<compile_context>
chip_gen: v7x
topology: tpu7x:2x2x1
jax: 0.10.0
libtpu: 0.0.40
codegen_flags: <defaults>
</compile_context>

<pallas_src>
import jax
import jax.numpy as jnp
from jax.experimental import pallas as pl
from jax.experimental.pallas import tpu as pltpu


def upsampling_kernel(x_ref, w_ref, b_ref, r_ref, o_ref):
    # x_ref: (1, TH, W, C)        input tile (pre-upsample), NHWC
    # w_ref: (C, Co)              1x1 conv weight, transposed for matmul
    # b_ref: (1, Co)              bias (f32)
    # r_ref: (1, TH, 2, 2W, Co)   skip tile, 2H pre-split as (H, 2)
    # o_ref: (1, TH, 2, 2W, C)    output tile, C = 2*Co
    _, TH, W, C = x_ref.shape
    Co = w_ref.shape[1]

    # 1x1 conv == per-pixel matmul over channels (MXU), f32 accumulate.
    x = x_ref[0].reshape(TH * W, C)
    y = jnp.dot(x, w_ref[...], preferred_element_type=jnp.float32) + b_ref[...]
    y = y.astype(o_ref.dtype)                     # cast early: 1x work, fewer f32 vregs

    # Nearest 2x along W: (TH*W, Co) -> (TH*W, 2, Co) -> (TH, 2W, Co).
    # The lane dim (Co) is untouched; only sublane-side regrouping.
    y = jnp.broadcast_to(y[:, None, :], (TH * W, 2, Co)).reshape(TH, 2 * W, Co)

    # Nearest 2x along H (the split (H, 2) axis) fused with the channel concat:
    # two dense slice stores for y, one pass-through slice store for r.
    o_ref[0, :, 0, :, pl.ds(0, Co)] = y
    o_ref[0, :, 1, :, pl.ds(0, Co)] = y
    o_ref[0, :, :, :, pl.ds(Co, Co)] = r_ref[0]


def _round_up(v, m):
    return -(-v // m) * m


def _pick_tile_h(H, W, C, Co, itemsize, budget_bytes):
    """Largest divisor TH of H whose double-buffered blocks fit the budget."""
    def padded_elems(shape):
        s = list(shape)
        s[-1] = _round_up(s[-1], 128)   # lanes
        s[-2] = _round_up(s[-2], 8)     # sublanes
        n = 1
        for d in s:
            n *= d
        return n

    best = 1
    for th in range(1, H + 1):
        if H % th:
            continue
        blocks = (padded_elems((th, W, C))              # x
                  + padded_elems((th, 2, 2 * W, Co))    # r
                  + padded_elems((th, 2, 2 * W, C)))    # out
        interm = 3 * padded_elems((th, 2 * W, Co)) * 4  # f32 y / y_wide scratch
        if 2 * blocks * itemsize + interm <= budget_bytes:
            best = th
    return best


def upsampling_forward(x, r, weight, bias, *, tile_h=None,
                       vmem_budget_bytes=12 << 20, vmem_limit_bytes=None):
    """NHWC fast path (no layout transposes around the kernel).

    x: (N, H, W, C), r: (N, 2H, 2W, C//2),
    weight: (Co, C, 1, 1) torch Conv2d layout, bias: (Co,).
    Returns (N, 2H, 2W, C) NHWC: channels [0, Co) = conv(upsample(x)),
    channels [Co, C) = r.
    """
    N, H, W, C = x.shape
    Co = weight.shape[0]
    assert Co == C // 2 and r.shape == (N, 2 * H, 2 * W, Co)

    w = jnp.transpose(weight[:, :, 0, 0], (1, 0)).astype(x.dtype)   # (C, Co)
    b = bias.reshape(1, Co).astype(jnp.float32)

    if tile_h is None:
        tile_h = _pick_tile_h(H, W, C, Co, x.dtype.itemsize, vmem_budget_bytes)
    TH = tile_h
    assert H % TH == 0, "tile_h must divide H"

    # Free bitcast view: split 2H -> (H, 2); trailing (2W, Co) layout unchanged.
    r_v = r.reshape(N, H, 2, 2 * W, Co)

    out_v = pl.pallas_call(
        upsampling_kernel,
        out_shape=jax.ShapeDtypeStruct((N, H, 2, 2 * W, C), x.dtype),
        grid_spec=pltpu.PrefetchScalarGridSpec(
            num_scalar_prefetch=0,
            grid=(N, H // TH),
            in_specs=[
                pl.BlockSpec((1, TH, W, C), lambda n, h: (n, h, 0, 0)),
                pl.BlockSpec((C, Co), lambda n, h: (0, 0)),
                pl.BlockSpec((1, Co), lambda n, h: (0, 0)),
                pl.BlockSpec((1, TH, 2, 2 * W, Co),
                             lambda n, h: (n, h, 0, 0, 0)),
            ],
            out_specs=pl.BlockSpec((1, TH, 2, 2 * W, C),
                                   lambda n, h: (n, h, 0, 0, 0)),
        ),
        compiler_params=pltpu.CompilerParams(
            dimension_semantics=("parallel", "parallel"),
            vmem_limit_bytes=vmem_limit_bytes),
    )(x, w, b, r_v)

    # Free: merges the leading (H, 2) dims back into 2H.
    return out_v.reshape(N, 2 * H, 2 * W, C)


def upsampling_forward_nchw(x_nchw, r_nchw, weight, bias, **kw):
    """PyTorch-layout (NCHW) compatibility wrapper.

    Prefer `upsampling_forward` (NHWC) inside a model: these transposes are
    extra full HBM passes and dominate this memory-bound op.
    """
    x = jnp.transpose(x_nchw, (0, 2, 3, 1))
    r = jnp.transpose(r_nchw, (0, 2, 3, 1))
    out = upsampling_forward(x, r, weight, bias, **kw)
    return jnp.transpose(out, (0, 3, 1, 2))


if __name__ == "__main__":
    # Small shapes consistent with the module: C=4 -> Co=2.
    N, C, H, W = 2, 4, 16, 16
    Co = C // 2

    key = jax.random.PRNGKey(0)
    kx, kr, kw, kb = jax.random.split(key, 4)

    # NHWC activations (TPU-native hot path, no transposes around the kernel).
    x = jax.random.normal(kx, (N, H, W, C), dtype=jnp.float32)
    r = jax.random.normal(kr, (N, 2 * H, 2 * W, Co), dtype=jnp.float32)

    # Deterministic Conv2d(C, C//2, 1, 1) parameters (kaiming-uniform-like).
    fan_in = C  # C * 1 * 1
    bound = 1.0 / jnp.sqrt(fan_in)
    weight = jax.random.uniform(kw, (Co, C, 1, 1), jnp.float32, -bound, bound)
    bias = jax.random.uniform(kb, (Co,), jnp.float32, -bound, bound)

    out = jax.block_until_ready(upsampling_forward(x, r, weight, bias))

    # Pure-JAX reference of the PyTorch forward, in NHWC.
    up = jnp.repeat(jnp.repeat(x, 2, axis=1), 2, axis=2)            # (N,2H,2W,C)
    conv = jnp.einsum("nhwc,oc->nhwo", up, weight[:, :, 0, 0]) + bias
    ref = jnp.concatenate([conv, r], axis=-1)

    assert out.shape == (N, 2 * H, 2 * W, C)
    assert jnp.allclose(out, ref, atol=1e-5, rtol=1e-5)

    # PyTorch-layout (NCHW) wrapper parity check against the module convention.
    x_nchw = jnp.transpose(x, (0, 3, 1, 2))
    r_nchw = jnp.transpose(r, (0, 3, 1, 2))
    out_nchw = jax.block_until_ready(
        upsampling_forward_nchw(x_nchw, r_nchw, weight, bias))
    assert out_nchw.shape == (N, C, 2 * H, 2 * W)
    assert jnp.allclose(out_nchw, jnp.transpose(ref, (0, 3, 1, 2)),
                        atol=1e-5, rtol=1e-5)

    print("KERNEL_OK")
</pallas_src>

<mosaic_0001>
module attributes {stable_mosaic.version = 11 : i64} {
  func.func @upsampling_kernel(%arg0: i32, %arg1: i32, %arg2: memref<1x16x16x4xf32, #tpu.memory_space<vmem>>, %arg3: memref<4x2xf32, #tpu.memory_space<vmem>>, %arg4: memref<1x2xf32, #tpu.memory_space<vmem>>, %arg5: memref<1x16x2x32x2xf32, #tpu.memory_space<vmem>>, %arg6: memref<1x16x2x32x4xf32, #tpu.memory_space<vmem>>) attributes {dimension_semantics = [#tpu.dimension_semantics<parallel>, #tpu.dimension_semantics<parallel>], iteration_bounds = array<i64: 2, 1>, scalar_prefetch = 0 : i64, scratch_operands = 0 : i64, tpu.core_type = #tpu.core_type<tc>, window_params = [{transform_indices = @transform_0, window_bounds = array<i64: 1, 16, 16, 4>}, {pipeline_mode = #tpu.pipeline_mode<synchronous>, transform_indices = @transform_1, window_bounds = array<i64: 4, 2>}, {pipeline_mode = #tpu.pipeline_mode<synchronous>, transform_indices = @transform_2, window_bounds = array<i64: 1, 2>}, {transform_indices = @transform_3, window_bounds = array<i64: 1, 16, 2, 32, 2>}, {transform_indices = @transform_4, window_bounds = array<i64: 1, 16, 2, 32, 4>}]} {
    %c0 = arith.constant 0 : index
    %c0_0 = arith.constant 0 : index
    %c0_1 = arith.constant 0 : index
    %c0_2 = arith.constant 0 : index
    %0 = vector.load %arg2[%c0, %c0_0, %c0_1, %c0_2] : memref<1x16x16x4xf32, #tpu.memory_space<vmem>>, vector<1x16x16x4xf32>
    %1 = vector.shape_cast %0 : vector<1x16x16x4xf32> to vector<16x16x4xf32>
    %2 = vector.shape_cast %1 : vector<16x16x4xf32> to vector<256x4xf32>
    %c0_3 = arith.constant 0 : index
    %c0_4 = arith.constant 0 : index
    %3 = vector.load %arg3[%c0_3, %c0_4] : memref<4x2xf32, #tpu.memory_space<vmem>>, vector<4x2xf32>
    %cst = arith.constant dense<0.000000e+00> : vector<256x2xf32>
    %4 = tpu.matmul %2, %3, %cst {dimension_numbers = #tpu.dot_dimension_numbers<[1], [0], [0], [1], [0, 0, 1, 1], [], []>} : vector<256x4xf32>, vector<4x2xf32>, vector<256x2xf32> -> vector<256x2xf32>
    %c0_5 = arith.constant 0 : index
    %c0_6 = arith.constant 0 : index
    %5 = vector.load %arg4[%c0_5, %c0_6] : memref<1x2xf32, #tpu.memory_space<vmem>>, vector<1x2xf32>
    %6 = vector.broadcast %5 : vector<1x2xf32> to vector<256x2xf32>
    %7 = arith.addf %4, %6 : vector<256x2xf32>
    %8 = vector.shape_cast %7 : vector<256x2xf32> to vector<256x1x2xf32>
    %9 = vector.shape_cast %8 : vector<256x1x2xf32> to vector<256x1x2xf32>
    %10 = vector.broadcast %9 : vector<256x1x2xf32> to vector<256x2x2xf32>
    %11 = vector.shape_cast %10 : vector<256x2x2xf32> to vector<16x32x2xf32>
    %c0_7 = arith.constant 0 : index
    %c0_8 = arith.constant 0 : index
    %c0_9 = arith.constant 0 : index
    %c0_10 = arith.constant 0 : index
    %c0_11 = arith.constant 0 : index
    %12 = vector.load %arg6[%c0_7, %c0_8, %c0_9, %c0_10, %c0_11] : memref<1x16x2x32x4xf32, #tpu.memory_space<vmem>>, vector<1x16x1x32x2xf32>
    %13 = vector.shape_cast %12 : vector<1x16x1x32x2xf32> to vector<16x32x2xf32>
    %14 = vector.shape_cast %11 : vector<16x32x2xf32> to vector<1x16x1x32x2xf32>
    tpu.vector_store %arg6[%c0_7, %c0_8, %c0_9, %c0_10, %c0_11], %14 {strides = array<i32>} : memref<1x16x2x32x4xf32, #tpu.memory_space<vmem>>, vector<1x16x1x32x2xf32>,
    %c0_12 = arith.constant 0 : index
    %c0_13 = arith.constant 0 : index
    %c1 = arith.constant 1 : index
    %c0_14 = arith.constant 0 : index
    %c0_15 = arith.constant 0 : index
    %15 = vector.load %arg6[%c0_12, %c0_13, %c1, %c0_14, %c0_15] : memref<1x16x2x32x4xf32, #tpu.memory_space<vmem>>, vector<1x16x1x32x2xf32>
    %16 = vector.shape_cast %15 : vector<1x16x1x32x2xf32> to vector<16x32x2xf32>
    %17 = vector.shape_cast %11 : vector<16x32x2xf32> to vector<1x16x1x32x2xf32>
    tpu.vector_store %arg6[%c0_12, %c0_13, %c1, %c0_14, %c0_15], %17 {strides = array<i32>} : memref<1x16x2x32x4xf32, #tpu.memory_space<vmem>>, vector<1x16x1x32x2xf32>,
    %c0_16 = arith.constant 0 : index
    %c0_17 = arith.constant 0 : index
    %c0_18 = arith.constant 0 : index
    %c0_19 = arith.constant 0 : index
    %c0_20 = arith.constant 0 : index
    %18 = vector.load %arg5[%c0_16, %c0_17, %c0_18, %c0_19, %c0_20] : memref<1x16x2x32x2xf32, #tpu.memory_space<vmem>>, vector<1x16x2x32x2xf32>
    %19 = vector.shape_cast %18 : vector<1x16x2x32x2xf32> to vector<16x2x32x2xf32>
    %c0_21 = arith.constant 0 : index
    %c0_22 = arith.constant 0 : index
    %c0_23 = arith.constant 0 : index
    %c0_24 = arith.constant 0 : index
    %c2 = arith.constant 2 : index
    %20 = vector.load %arg6[%c0_21, %c0_22, %c0_23, %c0_24, %c2] : memref<1x16x2x32x4xf32, #tpu.memory_space<vmem>>, vector<1x16x2x32x2xf32>
    %21 = vector.shape_cast %20 : vector<1x16x2x32x2xf32> to vector<16x2x32x2xf32>
    %22 = vector.shape_cast %19 : vector<16x2x32x2xf32> to vector<1x16x2x32x2xf32>
    tpu.vector_store %arg6[%c0_21, %c0_22, %c0_23, %c0_24, %c2], %22 {strides = array<i32>} : memref<1x16x2x32x4xf32, #tpu.memory_space<vmem>>, vector<1x16x2x32x2xf32>,
    return
  }
  func.func @transform_0(%arg0: i32, %arg1: i32) -> (i32, i32, i32, i32) {
    %c0_i32 = arith.constant 0 : i32
    %c0_i32_0 = arith.constant 0 : i32
    %c0_i32_1 = arith.constant 0 : i32
    return %arg0, %arg1, %c0_i32, %c0_i32_0 : i32, i32, i32, i32
  }
  func.func @transform_1(%arg0: i32, %arg1: i32) -> (i32, i32) {
    %c0_i32 = arith.constant 0 : i32
    %c0_i32_0 = arith.constant 0 : i32
    %c0_i32_1 = arith.constant 0 : i32
    return %c0_i32, %c0_i32_0 : i32, i32
  }
  func.func @transform_2(%arg0: i32, %arg1: i32) -> (i32, i32) {
    %c0_i32 = arith.constant 0 : i32
    %c0_i32_0 = arith.constant 0 : i32
    %c0_i32_1 = arith.constant 0 : i32
    return %c0_i32, %c0_i32_0 : i32, i32
  }
  func.func @transform_3(%arg0: i32, %arg1: i32) -> (i32, i32, i32, i32, i32) {
    %c0_i32 = arith.constant 0 : i32
    %c0_i32_0 = arith.constant 0 : i32
    %c0_i32_1 = arith.constant 0 : i32
    %c0_i32_2 = arith.constant 0 : i32
    return %arg0, %arg1, %c0_i32, %c0_i32_0, %c0_i32_1 : i32, i32, i32, i32, i32
  }
  func.func @transform_4(%arg0: i32, %arg1: i32) -> (i32, i32, i32, i32, i32) {
    %c0_i32 = arith.constant 0 : i32
    %c0_i32_0 = arith.constant 0 : i32
    %c0_i32_1 = arith.constant 0 : i32
    %c0_i32_2 = arith.constant 0 : i32
    return %arg0, %arg1, %c0_i32, %c0_i32_0, %c0_i32_1 : i32, i32, i32, i32, i32
  }
}

</mosaic_0001>

<bundles_post_ra>
// kernel: tpu_custom_call.1
= control target key start
LH: loop header
LB: loop body
LE: loop exit
PB: predicated region body
PF: predicated region fallthrough
CT: control target
= control target key end

     0   :  { %s5719_s15 = smov 0   ;;  %s5721_s16 = smov 0   ;;  %s7933_s0 = inlined_call_operand.vmem [shape: f32[2,16,16,4], index: 0, kind: input, shape index: {}]   ;;  %s7934_s1 = inlined_call_operand.vmem [shape: f32[4,2], index: 1, kind: input, shape index: {}]   ;;  %s7935_s2 = inlined_call_operand.vmem [shape: f32[1,2], index: 2, kind: input, shape index: {}]   ;;  %s7936_s3 = inlined_call_operand.vmem [shape: f32[2,16,2,32,2], index: 3, kind: input, shape index: {}]   ;;  %s7937_s4 = inlined_call_operand.vmem [shape: f32[2,16,2,32,4], index: 4, kind: output, shape index: {}]  }
   0x1   :  { %s5723_s17 = smov 0  }
   0x2 LB: > { %s26_s18 = sadd.s32 1, %s5685_s16  ;;  %p5443_p0 = scmp.ge.s32.totalorder %s5689_s17, 1  ;;  %s5689_s17 = sphi %s5723_s17, %s14_s17   ;;  %s5685_s16 = sphi %s5721_s16, %s8060_s16   ;;  %s5681_s15 = sphi %s5719_s15, %s8059_s15  }
   0x3   : > { %p28_p1 = scmp.ge.s32.totalorder %s26_s18, 2  ;;  %p202_p2 = scmp.lt.s32.totalorder %s5689_s17, 3 }
   0x5   : > { %s8062_s18 = smov (%p28_p1, %s26_s18), 0  ;;  %p203_p3 = pnand %p5443_p0, %p202_p2 }
   0x7   : > { %206 = sbr.rel (%p203_p3) target bundleno = 532 (0x214), region = 36 }
   0xe   : > { %v313_v0 = vld [vmem:[%s7934_s1] sm:$0xf]  ;;  %vm418_vm0 = vcmask 1043456   ;;  %p249_p4 = scmp.lt.s32.totalorder %s5681_s15, 1  ;;  %vm321_vm1 = vcmask 31744   ;;  %s5691_s29 = smov 2  }
   0xf   : > { %5586 = vmatprep.subr.msk.mxu0 %vm418_vm0, %v313_v0  ;;  %5636 = vmatprep.subr.msk.mxu1 %vm418_vm0, %v313_v0  ;;  %vm4423_vm2 = vcmask 15360   ;;  %vm5193_vm3 = vcmask 31760  }
  0x10   : > { %5587 = vmatpush3.msk.msra.mxu0 %vm418_vm0, %v313_v0  ;;  %s8064_s15 = smov (!%p249_p4, %s5681_s15), 1  ;;  %5637 = vmatpush3.msk.msra.mxu1 %vm418_vm0, %v313_v0 }
  0x11   : > { %s5551_s21 = sshll.u32 %s8064_s15, 10  ;;  %s5550_s22 = sshll.u32 %s8064_s15, 8 }
  0x12   : > { %s5749_s25 = scalar_lea.vmem %s7936_s3, %s5551_s21  ;;  %s5756_s28 = scalar_lea.vmem %s7933_s0, %s5550_s22 }
  0x13   : > { %v4555_v1 = vld [vmem:[%s5749_s25 + $0x10] sm:$0xff]  ;;  %v4553_v2 = vld [vmem:[%s5749_s25] sm:$0xff]  ;;  %v282_v4 = vld [vmem:[%s5756_s28 + $0x8] sm:$0xff]  ;;  %s6221_s8 = scalar_lea.vmem %s7937_s4, %s5551_s21 }
  0x14   : > { %4813 = vrot.lane.b32.xlu1 %v4555_v1, %s5691_s29  ;;  %4809 = vrot.lane.b32.xlu0 %v4553_v2, %s5691_s29  ;;  %v281_v3 = vld [vmem:[%s5756_s28] sm:$0xff]  ;;  %v4556_v5 = vld [vmem:[%s5749_s25 + $0x18] sm:$0xff] }
  0x15   : > { %5588 = vmatprep.mubr.msk.f32.mxu0 %vm321_vm1, %v281_v3  ;;  %v4554_v6 = vld [vmem:[%s5749_s25 + $0x8] sm:$0xff]  ;;  %v283_v7 = vld [vmem:[%s5756_s28 + $0x10] sm:$0xff]  ;;  %v284_v8 = vld [vmem:[%s5756_s28 + $0x18] sm:$0xff] }
  0x16   : > { %5589 = vmatmul.mubr.msk.f32.vlgmr.msra.gmra.mrb[0].mxu0 %vm321_vm1, %v282_v4  ;;  %v297_v9 = vld [vmem:[%s5756_s28 + $0x80] sm:$0xff]  ;;  %v298_v10 = vld [vmem:[%s5756_s28 + $0x88] sm:$0xff]  ;;  %v287_v15 = vld [vmem:[%s5756_s28 + $0x30] sm:$0xff] }
  0x17   : > { %5591 = vmatprep.mubr.msk.f32.mxu0 %vm321_vm1, %v283_v7  ;;  %v285_v11 = vld [vmem:[%s5756_s28 + $0x20] sm:$0xff]  ;;  %v4558_v12 = vld [vmem:[%s5749_s25 + $0x28] sm:$0xff]  ;;  %5612 = vmatprep.mubr.msk.f32.mxu1 %vm321_vm1, %v297_v9  ;;  %v4560_v16 = vld [vmem:[%s5749_s25 + $0x38] sm:$0xff] }
  0x18   : > { %4815 = vrot.lane.b32.xlu1 %v4556_v5, %s5691_s29  ;;  %4811 = vrot.lane.b32.xlu0 %v4554_v6, %s5691_s29  ;;  %v4557_v13 = vld [vmem:[%s5749_s25 + $0x20] sm:$0xff]  ;;  %v286_v14 = vld [vmem:[%s5756_s28 + $0x28] sm:$0xff] }
  0x19   : > { %5613 = vmatmul.mubr.msk.f32.vlgmr.msra.gmra.mrb[0].mxu1 %vm321_vm1, %v298_v10  ;;  %v4559_v17 = vld [vmem:[%s5749_s25 + $0x30] sm:$0xff]  ;;  %v300_v19 = vld [vmem:[%s5756_s28 + $0x98] sm:$0xff]  ;;  %v289_v21 = vld [vmem:[%s5756_s28 + $0x40] sm:$0xff] }
  0x1a   : > { %5592 = vmatmul.mubr.msk.f32.gmra.mrb[2].mxu0 %vm321_vm1, %v284_v8  ;;  %v299_v18 = vld [vmem:[%s5756_s28 + $0x90] sm:$0xff]  ;;  %v288_v20 = vld [vmem:[%s5756_s28 + $0x38] sm:$0xff]  ;;  %v4562_v22 = vld [vmem:[%s5749_s25 + $0x48] sm:$0xff] }
  0x1b   : > { %5594 = vmatprep.mubr.msk.f32.mxu0 %vm321_vm1, %v285_v11  ;;  %5615 = vmatprep.mubr.msk.f32.mxu1 %vm321_vm1, %v299_v18  ;;  %v4561_v23 = vld [vmem:[%s5749_s25 + $0x40] sm:$0xff]  ;;  %v302_v25 = vld [vmem:[%s5756_s28 + $0xa8] sm:$0xff]  ;;  %v291_v27 = vld [vmem:[%s5756_s28 + $0x50] sm:$0xff] }
  0x1c   : > { %4819 = vrot.lane.b32.xlu1 %v4558_v12, %s5691_s29  ;;  %4817 = vrot.lane.b32.xlu0 %v4557_v13, %s5691_s29  ;;  %v301_v24 = vld [vmem:[%s5756_s28 + $0xa0] sm:$0xff]  ;;  %v290_v26 = vld [vmem:[%s5756_s28 + $0x48] sm:$0xff] }
  0x1d   : > { %5616 = vmatmul.mubr.msk.f32.gmra.mrb[2].mxu1 %vm321_vm1, %v300_v19  ;;  %v4564_v28 = vld [vmem:[%s5749_s25 + $0x58] sm:$0xff]  ;;  %v4563_v29 = vld [vmem:[%s5749_s25 + $0x50] sm:$0xff]  ;;  %v293_v33 = vld [vmem:[%s5756_s28 + $0x60] sm:$0xff] }
  0x1e   : > { %5595 = vmatmul.mubr.msk.f32.gmra.mrb[4].mxu0 %vm321_vm1, %v286_v14  ;;  %5618 = vmatprep.mubr.msk.f32.mxu1 %vm321_vm1, %v301_v24  ;;  %v303_v30 = vld [vmem:[%s5756_s28 + $0xb0] sm:$0xff]  ;;  %v304_v31 = vld [vmem:[%s5756_s28 + $0xb8] sm:$0xff]  ;;  %v4566_v34 = vld [vmem:[%s5749_s25 + $0x68] sm:$0xff] }
  0x1f   : > { %5597 = vmatprep.mubr.msk.f32.mxu0 %vm321_vm1, %v287_v15  ;;  %v292_v32 = vld [vmem:[%s5756_s28 + $0x58] sm:$0xff]  ;;  %v4565_v35 = vld [vmem:[%s5749_s25 + $0x60] sm:$0xff]  ;;  %v306_v37 = vld [vmem:[%s5756_s28 + $0xc8] sm:$0xff] }
  0x20   : > { %4823 = vrot.lane.b32.xlu1 %v4560_v16, %s5691_s29  ;;  %4821 = vrot.lane.b32.xlu0 %v4559_v17, %s5691_s29  ;;  %v305_v36 = vld [vmem:[%s5756_s28 + $0xc0] sm:$0xff]  ;;  %v294_v38 = vld [vmem:[%s5756_s28 + $0x68] sm:$0xff] }
  0x21   : > { %5619 = vmatmul.mubr.msk.f32.gmra.mrb[4].mxu1 %vm321_vm1, %v302_v25  ;;  %v295_v39 = vld [vmem:[%s5756_s28 + $0x70] sm:$0xff]  ;;  %v4568_v40 = vld [vmem:[%s5749_s25 + $0x78] sm:$0xff]  ;;  %v4570_v45 = vld [vmem:[%s5749_s25 + $0x88] sm:$0xff] }
  0x22   : > { %5598 = vmatmul.mubr.msk.f32.gmra.mrb[6].mxu0 %vm321_vm1, %v288_v20  ;;  %5621 = vmatprep.mubr.msk.f32.mxu1 %vm321_vm1, %v303_v30  ;;  %v4567_v41 = vld [vmem:[%s5749_s25 + $0x70] sm:$0xff]  ;;  %v308_v43 = vld [vmem:[%s5756_s28 + $0xd8] sm:$0xff]  ;;  %v4569_v46 = vld [vmem:[%s5749_s25 + $0x80] sm:$0xff] }
  0x23   : > { %5600 = vmatprep.mubr.msk.f32.mxu0 %vm321_vm1, %v289_v21  ;;  %v307_v42 = vld [vmem:[%s5756_s28 + $0xd0] sm:$0xff]  ;;  %v296_v44 = vld [vmem:[%s5756_s28 + $0x78] sm:$0xff]  ;;  %v309_v47 = vld [vmem:[%s5756_s28 + $0xe0] sm:$0xff] }
  0x24   : > { %4827 = vrot.lane.b32.xlu1 %v4562_v22, %s5691_s29  ;;  %4825 = vrot.lane.b32.xlu0 %v4561_v23, %s5691_s29  ;;  %v310_v48 = vld [vmem:[%s5756_s28 + $0xe8] sm:$0xff]  ;;  %v311_v49 = vld [vmem:[%s5756_s28 + $0xf0] sm:$0xff] }
  0x25   : > { %5622 = vmatmul.mubr.msk.f32.gmra.mrb[6].mxu1 %vm321_vm1, %v304_v31  ;;  %v4572_v50 = vld [vmem:[%s5749_s25 + $0x98] sm:$0xff]  ;;  %v4571_v51 = vld [vmem:[%s5749_s25 + $0x90] sm:$0xff]  ;;  %v4574_v53 = vld [vmem:[%s5749_s25 + $0xa8] sm:$0xff] }
  0x26   : > { %5601 = vmatmul.mubr.msk.f32.gmra.mrb[8].mxu0 %vm321_vm1, %v290_v26  ;;  %5624 = vmatprep.mubr.msk.f32.mxu1 %vm321_vm1, %v305_v36  ;;  %v312_v52 = vld [vmem:[%s5756_s28 + $0xf8] sm:$0xff]  ;;  %v4573_v54 = vld [vmem:[%s5749_s25 + $0xa0] sm:$0xff]  ;;  %v4575_v56 = vld [vmem:[%s5749_s25 + $0xb0] sm:$0xff] }
  0x27   : > { %5603 = vmatprep.mubr.msk.f32.mxu0 %vm321_vm1, %v291_v27  ;;  %v4576_v55 = vld [vmem:[%s5749_s25 + $0xb8] sm:$0xff]  ;;  %v4578_v57 = vld [vmem:[%s5749_s25 + $0xc8] sm:$0xff]  ;;  %v4577_v58 = vld [vmem:[%s5749_s25 + $0xc0] sm:$0xff] }
  0x28   : > { %4831 = vrot.lane.b32.xlu1 %v4564_v28, %s5691_s29  ;;  %4829 = vrot.lane.b32.xlu0 %v4563_v29, %s5691_s29  ;;  %v4580_v59 = vld [vmem:[%s5749_s25 + $0xd8] sm:$0xff]  ;;  %v4579_v60 = vld [vmem:[%s5749_s25 + $0xd0] sm:$0xff] }
  0x29   : > { %5625 = vmatmul.mubr.msk.f32.gmra.mrb[8].mxu1 %vm321_vm1, %v306_v37  ;;  %v4582_v61 = vld [vmem:[%s5749_s25 + $0xe8] sm:$0xff]  ;;  %v4581_v62 = vld [vmem:[%s5749_s25 + $0xe0] sm:$0xff]  ;;  %v4584_v63 = vld [vmem:[%s5749_s25 + $0xf8] sm:$0xff] }
  0x2a   : > { %5604 = vmatmul.mubr.msk.f32.gmra.mrb[10].mxu0 %vm321_vm1, %v292_v32  ;;  %5627 = vmatprep.mubr.msk.f32.mxu1 %vm321_vm1, %v307_v42  ;;  %v4583_v0 = vld [vmem:[%s5749_s25 + $0xf0] sm:$0xff]  ;;  %v4586_v1 = vld [vmem:[%s5749_s25 + $0x108] sm:$0xff]  ;;  %v4585_v2 = vld [vmem:[%s5749_s25 + $0x100] sm:$0xff] }
  0x2b   : > { %5606 = vmatprep.mubr.msk.f32.mxu0 %vm321_vm1, %v293_v33  ;;  %v4588_v3 = vld [vmem:[%s5749_s25 + $0x118] sm:$0xff]  ;;  %v4587_v4 = vld [vmem:[%s5749_s25 + $0x110] sm:$0xff]  ;;  %v4590_v5 = vld [vmem:[%s5749_s25 + $0x128] sm:$0xff] }
  0x2c   : > { %4835 = vrot.lane.b32.xlu1 %v4566_v34, %s5691_s29  ;;  %4833 = vrot.lane.b32.xlu0 %v4565_v35, %s5691_s29  ;;  %v4589_v6 = vld [vmem:[%s5749_s25 + $0x120] sm:$0xff]  ;;  %v4592_v7 = vld [vmem:[%s5749_s25 + $0x138] sm:$0xff] }
  0x2d   : > { %5628 = vmatmul.mubr.msk.f32.gmra.mrb[10].mxu1 %vm321_vm1, %v308_v43  ;;  %v4591_v8 = vld [vmem:[%s5749_s25 + $0x130] sm:$0xff]  ;;  %v4594_v9 = vld [vmem:[%s5749_s25 + $0x148] sm:$0xff]  ;;  %v4593_v10 = vld [vmem:[%s5749_s25 + $0x140] sm:$0xff] }
  0x2e   : > { %5607 = vmatmul.mubr.msk.f32.gmra.mrb[12].mxu0 %vm321_vm1, %v294_v38  ;;  %5630 = vmatprep.mubr.msk.f32.mxu1 %vm321_vm1, %v309_v47  ;;  %v4596_v11 = vld [vmem:[%s5749_s25 + $0x158] sm:$0xff]  ;;  %v4595_v12 = vld [vmem:[%s5749_s25 + $0x150] sm:$0xff]  ;;  %v4598_v13 = vld [vmem:[%s5749_s25 + $0x168] sm:$0xff] }
  0x2f   : > { %5609 = vmatprep.mubr.msk.f32.mxu0 %vm321_vm1, %v295_v39  ;;  %v4597_v14 = vld [vmem:[%s5749_s25 + $0x160] sm:$0xff]  ;;  %v4600_v15 = vld [vmem:[%s5749_s25 + $0x178] sm:$0xff]  ;;  %v4599_v16 = vld [vmem:[%s5749_s25 + $0x170] sm:$0xff] }
  0x30   : > { %4839 = vrot.lane.b32.xlu1 %v4568_v40, %s5691_s29  ;;  %4837 = vrot.lane.b32.xlu0 %v4567_v41, %s5691_s29  ;;  %v4602_v17 = vld [vmem:[%s5749_s25 + $0x188] sm:$0xff]  ;;  %v4601_v18 = vld [vmem:[%s5749_s25 + $0x180] sm:$0xff] }
  0x31   : > { %5631 = vmatmul.mubr.msk.f32.gmra.mrb[12].mxu1 %vm321_vm1, %v310_v48  ;;  %v4604_v19 = vld [vmem:[%s5749_s25 + $0x198] sm:$0xff]  ;;  %v4603_v20 = vld [vmem:[%s5749_s25 + $0x190] sm:$0xff]  ;;  %v4606_v21 = vld [vmem:[%s5749_s25 + $0x1a8] sm:$0xff] }
  0x32   : > { %5610 = vmatmul.mubr.msk.f32.gmra.mrb[14].mxu0 %vm321_vm1, %v296_v44  ;;  %5633 = vmatprep.mubr.msk.f32.mxu1 %vm321_vm1, %v311_v49  ;;  %v4605_v22 = vld [vmem:[%s5749_s25 + $0x1a0] sm:$0xff]  ;;  %v4608_v23 = vld [vmem:[%s5749_s25 + $0x1b8] sm:$0xff]  ;;  %v4607_v24 = vld [vmem:[%s5749_s25 + $0x1b0] sm:$0xff] }
  0x33   : > { %v4610_v25 = vld [vmem:[%s5749_s25 + $0x1c8] sm:$0xff]  ;;  %v4609_v26 = vld [vmem:[%s5749_s25 + $0x1c0] sm:$0xff]  ;;  %v4612_v27 = vld [vmem:[%s5749_s25 + $0x1d8] sm:$0xff] }
  0x34   : > { %4843 = vrot.lane.b32.xlu1 %v4570_v45, %s5691_s29  ;;  %4841 = vrot.lane.b32.xlu0 %v4569_v46, %s5691_s29  ;;  %v4611_v28 = vld [vmem:[%s5749_s25 + $0x1d0] sm:$0xff]  ;;  %v4614_v31 = vld [vmem:[%s5749_s25 + $0x1e8] sm:$0xff] }
  0x35   : > { %5634 = vmatmul.mubr.msk.f32.gmra.mrb[14].mxu1 %vm321_vm1, %v312_v52  ;;  %v4613_v32 = vld [vmem:[%s5749_s25 + $0x1e0] sm:$0xff]  ;;  %v4616_v35 = vld [vmem:[%s5749_s25 + $0x1f8] sm:$0xff]  ;;  %v4615_v36 = vld [vmem:[%s5749_s25 + $0x1f0] sm:$0xff] }
  0x36   : > { %v4618_v39 = vld [vmem:[%s5749_s25 + $0x208] sm:$0xff]  ;;  %v4617_v40 = vld [vmem:[%s5749_s25 + $0x200] sm:$0xff]  ;;  %v4620_v43 = vld [vmem:[%s5749_s25 + $0x218] sm:$0xff] }
  0x37   : > { %v4619_v44 = vld [vmem:[%s5749_s25 + $0x210] sm:$0xff]  ;;  %v4622_v47 = vld [vmem:[%s5749_s25 + $0x228] sm:$0xff]  ;;  %v4621_v48 = vld [vmem:[%s5749_s25 + $0x220] sm:$0xff] }
  0x38   : > { %4847 = vrot.lane.b32.xlu1 %v4572_v50, %s5691_s29  ;;  %4845 = vrot.lane.b32.xlu0 %v4571_v51, %s5691_s29  ;;  %v4624_v51 = vld [vmem:[%s5749_s25 + $0x238] sm:$0xff]  ;;  %v4623_v52 = vld [vmem:[%s5749_s25 + $0x230] sm:$0xff] }
  0x3c   : > { %4851 = vrot.lane.b32.xlu1 %v4574_v53, %s5691_s29  ;;  %4849 = vrot.lane.b32.xlu0 %v4573_v54, %s5691_s29 }
  0x40   : > { %4855 = vrot.lane.b32.xlu1 %v4576_v55, %s5691_s29  ;;  %4853 = vrot.lane.b32.xlu0 %v4575_v56, %s5691_s29  ;;  %v4626_v55 = vld [vmem:[%s5749_s25 + $0x248] sm:$0xff]  ;;  %v4625_v56 = vld [vmem:[%s5749_s25 + $0x240] sm:$0xff] }
  0x44   : > { %4859 = vrot.lane.b32.xlu1 %v4578_v57, %s5691_s29  ;;  %4857 = vrot.lane.b32.xlu0 %v4577_v58, %s5691_s29 }
  0x48   : > { %4863 = vrot.lane.b32.xlu1 %v4580_v59, %s5691_s29  ;;  %4861 = vrot.lane.b32.xlu0 %v4579_v60, %s5691_s29  ;;  %v4628_v59 = vld [vmem:[%s5749_s25 + $0x258] sm:$0xff]  ;;  %v4627_v60 = vld [vmem:[%s5749_s25 + $0x250] sm:$0xff] }
  0x4c   : > { %4867 = vrot.lane.b32.xlu1 %v4582_v61, %s5691_s29  ;;  %4865 = vrot.lane.b32.xlu0 %v4581_v62, %s5691_s29 }
  0x50   : > { %4871 = vrot.lane.b32.xlu1 %v4584_v63, %s5691_s29  ;;  %4869 = vrot.lane.b32.xlu0 %v4583_v0, %s5691_s29  ;;  %v4630_v63 = vld [vmem:[%s5749_s25 + $0x268] sm:$0xff]  ;;  %v4629_v0 = vld [vmem:[%s5749_s25 + $0x260] sm:$0xff] }
  0x54   : > { %4875 = vrot.lane.b32.xlu1 %v4586_v1, %s5691_s29  ;;  %4873 = vrot.lane.b32.xlu0 %v4585_v2, %s5691_s29 }
  0x58   : > { %4879 = vrot.lane.b32.xlu1 %v4588_v3, %s5691_s29  ;;  %4877 = vrot.lane.b32.xlu0 %v4587_v4, %s5691_s29  ;;  %v4632_v3 = vld [vmem:[%s5749_s25 + $0x278] sm:$0xff]  ;;  %v4631_v4 = vld [vmem:[%s5749_s25 + $0x270] sm:$0xff] }
  0x5c   : > { %4883 = vrot.lane.b32.xlu1 %v4590_v5, %s5691_s29  ;;  %4881 = vrot.lane.b32.xlu0 %v4589_v6, %s5691_s29 }
  0x60   : > { %4887 = vrot.lane.b32.xlu1 %v4592_v7, %s5691_s29  ;;  %4885 = vrot.lane.b32.xlu0 %v4591_v8, %s5691_s29  ;;  %v4634_v7 = vld [vmem:[%s5749_s25 + $0x288] sm:$0xff]  ;;  %v4633_v8 = vld [vmem:[%s5749_s25 + $0x280] sm:$0xff] }
  0x64   : > { %4891 = vrot.lane.b32.xlu1 %v4594_v9, %s5691_s29  ;;  %4889 = vrot.lane.b32.xlu0 %v4593_v10, %s5691_s29 }
  0x68   : > { %4895 = vrot.lane.b32.xlu1 %v4596_v11, %s5691_s29  ;;  %4893 = vrot.lane.b32.xlu0 %v4595_v12, %s5691_s29  ;;  %v4636_v11 = vld [vmem:[%s5749_s25 + $0x298] sm:$0xff]  ;;  %v4635_v12 = vld [vmem:[%s5749_s25 + $0x290] sm:$0xff] }
  0x6c   : > { %4899 = vrot.lane.b32.xlu1 %v4598_v13, %s5691_s29  ;;  %4897 = vrot.lane.b32.xlu0 %v4597_v14, %s5691_s29 }
  0x70   : > { %4903 = vrot.lane.b32.xlu1 %v4600_v15, %s5691_s29  ;;  %4901 = vrot.lane.b32.xlu0 %v4599_v16, %s5691_s29  ;;  %v4638_v15 = vld [vmem:[%s5749_s25 + $0x2a8] sm:$0xff]  ;;  %v4637_v16 = vld [vmem:[%s5749_s25 + $0x2a0] sm:$0xff] }
  0x74   : > { %4907 = vrot.lane.b32.xlu1 %v4602_v17, %s5691_s29  ;;  %4905 = vrot.lane.b32.xlu0 %v4601_v18, %s5691_s29  ;;  %v4640_v17 = vld [vmem:[%s5749_s25 + $0x2b8] sm:$0xff]  ;;  %v4639_v18 = vld [vmem:[%s5749_s25 + $0x2b0] sm:$0xff] }
  0x78   : > { %4911 = vrot.lane.b32.xlu1 %v4604_v19, %s5691_s29  ;;  %4909 = vrot.lane.b32.xlu0 %v4603_v20, %s5691_s29 }
  0x7c   : > { %4915 = vrot.lane.b32.xlu1 %v4606_v21, %s5691_s29  ;;  %4913 = vrot.lane.b32.xlu0 %v4605_v22, %s5691_s29  ;;  %v4642_v21 = vld [vmem:[%s5749_s25 + $0x2c8] sm:$0xff]  ;;  %v4641_v22 = vld [vmem:[%s5749_s25 + $0x2c0] sm:$0xff] }
  0x80   : > { %4919 = vrot.lane.b32.xlu1 %v4608_v23, %s5691_s29  ;;  %4917 = vrot.lane.b32.xlu0 %v4607_v24, %s5691_s29 }
  0x84   : > { %4923 = vrot.lane.b32.xlu1 %v4610_v25, %s5691_s29  ;;  %4921 = vrot.lane.b32.xlu0 %v4609_v26, %s5691_s29  ;;  %v4644_v25 = vld [vmem:[%s5749_s25 + $0x2d8] sm:$0xff]  ;;  %v4643_v26 = vld [vmem:[%s5749_s25 + $0x2d0] sm:$0xff] }
  0x86   : > { %v5938_v29 = vpop.permute.xlu1 %4813  ;;  %v5940_v30 = vpop.permute.xlu0 %4809 }
  0x88   : > { %4927 = vrot.lane.b32.xlu1 %v4612_v27, %s5691_s29  ;;  %4925 = vrot.lane.b32.xlu0 %v4611_v28, %s5691_s29  ;;  %v4646_v27 = vld [vmem:[%s5749_s25 + $0x2e8] sm:$0xff]  ;;  %v4645_v28 = vld [vmem:[%s5749_s25 + $0x2e0] sm:$0xff] }
  0x8a   : > { %v5946_v33 = vpop.permute.xlu1 %4815  ;;  %v5948_v34 = vpop.permute.xlu0 %4811 }
  0x8c   : > { %4931 = vrot.lane.b32.xlu1 %v4614_v31, %s5691_s29  ;;  %4929 = vrot.lane.b32.xlu0 %v4613_v32, %s5691_s29 }
  0x8e   : > { %v5954_v37 = vpop.permute.xlu1 %4819  ;;  %v5956_v38 = vpop.permute.xlu0 %4817 }
  0x90   : > { %4935 = vrot.lane.b32.xlu1 %v4616_v35, %s5691_s29  ;;  %4933 = vrot.lane.b32.xlu0 %v4615_v36, %s5691_s29  ;;  %v4648_v35 = vld [vmem:[%s5749_s25 + $0x2f8] sm:$0xff]  ;;  %v4647_v36 = vld [vmem:[%s5749_s25 + $0x2f0] sm:$0xff] }
  0x92   : > { %v5962_v41 = vpop.permute.xlu1 %4823  ;;  %v5964_v42 = vpop.permute.xlu0 %4821 }
  0x94   : > { %4939 = vrot.lane.b32.xlu1 %v4618_v39, %s5691_s29  ;;  %4937 = vrot.lane.b32.xlu0 %v4617_v40, %s5691_s29 }
  0x96   : > { %v5970_v45 = vpop.permute.xlu1 %4827  ;;  %v5972_v46 = vpop.permute.xlu0 %4825 }
  0x98   : > { %4943 = vrot.lane.b32.xlu1 %v4620_v43, %s5691_s29  ;;  %4941 = vrot.lane.b32.xlu0 %v4619_v44, %s5691_s29  ;;  %v4650_v43 = vld [vmem:[%s5749_s25 + $0x308] sm:$0xff]  ;;  %v4649_v44 = vld [vmem:[%s5749_s25 + $0x300] sm:$0xff] }
  0x9a   : > { %v5978_v49 = vpop.permute.xlu1 %4831  ;;  %v5980_v50 = vpop.permute.xlu0 %4829 }
  0x9c   : > { %4947 = vrot.lane.b32.xlu1 %v4622_v47, %s5691_s29  ;;  %4945 = vrot.lane.b32.xlu0 %v4621_v48, %s5691_s29  ;;  %v4652_v47 = vld [vmem:[%s5749_s25 + $0x318] sm:$0xff]  ;;  %v4651_v48 = vld [vmem:[%s5749_s25 + $0x310] sm:$0xff] }
  0x9e   : > { %v5986_v53 = vpop.permute.xlu1 %4835  ;;  %v5988_v54 = vpop.permute.xlu0 %4833 }
  0xa0   : > { %4951 = vrot.lane.b32.xlu1 %v4624_v51, %s5691_s29  ;;  %4949 = vrot.lane.b32.xlu0 %v4623_v52, %s5691_s29 }
  0xa2   : > { %v5994_v57 = vpop.permute.xlu1 %4839  ;;  %v5996_v58 = vpop.permute.xlu0 %4837 }
  0xa4   : > { %4955 = vrot.lane.b32.xlu1 %v4626_v55, %s5691_s29  ;;  %4953 = vrot.lane.b32.xlu0 %v4625_v56, %s5691_s29  ;;  %v4654_v55 = vld [vmem:[%s5749_s25 + $0x328] sm:$0xff]  ;;  %v4653_v56 = vld [vmem:[%s5749_s25 + $0x320] sm:$0xff] }
  0xa6   : > { %v6002_v61 = vpop.permute.xlu1 %4843  ;;  %v6004_v62 = vpop.permute.xlu0 %4841 }
  0xa8   : > { %4959 = vrot.lane.b32.xlu1 %v4628_v59, %s5691_s29  ;;  %4957 = vrot.lane.b32.xlu0 %v4627_v60, %s5691_s29 }
  0xaa   : > { %v6010_v1 = vpop.permute.xlu1 %4847  ;;  %v6012_v2 = vpop.permute.xlu0 %4845 }
  0xac   : > { %4963 = vrot.lane.b32.xlu1 %v4630_v63, %s5691_s29  ;;  %4961 = vrot.lane.b32.xlu0 %v4629_v0, %s5691_s29  ;;  %v4656_v63 = vld [vmem:[%s5749_s25 + $0x338] sm:$0xff]  ;;  %v4655_v0 = vld [vmem:[%s5749_s25 + $0x330] sm:$0xff] }
  0xae   : > { %v6018_v5 = vpop.permute.xlu1 %4851  ;;  %v6020_v6 = vpop.permute.xlu0 %4849 }
  0xb0   : > { %4967 = vrot.lane.b32.xlu1 %v4632_v3, %s5691_s29  ;;  %4965 = vrot.lane.b32.xlu0 %v4631_v4, %s5691_s29  ;;  %v5692_v3 = vmov 1966171168  }
  0xb1   : > { %v681_v4 = vunpack.c.l.s4 %v5692_v3 }
  0xb2   : > { %v6026_v9 = vpop.permute.xlu0 %4853  ;;  %v6028_v10 = vpop.permute.xlu1 %4855 }
  0xb4   : > { %4971 = vrot.lane.b32.xlu1 %v4634_v7, %s5691_s29  ;;  %4969 = vrot.lane.b32.xlu0 %v4633_v8, %s5691_s29  ;;  %v683_v7 = vlaneseq  ;;  %v4658_v8 = vld [vmem:[%s5749_s25 + $0x348] sm:$0xff] }
  0xb6   : > { %v6034_v13 = vpop.permute.xlu0 %4857  ;;  %v6038_v14 = vpop.permute.xlu1 %4859 }
  0xb7   : > { %7939 = vst [vmem:[#allocation2_spill] sm:$0xff] %v6034_v13  ;;  %7940 = vst [vmem:[#allocation3_spill] sm:$0xff] %v6038_v14 }
  0xb8   : > { %4975 = vrot.lane.b32.xlu1 %v4636_v11, %s5691_s29  ;;  %4973 = vrot.lane.b32.xlu0 %v4635_v12, %s5691_s29  ;;  %v4657_v11 = vld [vmem:[%s5749_s25 + $0x340] sm:$0xff] }
  0xba   : > { %v6046_v19 = vpop.permute.xlu0 %4861  ;;  %v6048_v20 = vpop.permute.xlu1 %4863 }
  0xbb   : > { %7941 = vst [vmem:[#allocation4_spill] sm:$0xff] %v6048_v20 }
  0xbc   : > { %4979 = vrot.lane.b32.xlu1 %v4638_v15, %s5691_s29  ;;  %4977 = vrot.lane.b32.xlu0 %v4637_v16, %s5691_s29  ;;  %v682_v16 = vunpack.c.0.s8 %v681_v4 }
  0xbe   : > { %v6054_v23 = vpop.permute.xlu0 %4865  ;;  %v6058_v24 = vpop.permute.xlu1 %4867 }
  0xbf   : > { %7942 = vst [vmem:[#allocation5_spill] sm:$0xff] %v6054_v23  ;;  %7943 = vst [vmem:[#allocation6_spill] sm:$0xff] %v6058_v24 }
  0xc0   : > { %4983 = vrot.lane.b32.xlu1 %v4640_v17, %s5691_s29  ;;  %4981 = vrot.lane.b32.xlu0 %v4639_v18, %s5691_s29  ;;  %v684_v17 = vshrl.u32 %v683_v7, 7  ;;  %v4660_v18 = vld [vmem:[%s5749_s25 + $0x358] sm:$0xff] }
  0xc2   : > { %v6066_v31 = vpop.permute.xlu0 %4869  ;;  %v6068_v32 = vpop.permute.xlu1 %4871  ;;  %v6134_v3 = vsub.s32 0, %v684_v17 }
  0xc3   : > { %7944 = vst [vmem:[#allocation7_spill] sm:$0xff] %v6068_v32 }
  0xc4   : > { %4987 = vrot.lane.b32.xlu1 %v4642_v21, %s5691_s29  ;;  %4985 = vrot.lane.b32.xlu0 %v4641_v22, %s5691_s29  ;;  %v4659_v21 = vld [vmem:[%s5749_s25 + $0x350] sm:$0xff]  ;;  %v5693_v22 = vmov 1983009808  }
  0xc6   : > { %v6074_v39 = vpop.permute.xlu0 %4873  ;;  %v6078_v40 = vpop.permute.xlu1 %4875 }
  0xc7   : > { %7945 = vst [vmem:[#allocation8_spill] sm:$0xff] %v6074_v39  ;;  %7946 = vst [vmem:[#allocation9_spill] sm:$0xff] %v6078_v40  ;;  %v4665_v39 = vld [vmem:[%s5749_s25 + $0x380] sm:$0xff] }
  0xc8   : > { %4991 = vrot.lane.b32.xlu1 %v4644_v25, %s5691_s29  ;;  %4989 = vrot.lane.b32.xlu0 %v4643_v26, %s5691_s29  ;;  %v3274_v25 = vunpack.c.l.s4 %v5693_v22  ;;  %v6117_v26 = vld [vmem:[%s7935_s2] ss:$0 sm:$0xff] }
  0xca   : > { %v6086_v51 = vpop.permute.xlu0 %4877  ;;  %v6088_v52 = vpop.permute.xlu1 %4879 }
  0xcb   : > { %7947 = vst [vmem:[#allocation10_spill] sm:$0xff] %v6086_v51  ;;  %7948 = vst [vmem:[#allocation11_spill] sm:$0xff] %v6088_v52 }
  0xcc   : > { %4995 = vrot.lane.b32.xlu1 %v4646_v27, %s5691_s29  ;;  %4993 = vrot.lane.b32.xlu0 %v4645_v28, %s5691_s29  ;;  %v6123_v28 = vsub.s32 %v682_v16, %v684_v17  ;;  %v4664_v16 = vld [vmem:[%s5749_s25 + $0x378] sm:$0xff] }
  0xce   : > { %v6094_v59 = vpop.permute.xlu0 %4881  ;;  %v6098_v60 = vpop.permute.xlu1 %4883 }
  0xcf   : > { %7949 = vst [vmem:[#allocation12_spill] sm:$0xff] %v6094_v59  ;;  %7950 = vst [vmem:[#allocation13_spill] sm:$0xff] %v6098_v60 }
  0xd0   : > { %4999 = vrot.lane.b32.xlu1 %v4648_v35, %s5691_s29  ;;  %4997 = vrot.lane.b32.xlu0 %v4647_v36, %s5691_s29 }
  0xd2   : > { %v6106_v12 = vpop.permute.xlu0 %4885  ;;  %v6108_v15 = vpop.permute.xlu1 %4887 }
  0xd3   : > { %7951 = vst [vmem:[#allocation14_spill] sm:$0xff] %v6106_v12  ;;  %7952 = vst [vmem:[#allocation15_spill] sm:$0xff] %v6108_v15 }
  0xd4   : > { %5003 = vrot.lane.b32.xlu1 %v4650_v43, %s5691_s29  ;;  %5001 = vrot.lane.b32.xlu0 %v4649_v44, %s5691_s29  ;;  %v3275_v43 = vunpack.c.0.s8 %v3274_v25  ;;  %v4662_v44 = vld [vmem:[%s5749_s25 + $0x368] sm:$0xff] }
  0xd6   : > { %v6119_v27 = vpop.permute.xlu0 %4889  ;;  %v6125_v35 = vpop.permute.xlu1 %4891  ;;  %v6136_v4 = vsub.s32 %v3275_v43, %v684_v17  ;;  %v4663_v17 = vld [vmem:[%s5749_s25 + $0x370] sm:$0xff] }
  0xd7   : > { %7953 = vst [vmem:[#allocation16_spill] sm:$0xff] %v6119_v27  ;;  %7954 = vst [vmem:[#allocation17_spill] sm:$0xff] %v6125_v35 }
  0xd8   : > { %5007 = vrot.lane.b32.xlu1 %v4652_v47, %s5691_s29  ;;  %5005 = vrot.lane.b32.xlu0 %v4651_v48, %s5691_s29  ;;  %v4661_v47 = vld [vmem:[%s5749_s25 + $0x360] sm:$0xff] }
  0xda   : > { %v6150_v43 = vpop.permute.xlu1 %4895 }
  0xdb   : > { %7956 = vst [vmem:[#allocation19_spill] sm:$0xff] %v6150_v43 }
  0xdc   : > { %5011 = vrot.lane.b32.xlu1 %v4654_v55, %s5691_s29  ;;  %5009 = vrot.lane.b32.xlu0 %v4653_v56, %s5691_s29 }
  0xe0   : > { %5015 = vrot.lane.b32.xlu1 %v4656_v63, %s5691_s29  ;;  %5013 = vrot.lane.b32.xlu0 %v4655_v0, %s5691_s29 }
  0xe4   : > { %5019 = vrot.lane.b32.xlu1 %v4658_v8, %s5691_s29  ;;  %5017 = vrot.lane.b32.xlu0 %v4657_v11, %s5691_s29 }
  0xe8   : > { %5023 = vrot.lane.b32.xlu1 %v4660_v18, %s5691_s29  ;;  %5021 = vrot.lane.b32.xlu0 %v4659_v21, %s5691_s29  ;;  %v6142_v21 = vpop.permute.xlu0 %4893 }
  0xe9   : > { %v5590_v36 = vpop.f32.mrb[0].mxu0  ;;  %7955 = vst [vmem:[#allocation18_spill] sm:$0xff] %v6142_v21 }
  0xea   : > { %v494_v48 = vadd.f32 %v5590_v36, %v6117_v26  ;;  %v488_v55 = vpop.f32.mrb[1].mxu0 }
  0xeb   : > { %v489_v56 = vadd.f32 %v6117_v26, %v488_v55 }
  0xec   : > { %v728_v63 = vcombine.high %v494_v48, %v494_v48  ;;  %v735_v0 = vrot.slane %v494_v48, %v6123_v28  ;;  %5027 = vrot.lane.b32.xlu1 %v4662_v44, %s5691_s29  ;;  %5025 = vrot.lane.b32.xlu0 %v4661_v47, %s5691_s29  ;;  %v6140_v18 = vpop.f32.mrb[0].mxu1 }
  0xed   : > { %v679_v7 = vcombine.high %v489_v56, %v489_v56  ;;  %v686_v8 = vrot.slane %v489_v56, %v6123_v28  ;;  %v5593_v11 = vpop.f32.mrb[2].mxu0 }
  0xee   : > { %v742_v22 = vrot.slane %v728_v63, %v6123_v28  ;;  %v743_v25 = vcombine.high %v735_v0, %v735_v0  ;;  %v751_v36 = vrot.slane %v735_v0, %v6123_v28  ;;  %v6147_v44 = vadd.f32 %v5593_v11, %v6117_v26  ;;  %v498_v47 = vpop.f32.mrb[3].mxu0  ;;  %v6159_v63 = vpop.f32.mrb[1].mxu1 }
  0xef   : > { %v693_v48 = vrot.slane %v679_v7, %v6123_v28  ;;  %v694_v55 = vcombine.high %v686_v8, %v686_v8  ;;  %v6154_v56 = vrot.slane %v686_v8, %v6123_v28  ;;  %v6157_v35 = vadd.f32 %v6117_v26, %v498_v47 }
  0xf0   : > { %v744_v0 = vcombine.high %v742_v22, %v742_v22  ;;  %v758_v11 = vrot.slane %v742_v22, %v6123_v28  ;;  %v765_v27 = vrot.slane %v743_v25, %v6123_v28  ;;  %v773_v21 = vcombine.high %v751_v36, %v751_v36  ;;  %5031 = vrot.lane.b32.xlu1 %v4664_v16, %s5691_s29  ;;  %v4666_v22 = vld [vmem:[%s5749_s25 + $0x388] sm:$0xff]  ;;  %v6183_v52 = vpop.f32.mrb[2].mxu1 }
  0xf1   : > { %v2282_v7 = vrot.slane %v751_v36, %v6134_v3  ;;  %v695_v43 = vcombine.high %v693_v48, %v693_v48  ;;  %v6166_v8 = vrot.slane %v693_v48, %v6123_v28  ;;  %v716_v47 = vrot.slane %v694_v55, %v6123_v28  ;;  %5029 = vrot.lane.b32.xlu0 %v4663_v17, %s5691_s29  ;;  %v6170_v60 = vpop.f32.mrb[4].mxu0 }
  0xf2   : > { %v772_v25 = vrot.slane %v744_v0, %v6123_v28  ;;  %v774_v40 = vcombine.high %v758_v11, %v758_v11  ;;  %v775_v59 = vcombine.high %v765_v27, %v765_v27  ;;  %v2286_v16 = vrot.slane %v765_v27, %v6134_v3  ;;  %v6175_v36 = vpop.f32.mrb[5].mxu0  ;;  %7957 = vst [vmem:[#allocation20_spill] sm:$0xff] %v6183_v52  ;;  %v6185_v0 = vpop.permute.xlu0 %4897 }
  0xf3   : > { %v2290_v48 = vrot.slane %v773_v21, %v6134_v3  ;;  %v2298_v15 = vrot.slane %v758_v11, %v6134_v3  ;;  %v723_v55 = vrot.slane %v695_v43, %v6123_v28  ;;  %v724_v17 = vcombine.high %v6154_v56, %v6154_v56  ;;  %7958 = vst [vmem:[#allocation21_spill] sm:$0xff] %v6185_v0  ;;  %v6191_v21 = vpop.f32.mrb[3].mxu1  ;;  %v6193_v43 = vpop.permute.xlu1 %4899 }
  0xf4   : > { %v776_v12 = vcombine.high %v772_v25, %v772_v25  ;;  %v2294_v27 = vrot.slane %v775_v59, %v6134_v3  ;;  %v2302_v51 = vrot.slane %v772_v25, %v6134_v3  ;;  %v2306_v24 = vrot.slane %v774_v40, %v6134_v3  ;;  %5035 = vrot.lane.b32.xlu1 %v4666_v22, %s5691_s29  ;;  %v4668_v25 = vld [vmem:[%s5749_s25 + $0x398] sm:$0xff] }
  0xf5   : > { %7959 = vst [vmem:[#allocation22_spill] sm:$0xff] %v6191_v21  ;;  %7960 = vst [vmem:[#allocation23_spill] sm:$0xff] %v6193_v43  ;;  %v3305_v11 = vcombine.low %v2282_v7, %v2286_v16  ;;  %v725_v52 = vcombine.high %v6166_v8, %v6166_v8  ;;  %v726_v14 = vcombine.high %v716_v47, %v716_v47  ;;  %5033 = vrot.lane.b32.xlu0 %v4665_v39, %s5691_s29  ;;  %v6198_v59 = vpop.f32.mrb[6].mxu0  ;;  %v4667_v7 = vld [vmem:[%s5749_s25 + $0x390] sm:$0xff] }
  0xf6   : > { %v727_v0 = vcombine.high %v723_v55, %v723_v55  ;;  %v2310_v40 = vrot.slane %v776_v12, %v6134_v3  ;;  %v3306_v23 = vcombine.low %v2290_v48, %v2294_v27  ;;  %v3322_v22 = vcombine.low %v2298_v15, %v2302_v51  ;;  %v6204_v43 = vpop.f32.mrb[7].mxu0  ;;  %v6230_v48 = vpop.permute.xlu0 %4901 }
  0xf7   : > { %v2250_v21 = vrot.slane %v6154_v56, %v6134_v3  ;;  %v3313_v16 = vrot.slane %v3305_v11, %v6136_v4  ;;  %v2254_v13 = vrot.slane %v716_v47, %v6134_v3  ;;  %v2258_v39 = vrot.slane %v724_v17, %v6134_v3  ;;  %v4670_v47 = vld [vmem:[%s5749_s25 + $0x3a8] sm:$0xff] }
  0xf8   : > { %v2262_v32 = vrot.slane %v726_v14, %v6134_v3  ;;  %v3320_v20 = vrot.slane %v3306_v23, %v6136_v4  ;;  %v3323_v12 = vcombine.low %v2306_v24, %v2310_v40  ;;  %v3330_v51 = vrot.slane %v3322_v22, %v6136_v4  ;;  %5039 = vrot.lane.b32.xlu1 %v4668_v25, %s5691_s29 }
  0xf9   : > { %v2266_v15 = vrot.slane %v6166_v8, %v6134_v3  ;;  %v2270_v56 = vrot.slane %v723_v55, %v6134_v3  ;;  %v2274_v14 = vrot.slane %v725_v52, %v6134_v3  ;;  %v2278_v23 = vrot.slane %v727_v0, %v6134_v3  ;;  %5037 = vrot.lane.b32.xlu0 %v4667_v7, %s5691_s29  ;;  %v6227_v8 = vpop.f32.mrb[8].mxu0  ;;  %v6238_v0 = vpop.permute.xlu1 %4903 }
  0xfa   : > { %v3271_v24 = vcombine.low %v2250_v21, %v2254_v13  ;;  %v3321_v17 = vcombine.low %v3313_v16, %v3320_v20  ;;  %v3337_v27 = vrot.slane %v3323_v12, %v6136_v4  ;;  %v3272_v11 = vcombine.low %v2258_v39, %v2262_v32  ;;  %v6235_v55 = vpop.f32.mrb[9].mxu0  ;;  %v4669_v13 = vld [vmem:[%s5749_s25 + $0x3a0] sm:$0xff] }
  0xfb   : > { %v826_v52 = vcombine.high %v6147_v44, %v6147_v44  ;;  %v3288_v25 = vcombine.low %v2266_v15, %v2270_v56  ;;  %v3289_v40 = vcombine.low %v2274_v14, %v2278_v23  ;;  %v833_v20 = vrot.slane %v6147_v44, %v6123_v28  ;;  %v4672_v56 = vld [vmem:[%s5749_s25 + $0x3b8] sm:$0xff] }
  0xfc   : > { %v3279_v21 = vrot.slane %v3271_v24, %v6136_v4  ;;  %v3338_v22 = vcombine.low %v3330_v51, %v3337_v27  ;;  %4426 = vst.msk [vmem:[%s6221_s8 + $0x10] sm:$0xff] %vm4423_vm2, %v3321_v17  ;;  %5486 = vst.msk [vmem:[%s6221_s8 + $0x30] sm:$0xff] %vm4423_vm2, %v3321_v17  ;;  %v3286_v32 = vrot.slane %v3272_v11, %v6136_v4  ;;  %5043 = vrot.lane.b32.xlu1 %v4670_v47, %s5691_s29  ;;  %v4671_v47 = vld [vmem:[%s5749_s25 + $0x3b0] sm:$0xff] }
  0xfd   : > { %v840_v7 = vrot.slane %v826_v52, %v6123_v28  ;;  %v777_v16 = vcombine.high %v6157_v35, %v6157_v35  ;;  %5196 = vst.msk [vmem:[%s6221_s8 + $0x10] sm:$0xff] %vm5193_vm3, %v5938_v29  ;;  %5200 = vst.msk [vmem:[%s6221_s8 + $0x30] sm:$0xff] %vm5193_vm3, %v5964_v42  ;;  %v3296_v44 = vrot.slane %v3288_v25, %v6136_v4  ;;  %5041 = vrot.lane.b32.xlu0 %v4669_v13, %s5691_s29  ;;  %v6262_v15 = vpop.f32.mrb[10].mxu0  ;;  %v6293_v25 = vpop.permute.xlu1 %4907 }
  0xfe   : > { %v3303_v39 = vrot.slane %v3289_v40, %v6136_v4  ;;  %v841_v12 = vcombine.high %v833_v20, %v833_v20  ;;  %v849_v51 = vrot.slane %v833_v20, %v6123_v28  ;;  %4427 = vst.msk [vmem:[%s6221_s8 + $0x18] sm:$0xff] %vm4423_vm2, %v3338_v22  ;;  %5487 = vst.msk [vmem:[%s6221_s8 + $0x38] sm:$0xff] %vm4423_vm2, %v3338_v22  ;;  %v6272_v24 = vpop.f32.mrb[11].mxu0 }
  0xff   : > { %v3287_v29 = vcombine.low %v3279_v21, %v3286_v32  ;;  %v842_v42 = vcombine.high %v840_v7, %v840_v7  ;;  %v856_v14 = vrot.slane %v840_v7, %v6123_v28  ;;  %v784_v23 = vrot.slane %v6157_v35, %v6123_v28  ;;  %5197 = vst.msk [vmem:[%s6221_s8 + $0x18] sm:$0xff] %vm5193_vm3, %v5946_v33  ;;  %v6283_v35 = vpop.permute.xlu0 %4905 }
 0x100   : > { %5201 = vst.msk [vmem:[%s6221_s8 + $0x38] sm:$0xff] %vm5193_vm3, %v5962_v41  ;;  %v3304_v17 = vcombine.low %v3296_v44, %v3303_v39  ;;  %v863_v27 = vrot.slane %v841_v12, %v6123_v28  ;;  %v871_v11 = vcombine.high %v849_v51, %v849_v51  ;;  %v2346_v52 = vrot.slane %v849_v51, %v6134_v3  ;;  %v4673_v51 = vld [vmem:[%s5749_s25 + $0x3c0] sm:$0xff] }
 0x101   : > { %4424 = vst.msk [vmem:[%s6221_s8] sm:$0xff] %vm4423_vm2, %v3287_v29  ;;  %5484 = vst.msk [vmem:[%s6221_s8 + $0x20] sm:$0xff] %vm4423_vm2, %v3287_v29  ;;  %v870_v33 = vrot.slane %v842_v42, %v6123_v28  ;;  %v872_v13 = vcombine.high %v856_v14, %v856_v14  ;;  %v2362_v41 = vrot.slane %v856_v14, %v6134_v3  ;;  %5047 = vrot.lane.b32.xlu1 %v4672_v56, %s5691_s29  ;;  %v6308_v7 = vpop.f32.mrb[12].mxu0 }
 0x102   : > { %v791_v21 = vrot.slane %v777_v16, %v6123_v28  ;;  %7961 = vst [vmem:[#allocation24_spill] sm:$0xff] %v6293_v25  ;;  %4425 = vst.msk [vmem:[%s6221_s8 + $0x8] sm:$0xff] %vm4423_vm2, %v3304_v17  ;;  %v873_v40 = vcombine.high %v863_v27, %v863_v27  ;;  %v2350_v20 = vrot.slane %v863_v27, %v6134_v3  ;;  %5045 = vrot.lane.b32.xlu0 %v4671_v47, %s5691_s29  ;;  %v4674_v16 = vld [vmem:[%s5749_s25 + $0x3c8] sm:$0xff]  ;;  %v6319_v12 = vpop.f32.mrb[13].mxu0 }
 0x103   : > { %5485 = vst.msk [vmem:[%s6221_s8 + $0x28] sm:$0xff] %vm4423_vm2, %v3304_v17  ;;  %v2354_v22 = vrot.slane %v871_v11, %v6134_v3  ;;  %v792_v32 = vcombine.high %v784_v23, %v784_v23  ;;  %v2370_v44 = vrot.slane %v872_v13, %v6134_v3  ;;  %v800_v42 = vrot.slane %v784_v23, %v6123_v28  ;;  %v6333_v23 = vpop.permute.xlu0 %4909 }
 0x104   : > { %5194 = vst.msk [vmem:[%s6221_s8] sm:$0xff] %vm5193_vm3, %v5940_v30  ;;  %5198 = vst.msk [vmem:[%s6221_s8 + $0x20] sm:$0xff] %vm5193_vm3, %v5956_v38  ;;  %v874_v30 = vcombine.high %v870_v33, %v870_v33  ;;  %v2366_v38 = vrot.slane %v870_v33, %v6134_v3  ;;  %v793_v39 = vcombine.high %v791_v21, %v791_v21 }
 0x105   : > { %5195 = vst.msk [vmem:[%s6221_s8 + $0x8] sm:$0xff] %vm5193_vm3, %v5948_v34  ;;  %5199 = vst.msk [vmem:[%s6221_s8 + $0x28] sm:$0xff] %vm5193_vm3, %v5954_v37  ;;  %v2358_v56 = vrot.slane %v873_v40, %v6134_v3  ;;  %v3373_v29 = vcombine.low %v2346_v52, %v2350_v20  ;;  %v807_v14 = vrot.slane %v791_v21, %v6123_v28  ;;  %5051 = vrot.lane.b32.xlu1 %v4674_v16, %s5691_s29  ;;  %v6331_v52 = vpop.f32.mrb[14].mxu0 }
 0x106   : > { %v2374_v34 = vrot.slane %v874_v30, %v6134_v3  ;;  %v3390_v47 = vcombine.low %v2362_v41, %v2366_v38  ;;  %v814_v37 = vrot.slane %v792_v32, %v6123_v28  ;;  %v821_v17 = vrot.slane %v793_v39, %v6123_v28  ;;  %5049 = vrot.lane.b32.xlu0 %v4673_v51, %s5691_s29  ;;  %v6336_v32 = vpop.f32.mrb[15].mxu0  ;;  %v6338_v30 = vpop.permute.xlu1 %4911 }
 0x107   : > { %v3374_v27 = vcombine.low %v2354_v22, %v2358_v56  ;;  %v3381_v11 = vrot.slane %v3373_v29, %v6136_v4  ;;  %v822_v33 = vcombine.high %v800_v42, %v800_v42  ;;  %v823_v13 = vcombine.high %v807_v14, %v807_v14 }
 0x108   : > { %v3391_v21 = vcombine.low %v2370_v44, %v2374_v34  ;;  %v3398_v41 = vrot.slane %v3390_v47, %v6136_v4  ;;  %v824_v40 = vcombine.high %v814_v37, %v814_v37  ;;  %v825_v20 = vcombine.high %v821_v17, %v821_v17 }
 0x109   : > { %v3388_v22 = vrot.slane %v3374_v27, %v6136_v4  ;;  %v2314_v16 = vrot.slane %v800_v42, %v6134_v3  ;;  %v2318_v38 = vrot.slane %v814_v37, %v6134_v3  ;;  %v2322_v39 = vrot.slane %v822_v33, %v6134_v3 }
 0x10a   : > { %v3405_v44 = vrot.slane %v3391_v21, %v6136_v4  ;;  %v2326_v51 = vrot.slane %v824_v40, %v6134_v3  ;;  %v2330_v56 = vrot.slane %v807_v14, %v6134_v3  ;;  %v2334_v29 = vrot.slane %v821_v17, %v6134_v3  ;;  %v4676_v40 = vld [vmem:[%s5749_s25 + $0x3d8] sm:$0xff]  ;;  %v4675_v14 = vld [vmem:[%s5749_s25 + $0x3d0] sm:$0xff] }
 0x10b   : > { %v3389_v34 = vcombine.low %v3381_v11, %v3388_v22  ;;  %v2338_v47 = vrot.slane %v823_v13, %v6134_v3  ;;  %v2342_v42 = vrot.slane %v825_v20, %v6134_v3  ;;  %v3339_v37 = vcombine.low %v2314_v16, %v2318_v38  ;;  %5055 = vrot.lane.b32.xlu1 %v4676_v40, %s5691_s29  ;;  %v6378_v20 = vpop.permute.xlu0 %4913  ;;  %v4680_v40 = vld [vmem:[%s5749_s25 + $0x3f8] sm:$0xff] }
 0x10c   : > { %v3406_v27 = vcombine.low %v3398_v41, %v3405_v44  ;;  %v3340_v33 = vcombine.low %v2322_v39, %v2326_v51  ;;  %v3356_v25 = vcombine.low %v2330_v56, %v2334_v29  ;;  %v514_v21 = vadd.f32 %v6170_v60, %v6117_v26  ;;  %5053 = vrot.lane.b32.xlu0 %v4675_v14, %s5691_s29  ;;  %v4677_v56 = vld [vmem:[%s5749_s25 + $0x3e0] sm:$0xff]  ;;  %v6409_v14 = vpop.f32.mrb[4].mxu1 }
 0x10d   : > { %4430 = vst.msk [vmem:[%s6221_s8 + $0x50] sm:$0xff] %vm4423_vm2, %v3389_v34  ;;  %5490 = vst.msk [vmem:[%s6221_s8 + $0x70] sm:$0xff] %vm4423_vm2, %v3389_v34  ;;  %v3347_v17 = vrot.slane %v3339_v37, %v6136_v4  ;;  %v3357_v11 = vcombine.low %v2338_v47, %v2342_v42  ;;  %v574_v13 = vadd.f32 %v6140_v18, %v6117_v26 }
 0x10e   : > { %v6363_v41 = vadd.f32 %v6117_v26, %v6175_v36  ;;  %4431 = vst.msk [vmem:[%s6221_s8 + $0x58] sm:$0xff] %vm4423_vm2, %v3406_v27  ;;  %5491 = vst.msk [vmem:[%s6221_s8 + $0x78] sm:$0xff] %vm4423_vm2, %v3406_v27  ;;  %v3354_v60 = vrot.slane %v3340_v33, %v6136_v4  ;;  %v3364_v18 = vrot.slane %v3356_v25, %v6136_v4 }
 0x10f   : > { %5204 = vst.msk [vmem:[%s6221_s8 + $0x50] sm:$0xff] %vm5193_vm3, %v5980_v50  ;;  %5208 = vst.msk [vmem:[%s6221_s8 + $0x70] sm:$0xff] %vm5193_vm3, %v5996_v58  ;;  %v924_v36 = vcombine.high %v514_v21, %v514_v21  ;;  %v931_v22 = vrot.slane %v514_v21, %v6123_v28  ;;  %v3371_v50 = vrot.slane %v3357_v11, %v6136_v4  ;;  %v6389_v58 = vpop.permute.xlu1 %4915 }
 0x110   : > { %5205 = vst.msk [vmem:[%s6221_s8 + $0x58] sm:$0xff] %vm5193_vm3, %v5978_v49  ;;  %5209 = vst.msk [vmem:[%s6221_s8 + $0x78] sm:$0xff] %vm5193_vm3, %v5994_v57  ;;  %v1512_v25 = vcombine.high %v574_v13, %v574_v13  ;;  %v1519_v16 = vrot.slane %v574_v13, %v6123_v28  ;;  %v3355_v39 = vcombine.low %v3347_v17, %v3354_v60  ;;  %v4678_v57 = vld [vmem:[%s5749_s25 + $0x3e8] sm:$0xff]  ;;  %5057 = vrot.lane.b32.xlu0 %v4677_v56, %s5691_s29  ;;  %v6445_v56 = vpop.f32.mrb[5].mxu1 }
 0x111   : > { %v938_v44 = vrot.slane %v924_v36, %v6123_v28  ;;  %v939_v51 = vcombine.high %v931_v22, %v931_v22  ;;  %v947_v49 = vrot.slane %v931_v22, %v6123_v28  ;;  %v3372_v29 = vcombine.low %v3364_v18, %v3371_v50  ;;  %5059 = vrot.lane.b32.xlu1 %v4678_v57, %s5691_s29  ;;  %v4679_v18 = vld [vmem:[%s5749_s25 + $0x3f0] sm:$0xff]  ;;  %v6433_v50 = vpop.permute.xlu0 %4917 }
 0x112   : > { %v1526_v34 = vrot.slane %v1512_v25, %v6123_v28  ;;  %v1527_v47 = vcombine.high %v1519_v16, %v1519_v16  ;;  %v1535_v42 = vrot.slane %v1519_v16, %v6123_v28  ;;  %4428 = vst.msk [vmem:[%s6221_s8 + $0x40] sm:$0xff] %vm4423_vm2, %v3355_v39  ;;  %5488 = vst.msk [vmem:[%s6221_s8 + $0x60] sm:$0xff] %vm4423_vm2, %v3355_v39 }
 0x113   : > { %v940_v37 = vcombine.high %v938_v44, %v938_v44  ;;  %v954_v27 = vrot.slane %v938_v44, %v6123_v28  ;;  %v961_v33 = vrot.slane %v939_v51, %v6123_v28  ;;  %v969_v21 = vcombine.high %v947_v49, %v947_v49  ;;  %4429 = vst.msk [vmem:[%s6221_s8 + $0x48] sm:$0xff] %vm4423_vm2, %v3372_v29  ;;  %v6438_v51 = vpop.permute.xlu1 %4919 }
 0x114   : > { %5489 = vst.msk [vmem:[%s6221_s8 + $0x68] sm:$0xff] %vm4423_vm2, %v3372_v29  ;;  %v2410_v17 = vrot.slane %v947_v49, %v6134_v3  ;;  %v1528_v11 = vcombine.high %v1526_v34, %v1526_v34  ;;  %v1542_v13 = vrot.slane %v1526_v34, %v6123_v28  ;;  %v1549_v60 = vrot.slane %v1527_v47, %v6123_v28 }
 0x115   : > { %5202 = vst.msk [vmem:[%s6221_s8 + $0x40] sm:$0xff] %vm5193_vm3, %v5972_v46  ;;  %5206 = vst.msk [vmem:[%s6221_s8 + $0x60] sm:$0xff] %vm5193_vm3, %v5988_v54  ;;  %v968_v36 = vrot.slane %v940_v37, %v6123_v28  ;;  %v970_v46 = vcombine.high %v954_v27, %v954_v27  ;;  %v971_v22 = vcombine.high %v961_v33, %v961_v33  ;;  %5063 = vrot.lane.b32.xlu1 %v4680_v40, %s5691_s29 }
 0x116   : > { %5203 = vst.msk [vmem:[%s6221_s8 + $0x48] sm:$0xff] %vm5193_vm3, %v5970_v45  ;;  %5207 = vst.msk [vmem:[%s6221_s8 + $0x68] sm:$0xff] %vm5193_vm3, %v5986_v53  ;;  %v2414_v54 = vrot.slane %v961_v33, %v6134_v3  ;;  %v2418_v25 = vrot.slane %v969_v21, %v6134_v3  ;;  %v2426_v16 = vrot.slane %v954_v27, %v6134_v3  ;;  %5061 = vrot.lane.b32.xlu0 %v4679_v18, %s5691_s29 }
 0x117   : > { %v1556_v39 = vrot.slane %v1528_v11, %v6123_v28  ;;  %v1557_v44 = vcombine.high %v1535_v42, %v1535_v42  ;;  %v972_v45 = vcombine.high %v968_v36, %v968_v36  ;;  %v2422_v53 = vrot.slane %v971_v22, %v6134_v3 }
 0x118   : > { %v2430_v49 = vrot.slane %v968_v36, %v6134_v3  ;;  %v2434_v57 = vrot.slane %v970_v46, %v6134_v3  ;;  %v3441_v29 = vcombine.low %v2410_v17, %v2414_v54  ;;  %v1558_v34 = vcombine.high %v1542_v13, %v1542_v13 }
 0x119   : > { %v1559_v47 = vcombine.high %v1549_v60, %v1549_v60  ;;  %v1560_v37 = vcombine.high %v1556_v39, %v1556_v39  ;;  %v2438_v27 = vrot.slane %v972_v45, %v6134_v3  ;;  %v3442_v33 = vcombine.low %v2418_v25, %v2422_v53  ;;  %v6456_v25 = vpop.permute.xlu0 %4921  ;;  %v6467_v45 = vpop.permute.xlu1 %4923 }
 0x11a   : > { %v3458_v21 = vcombine.low %v2426_v16, %v2430_v49  ;;  %v2794_v40 = vrot.slane %v1535_v42, %v6134_v3  ;;  %v3449_v11 = vrot.slane %v3441_v29, %v6136_v4  ;;  %v2798_v36 = vrot.slane %v1549_v60, %v6134_v3  ;;  %7962 = vst [vmem:[#allocation25_spill] sm:$0xff] %v6456_v25 }
 0x11b   : > { %v2802_v46 = vrot.slane %v1557_v44, %v6134_v3  ;;  %v2806_v18 = vrot.slane %v1559_v47, %v6134_v3  ;;  %v3456_v22 = vrot.slane %v3442_v33, %v6136_v4  ;;  %v3459_v17 = vcombine.low %v2434_v57, %v2438_v27  ;;  %7963 = vst [vmem:[#allocation26_spill] sm:$0xff] %v6467_v45 }
 0x11c   : > { %v3466_v54 = vrot.slane %v3458_v21, %v6136_v4  ;;  %v2810_v38 = vrot.slane %v1542_v13, %v6134_v3  ;;  %v2814_v42 = vrot.slane %v1556_v39, %v6134_v3  ;;  %v6460_v16 = vrot.slane %v1558_v34, %v6134_v3 }
 0x11d   : > { %v6463_v60 = vrot.slane %v1560_v37, %v6134_v3  ;;  %v6465_v44 = vcombine.low %v2794_v40, %v2798_v36  ;;  %v3457_v53 = vcombine.low %v3449_v11, %v3456_v22  ;;  %v3473_v13 = vrot.slane %v3459_v17, %v6136_v4  ;;  %v6490_v40 = vpop.f32.mrb[6].mxu1  ;;  %v6513_v17 = vpop.permute.xlu0 %4925 }
 0x11e   : > { %v3850_v49 = vcombine.low %v2802_v46, %v2806_v18  ;;  %v882_v57 = vrot.slane %v6363_v41, %v6123_v28  ;;  %v6474_v29 = vcombine.low %v2810_v38, %v2814_v42  ;;  %v7965_v47 = vcombine.high %v6363_v41, %v6363_v41  ;;  %7966 = vst [vmem:[#allocation28_spill] sm:$0xff] %v6490_v40 }
 0x11f   : > { %v3474_v27 = vcombine.low %v3466_v54, %v3473_v13  ;;  %4434 = vst.msk [vmem:[%s6221_s8 + $0x90] sm:$0xff] %vm4423_vm2, %v3457_v53  ;;  %5494 = vst.msk [vmem:[%s6221_s8 + $0xb0] sm:$0xff] %vm4423_vm2, %v3457_v53  ;;  %v569_v46 = vadd.f32 %v6117_v26, %v6159_v63  ;;  %v6523_v13 = vpop.permute.xlu1 %4927 }
 0x120   : > { %7964 = vst [vmem:[#allocation27_spill] sm:$0xff] %v6474_v29  ;;  %v889_v37 = vrot.slane %v7965_v47, %v6123_v28  ;;  %v6487_v33 = vrot.slane %v3850_v49, %v6136_v4  ;;  %v890_v38 = vcombine.high %v882_v57, %v882_v57  ;;  %v898_v21 = vrot.slane %v882_v57, %v6123_v28 }
 0x121   : > { %5212 = vst.msk [vmem:[%s6221_s8 + $0x90] sm:$0xff] %vm5193_vm3, %v6012_v2  ;;  %5216 = vst.msk [vmem:[%s6221_s8 + $0xb0] sm:$0xff] %vm5193_vm3, %v6026_v9  ;;  %v6511_v9 = vadd.f32 %v6198_v59, %v6117_v26  ;;  %v1463_v53 = vcombine.high %v569_v46, %v569_v46  ;;  %v1470_v47 = vrot.slane %v569_v46, %v6123_v28  ;;  %v6537_v40 = vpop.permute.xlu0 %4929 }
 0x122   : > { %v891_v11 = vcombine.high %v889_v37, %v889_v37  ;;  %v905_v36 = vrot.slane %v889_v37, %v6123_v28  ;;  %4435 = vst.msk [vmem:[%s6221_s8 + $0x98] sm:$0xff] %vm4423_vm2, %v3474_v27  ;;  %5495 = vst.msk [vmem:[%s6221_s8 + $0xb8] sm:$0xff] %vm4423_vm2, %v3474_v27  ;;  %v912_v18 = vrot.slane %v890_v38, %v6123_v28 }
 0x123   : > { %v920_v22 = vcombine.high %v898_v21, %v898_v21  ;;  %v2378_v2 = vrot.slane %v898_v21, %v6134_v3  ;;  %5213 = vst.msk [vmem:[%s6221_s8 + $0x98] sm:$0xff] %vm5193_vm3, %v6010_v1  ;;  %5217 = vst.msk [vmem:[%s6221_s8 + $0xb8] sm:$0xff] %vm5193_vm3, %v6028_v10  ;;  %v1477_v27 = vrot.slane %v1463_v53, %v6123_v28  ;;  %v6539_v53 = vpop.f32.mrb[7].mxu1 }
 0x124   : > { %v919_v63 = vrot.slane %v891_v11, %v6123_v28  ;;  %v921_v54 = vcombine.high %v905_v36, %v905_v36  ;;  %v2394_v42 = vrot.slane %v905_v36, %v6134_v3  ;;  %v922_v49 = vcombine.high %v912_v18, %v912_v18  ;;  %7967 = vst [vmem:[#allocation29_spill] sm:$0xff] %v6537_v40 }
 0x125   : > { %v2382_v59 = vrot.slane %v912_v18, %v6134_v3  ;;  %v2386_v57 = vrot.slane %v920_v22, %v6134_v3  ;;  %v1478_v11 = vcombine.high %v1470_v47, %v1470_v47  ;;  %v1486_v36 = vrot.slane %v1470_v47, %v6123_v28  ;;  %7968 = vst [vmem:[#allocation30_spill] sm:$0xff] %v6539_v53 }
 0x126   : > { %v923_v37 = vcombine.high %v919_v63, %v919_v63  ;;  %v2398_v1 = vrot.slane %v919_v63, %v6134_v3  ;;  %v2402_v10 = vrot.slane %v921_v54, %v6134_v3  ;;  %v2390_v38 = vrot.slane %v922_v49, %v6134_v3 }
 0x127   : > { %v3407_v21 = vcombine.low %v2378_v2, %v2382_v59  ;;  %v1479_v39 = vcombine.high %v1477_v27, %v1477_v27  ;;  %v1493_v22 = vrot.slane %v1477_v27, %v6123_v28  ;;  %v1500_v63 = vrot.slane %v1478_v11, %v6123_v28 }
 0x128   : > { %v2406_v41 = vrot.slane %v923_v37, %v6134_v3  ;;  %v3424_v18 = vcombine.low %v2394_v42, %v2398_v1  ;;  %v3408_v46 = vcombine.low %v2386_v57, %v2390_v38  ;;  %v1508_v54 = vcombine.high %v1486_v36, %v1486_v36  ;;  %v6543_v42 = vpop.permute.xlu1 %4931 }
 0x129   : > { %v3415_v34 = vrot.slane %v3407_v21, %v6136_v4  ;;  %v1507_v59 = vrot.slane %v1479_v39, %v6123_v28  ;;  %v1509_v47 = vcombine.high %v1493_v22, %v1493_v22  ;;  %7969 = vst [vmem:[#allocation31_spill] sm:$0xff] %v6543_v42  ;;  %v1510_v57 = vcombine.high %v1500_v63, %v1500_v63 }
 0x12a   : > { %v3425_v2 = vcombine.low %v2402_v10, %v2406_v41  ;;  %v3432_v49 = vrot.slane %v3424_v18, %v6136_v4  ;;  %v3422_v37 = vrot.slane %v3408_v46, %v6136_v4  ;;  %v2762_v1 = vrot.slane %v1486_v36, %v6134_v3 }
 0x12b   : > { %v2766_v27 = vrot.slane %v1500_v63, %v6134_v3  ;;  %v1511_v21 = vcombine.high %v1507_v59, %v1507_v59  ;;  %v2770_v41 = vrot.slane %v1508_v54, %v6134_v3  ;;  %v2778_v10 = vrot.slane %v1493_v22, %v6134_v3 }
 0x12c   : > { %v3439_v38 = vrot.slane %v3425_v2, %v6136_v4  ;;  %v3423_v39 = vcombine.low %v3415_v34, %v3422_v37  ;;  %v2774_v11 = vrot.slane %v1510_v57, %v6134_v3  ;;  %v2782_v18 = vrot.slane %v1507_v59, %v6134_v3 }
 0x12d   : > { %v6554_v36 = vrot.slane %v1509_v47, %v6134_v3  ;;  %v6557_v63 = vrot.slane %v1511_v21, %v6134_v3  ;;  %v6559_v2 = vcombine.low %v2762_v1, %v2766_v27  ;;  %v1022_v22 = vcombine.high %v6511_v9, %v6511_v9  ;;  %v6573_v47 = vpop.permute.xlu0 %4933  ;;  %v6594_v1 = vpop.permute.xlu1 %4935 }
 0x12e   : > { %v3440_v46 = vcombine.low %v3432_v49, %v3439_v38  ;;  %4432 = vst.msk [vmem:[%s6221_s8 + $0x80] sm:$0xff] %vm4423_vm2, %v3423_v39  ;;  %5492 = vst.msk [vmem:[%s6221_s8 + $0xa0] sm:$0xff] %vm4423_vm2, %v3423_v39  ;;  %v3816_v34 = vcombine.low %v2770_v41, %v2774_v11  ;;  %v6567_v54 = vcombine.low %v2778_v10, %v2782_v18  ;;  %v6608_v21 = vpop.f32.mrb[8].mxu1 }
 0x12f   : > { %v1029_v49 = vrot.slane %v6511_v9, %v6123_v28  ;;  %v519_v59 = vadd.f32 %v6117_v26, %v6204_v43  ;;  %5210 = vst.msk [vmem:[%s6221_s8 + $0x80] sm:$0xff] %vm5193_vm3, %v6004_v62  ;;  %5214 = vst.msk [vmem:[%s6221_s8 + $0xa0] sm:$0xff] %vm5193_vm3, %v6020_v6  ;;  %v1036_v43 = vrot.slane %v1022_v22, %v6123_v28 }
 0x130   : > { %4433 = vst.msk [vmem:[%s6221_s8 + $0x88] sm:$0xff] %vm4423_vm2, %v3440_v46  ;;  %5493 = vst.msk [vmem:[%s6221_s8 + $0xa8] sm:$0xff] %vm4423_vm2, %v3440_v46  ;;  %v6592_v57 = vadd.f32 %v6227_v8, %v6117_v26  ;;  %v6603_v62 = vrot.slane %v3816_v34, %v6136_v4 }
 0x131   : > { %5211 = vst.msk [vmem:[%s6221_s8 + $0x88] sm:$0xff] %vm5193_vm3, %v6002_v61  ;;  %5215 = vst.msk [vmem:[%s6221_s8 + $0xa8] sm:$0xff] %vm5193_vm3, %v6018_v5  ;;  %v1037_v27 = vcombine.high %v1029_v49, %v1029_v49  ;;  %v1045_v38 = vrot.slane %v1029_v49, %v6123_v28  ;;  %v1038_v8 = vcombine.high %v1036_v43, %v1036_v43 }
 0x132   : > { %7970 = vst [vmem:[#allocation32_spill] sm:$0xff] %v6608_v21  ;;  %v1052_v41 = vrot.slane %v1036_v43, %v6123_v28  ;;  %v973_v10 = vcombine.high %v519_v59, %v519_v59  ;;  %v980_v61 = vrot.slane %v519_v59, %v6123_v28  ;;  %v1120_v18 = vcombine.high %v6592_v57, %v6592_v57 }
 0x133   : > { %v1059_v39 = vrot.slane %v1037_v27, %v6123_v28  ;;  %v1067_v5 = vcombine.high %v1045_v38, %v1045_v38  ;;  %v2474_v11 = vrot.slane %v1045_v38, %v6134_v3  ;;  %v1066_v46 = vrot.slane %v1038_v8, %v6123_v28  ;;  %v6621_v27 = vpop.permute.xlu0 %4937  ;;  %v6625_v8 = vpop.permute.xlu1 %4939 }
 0x134   : > { %v1068_v22 = vcombine.high %v1052_v41, %v1052_v41  ;;  %v2490_v34 = vrot.slane %v1052_v41, %v6134_v3  ;;  %v987_v49 = vrot.slane %v973_v10, %v6123_v28  ;;  %v988_v6 = vcombine.high %v980_v61, %v980_v61  ;;  %7971 = vst [vmem:[#allocation33_spill] sm:$0xff] %v6621_v27 }
 0x135   : > { %v1069_v37 = vcombine.high %v1059_v39, %v1059_v39  ;;  %v2478_v43 = vrot.slane %v1059_v39, %v6134_v3  ;;  %v2482_v59 = vrot.slane %v1067_v5, %v6134_v3  ;;  %v1070_v9 = vcombine.high %v1066_v46, %v1066_v46  ;;  %7972 = vst [vmem:[#allocation34_spill] sm:$0xff] %v6625_v8  ;;  %v6634_v8 = vpop.f32.mrb[9].mxu1 }
 0x136   : > { %v2494_v38 = vrot.slane %v1066_v46, %v6134_v3  ;;  %v2498_v21 = vrot.slane %v1068_v22, %v6134_v3  ;;  %v989_v53 = vcombine.high %v987_v49, %v987_v49  ;;  %v996_v10 = vrot.slane %v980_v61, %v6123_v28  ;;  %7973 = vst [vmem:[#allocation35_spill] sm:$0xff] %v6634_v8 }
 0x137   : > { %v2486_v41 = vrot.slane %v1069_v37, %v6134_v3  ;;  %v3509_v42 = vcombine.low %v2474_v11, %v2478_v43  ;;  %v1003_v39 = vrot.slane %v987_v49, %v6123_v28  ;;  %v2502_v5 = vrot.slane %v1070_v9, %v6134_v3 }
 0x138   : > { %v3526_v45 = vcombine.low %v2490_v34, %v2494_v38  ;;  %v1010_v40 = vrot.slane %v988_v6, %v6123_v28  ;;  %v1017_v25 = vrot.slane %v989_v53, %v6123_v28  ;;  %v1018_v29 = vcombine.high %v996_v10, %v996_v10  ;;  %v6647_v38 = vpop.permute.xlu1 %4943 }
 0x139   : > { %v3510_v46 = vcombine.low %v2482_v59, %v2486_v41  ;;  %v3517_v22 = vrot.slane %v3509_v42, %v6136_v4  ;;  %v1019_v27 = vcombine.high %v1003_v39, %v1003_v39  ;;  %v3527_v37 = vcombine.low %v2498_v21, %v2502_v5  ;;  %v6641_v42 = vpop.permute.xlu0 %4941 }
 0x13a   : > { %v3534_v11 = vrot.slane %v3526_v45, %v6136_v4  ;;  %v1020_v61 = vcombine.high %v1010_v40, %v1010_v40  ;;  %v1021_v43 = vcombine.high %v1017_v25, %v1017_v25  ;;  %v2442_v9 = vrot.slane %v996_v10, %v6134_v3 }
 0x13b   : > { %v3524_v49 = vrot.slane %v3510_v46, %v6136_v4  ;;  %v2446_v6 = vrot.slane %v1010_v40, %v6134_v3  ;;  %v2450_v53 = vrot.slane %v1018_v29, %v6134_v3  ;;  %v3541_v34 = vrot.slane %v3527_v37, %v6136_v4 }
 0x13c   : > { %v2454_v21 = vrot.slane %v1020_v61, %v6134_v3  ;;  %v2458_v45 = vrot.slane %v1003_v39, %v6134_v3  ;;  %v2462_v59 = vrot.slane %v1017_v25, %v6134_v3  ;;  %v2466_v40 = vrot.slane %v1019_v27, %v6134_v3 }
 0x13d   : > { %v3525_v41 = vcombine.low %v3517_v22, %v3524_v49  ;;  %v2470_v29 = vrot.slane %v1021_v43, %v6134_v3  ;;  %v3475_v10 = vcombine.low %v2442_v9, %v2446_v6  ;;  %v3542_v5 = vcombine.low %v3534_v11, %v3541_v34  ;;  %v7974_v49 = vld [vmem:[#allocation4_spill] sm:$0xff]  ;;  %v6682_v6 = vpop.permute.xlu0 %4945 }
 0x13e   : > { %v3476_v46 = vcombine.low %v2450_v53, %v2454_v21  ;;  %v3492_v37 = vcombine.low %v2458_v45, %v2462_v59  ;;  %v1127_v39 = vrot.slane %v6592_v57, %v6123_v28  ;;  %v1134_v27 = vrot.slane %v1120_v18, %v6123_v28  ;;  %v6684_v53 = vpop.f32.mrb[10].mxu1 }
 0x13f   : > { %4438 = vst.msk [vmem:[%s6221_s8 + $0xd0] sm:$0xff] %vm4423_vm2, %v3525_v41  ;;  %5498 = vst.msk [vmem:[%s6221_s8 + $0xf0] sm:$0xff] %vm4423_vm2, %v3525_v41  ;;  %v3483_v25 = vrot.slane %v3475_v10, %v6136_v4  ;;  %v3493_v22 = vcombine.low %v2466_v40, %v2470_v29  ;;  %v529_v61 = vadd.f32 %v6117_v26, %v6235_v55  ;;  %v7975_v26 = vld [vmem:[#allocation7_spill] sm:$0xff]  ;;  %v6688_v41 = vpop.permute.xlu1 %4947 }
 0x140   : > { %4439 = vst.msk [vmem:[%s6221_s8 + $0xd8] sm:$0xff] %vm4423_vm2, %v3542_v5  ;;  %5499 = vst.msk [vmem:[%s6221_s8 + $0xf8] sm:$0xff] %vm4423_vm2, %v3542_v5  ;;  %v3490_v57 = vrot.slane %v3476_v46, %v6136_v4  ;;  %v3500_v11 = vrot.slane %v3492_v37, %v6136_v4  ;;  %v1135_v43 = vcombine.high %v1127_v39, %v1127_v39 }
 0x141   : > { %5220 = vst.msk [vmem:[%s6221_s8 + $0xd0] sm:$0xff] %vm5193_vm3, %v6046_v19  ;;  %5224 = vst.msk [vmem:[%s6221_s8 + $0xf0] sm:$0xff] %vm5193_vm3, %v6066_v31  ;;  %v1143_v18 = vrot.slane %v1127_v39, %v6123_v28  ;;  %v3507_v55 = vrot.slane %v3493_v22, %v6136_v4  ;;  %v1136_v19 = vcombine.high %v1134_v27, %v1134_v27  ;;  %v7977_v22 = vld [vmem:[#allocation2_spill] sm:$0xff] }
 0x142   : > { %5221 = vst.msk [vmem:[%s6221_s8 + $0xd8] sm:$0xff] %vm5193_vm3, %v7974_v49  ;;  %5225 = vst.msk [vmem:[%s6221_s8 + $0xf8] sm:$0xff] %vm5193_vm3, %v7975_v26  ;;  %v1150_v31 = vrot.slane %v1134_v27, %v6123_v28  ;;  %v1071_v9 = vcombine.high %v529_v61, %v529_v61  ;;  %v3491_v34 = vcombine.low %v3483_v25, %v3490_v57  ;;  %v7978_v27 = vld [vmem:[#allocation5_spill] sm:$0xff]  ;;  %v7979_v49 = vld [vmem:[#allocation3_spill] sm:$0xff] }
 0x143   : > { %7976 = vst [vmem:[#allocation4_spill] sm:$0xff] %v6684_v53  ;;  %v1157_v21 = vrot.slane %v1135_v43, %v6123_v28  ;;  %v1165_v45 = vcombine.high %v1143_v18, %v1143_v18  ;;  %v2538_v59 = vrot.slane %v1143_v18, %v6134_v3  ;;  %v3508_v40 = vcombine.low %v3500_v11, %v3507_v55 }
 0x144   : > { %v1164_v29 = vrot.slane %v1136_v19, %v6123_v28  ;;  %v1166_v10 = vcombine.high %v1150_v31, %v1150_v31  ;;  %v2554_v5 = vrot.slane %v1150_v31, %v6134_v3  ;;  %4436 = vst.msk [vmem:[%s6221_s8 + $0xc0] sm:$0xff] %vm4423_vm2, %v3491_v34  ;;  %5496 = vst.msk [vmem:[%s6221_s8 + $0xe0] sm:$0xff] %vm4423_vm2, %v3491_v34 }
 0x145   : > { %v1167_v46 = vcombine.high %v1157_v21, %v1157_v21  ;;  %v2542_v37 = vrot.slane %v1157_v21, %v6134_v3  ;;  %v2546_v39 = vrot.slane %v1165_v45, %v6134_v3  ;;  %v1078_v25 = vrot.slane %v529_v61, %v6123_v28  ;;  %4437 = vst.msk [vmem:[%s6221_s8 + $0xc8] sm:$0xff] %vm4423_vm2, %v3508_v40  ;;  %v7980_v61 = vld [vmem:[#allocation6_spill] sm:$0xff] }
 0x146   : > { %5497 = vst.msk [vmem:[%s6221_s8 + $0xe8] sm:$0xff] %vm4423_vm2, %v3508_v40  ;;  %v1168_v57 = vcombine.high %v1164_v29, %v1164_v29  ;;  %v2558_v11 = vrot.slane %v1164_v29, %v6134_v3  ;;  %v2562_v43 = vrot.slane %v1166_v10, %v6134_v3  ;;  %v1085_v18 = vrot.slane %v1071_v9, %v6123_v28  ;;  %v6722_v29 = vpop.permute.xlu0 %4949 }
 0x147   : > { %5218 = vst.msk [vmem:[%s6221_s8 + $0xc0] sm:$0xff] %vm5193_vm3, %v7977_v22  ;;  %5222 = vst.msk [vmem:[%s6221_s8 + $0xe0] sm:$0xff] %vm5193_vm3, %v7978_v27  ;;  %v2550_v26 = vrot.slane %v1167_v46, %v6134_v3  ;;  %v3577_v55 = vcombine.low %v2538_v59, %v2542_v37  ;;  %v1086_v19 = vcombine.high %v1078_v25, %v1078_v25 }
 0x148   : > { %5219 = vst.msk [vmem:[%s6221_s8 + $0xc8] sm:$0xff] %vm5193_vm3, %v7979_v49  ;;  %5223 = vst.msk [vmem:[%s6221_s8 + $0xe8] sm:$0xff] %vm5193_vm3, %v7980_v61  ;;  %v1094_v31 = vrot.slane %v1078_v25, %v6123_v28  ;;  %v2566_v34 = vrot.slane %v1168_v57, %v6134_v3  ;;  %v3594_v21 = vcombine.low %v2554_v5, %v2558_v11  ;;  %v6726_v49 = vpop.permute.xlu1 %4951  ;;  %v6730_v5 = vpop.f32.mrb[11].mxu1 }
 0x149   : > { %v1087_v45 = vcombine.high %v1085_v18, %v1085_v18  ;;  %v1101_v40 = vrot.slane %v1085_v18, %v6123_v28  ;;  %v3578_v9 = vcombine.low %v2546_v39, %v2550_v26  ;;  %v3585_v10 = vrot.slane %v3577_v55, %v6136_v4  ;;  %7981 = vst [vmem:[#allocation7_spill] sm:$0xff] %v6730_v5 }
 0x14a   : > { %v1108_v22 = vrot.slane %v1086_v19, %v6123_v28  ;;  %v1116_v27 = vcombine.high %v1094_v31, %v1094_v31  ;;  %v3595_v59 = vcombine.low %v2562_v43, %v2566_v34  ;;  %v3602_v46 = vrot.slane %v3594_v21, %v6136_v4 }
 0x14b   : > { %v1115_v37 = vrot.slane %v1087_v45, %v6123_v28  ;;  %v1117_v25 = vcombine.high %v1101_v40, %v1101_v40  ;;  %v3592_v57 = vrot.slane %v3578_v9, %v6136_v4  ;;  %v2506_v39 = vrot.slane %v1094_v31, %v6134_v3 }
 0x14c   : > { %v1118_v11 = vcombine.high %v1108_v22, %v1108_v22  ;;  %v2510_v18 = vrot.slane %v1108_v22, %v6134_v3  ;;  %v3609_v61 = vrot.slane %v3595_v59, %v6136_v4  ;;  %v2514_v43 = vrot.slane %v1116_v27, %v6134_v3  ;;  %v6745_v27 = vld [vmem:[%s7935_s2] ss:$0 sm:$0xff] }
 0x14d   : > { %v1119_v26 = vcombine.high %v1115_v37, %v1115_v37  ;;  %v2522_v55 = vrot.slane %v1101_v40, %v6134_v3  ;;  %v3593_v19 = vcombine.low %v3585_v10, %v3592_v57  ;;  %v2526_v21 = vrot.slane %v1115_v37, %v6134_v3  ;;  %v6749_v10 = vpop.permute.xlu0 %4953  ;;  %v6761_v57 = vpop.permute.xlu1 %4955 }
 0x14e   : > { %v2518_v34 = vrot.slane %v1118_v11, %v6134_v3  ;;  %v2530_v31 = vrot.slane %v1117_v25, %v6134_v3  ;;  %v3610_v45 = vcombine.low %v3602_v46, %v3609_v61  ;;  %v3543_v22 = vcombine.low %v2506_v39, %v2510_v18  ;;  %7982 = vst [vmem:[#allocation2_spill] sm:$0xff] %v6749_v10  ;;  %v7985_v11 = vld [vmem:[#allocation14_spill] sm:$0xff] }
 0x14f   : > { %v2534_v9 = vrot.slane %v1119_v26, %v6134_v3  ;;  %v544_v40 = vadd.f32 %v6745_v27, %v6262_v15  ;;  %4442 = vst.msk [vmem:[%s6221_s8 + $0x110] sm:$0xff] %vm4423_vm2, %v3593_v19  ;;  %5502 = vst.msk [vmem:[%s6221_s8 + $0x130] sm:$0xff] %vm4423_vm2, %v3593_v19  ;;  %v3560_v46 = vcombine.low %v2522_v55, %v2526_v21  ;;  %v7984_v15 = vld [vmem:[#allocation10_spill] sm:$0xff]  ;;  %v7987_v26 = vld [vmem:[#allocation15_spill] sm:$0xff] }
 0x150   : > { %v3544_v59 = vcombine.low %v2514_v43, %v2518_v34  ;;  %v539_v37 = vadd.f32 %v6745_v27, %v6272_v24  ;;  %v6759_v25 = vadd.f32 %v6745_v27, %v6308_v7  ;;  %7983 = vst [vmem:[#allocation5_spill] sm:$0xff] %v6761_v57  ;;  %4443 = vst.msk [vmem:[%s6221_s8 + $0x118] sm:$0xff] %vm4423_vm2, %v3610_v45  ;;  %v7986_v7 = vld [vmem:[#allocation11_spill] sm:$0xff] }
 0x151   : > { %5503 = vst.msk [vmem:[%s6221_s8 + $0x138] sm:$0xff] %vm4423_vm2, %v3610_v45  ;;  %v3551_v39 = vrot.slane %v3543_v22, %v6136_v4  ;;  %v3561_v18 = vcombine.low %v2530_v31, %v2534_v9  ;;  %v1218_v24 = vcombine.high %v544_v40, %v544_v40  ;;  %v1225_v61 = vrot.slane %v544_v40, %v6123_v28  ;;  %v6787_v22 = vpop.f32.mrb[12].mxu1 }
 0x152   : > { %5228 = vst.msk [vmem:[%s6221_s8 + $0x110] sm:$0xff] %vm5193_vm3, %v7984_v15  ;;  %5232 = vst.msk [vmem:[%s6221_s8 + $0x130] sm:$0xff] %vm5193_vm3, %v7985_v11  ;;  %v3558_v43 = vrot.slane %v3544_v59, %v6136_v4  ;;  %v3568_v55 = vrot.slane %v3560_v46, %v6136_v4  ;;  %v1169_v19 = vcombine.high %v539_v37, %v539_v37 }
 0x153   : > { %5229 = vst.msk [vmem:[%s6221_s8 + $0x118] sm:$0xff] %vm5193_vm3, %v7986_v7  ;;  %5233 = vst.msk [vmem:[%s6221_s8 + $0x138] sm:$0xff] %vm5193_vm3, %v7987_v26  ;;  %v1176_v34 = vrot.slane %v539_v37, %v6123_v28  ;;  %v3575_v21 = vrot.slane %v3561_v18, %v6136_v4  ;;  %v1232_v31 = vrot.slane %v1218_v24, %v6123_v28  ;;  %v6793_v7 = vpop.permute.xlu0 %4957 }
 0x154   : > { %v1233_v45 = vcombine.high %v1225_v61, %v1225_v61  ;;  %v1241_v9 = vrot.slane %v1225_v61, %v6123_v28  ;;  %7988 = vst [vmem:[#allocation3_spill] sm:$0xff] %v6787_v22  ;;  %v3559_v40 = vcombine.low %v3551_v39, %v3558_v43  ;;  %v1183_v59 = vrot.slane %v1169_v19, %v6123_v28  ;;  %v7991_v19 = vld [vmem:[#allocation8_spill] sm:$0xff] }
 0x155   : > { %v1184_v46 = vcombine.high %v1176_v34, %v1176_v34  ;;  %v1192_v15 = vrot.slane %v1176_v34, %v6123_v28  ;;  %v3576_v37 = vcombine.low %v3568_v55, %v3575_v21  ;;  %v1234_v11 = vcombine.high %v1232_v31, %v1232_v31  ;;  %7989 = vst [vmem:[#allocation6_spill] sm:$0xff] %v6793_v7  ;;  %v6801_v55 = vpop.permute.xlu1 %4959  ;;  %v7992_v34 = vld [vmem:[#allocation12_spill] sm:$0xff] }
 0x156   : > { %v1248_v18 = vrot.slane %v1232_v31, %v6123_v28  ;;  %v1255_v24 = vrot.slane %v1233_v45, %v6123_v28  ;;  %4440 = vst.msk [vmem:[%s6221_s8 + $0x100] sm:$0xff] %vm4423_vm2, %v3559_v40  ;;  %5500 = vst.msk [vmem:[%s6221_s8 + $0x120] sm:$0xff] %vm4423_vm2, %v3559_v40  ;;  %v1263_v39 = vcombine.high %v1241_v9, %v1241_v9  ;;  %v7993_v40 = vld [vmem:[#allocation9_spill] sm:$0xff] }
 0x157   : > { %v2602_v61 = vrot.slane %v1241_v9, %v6134_v3  ;;  %v1185_v26 = vcombine.high %v1183_v59, %v1183_v59  ;;  %v1199_v43 = vrot.slane %v1183_v59, %v6123_v28  ;;  %7990 = vst [vmem:[#allocation10_spill] sm:$0xff] %v6801_v55  ;;  %4441 = vst.msk [vmem:[%s6221_s8 + $0x108] sm:$0xff] %vm4423_vm2, %v3576_v37  ;;  %v7994_v59 = vld [vmem:[#allocation13_spill] sm:$0xff]  ;;  %v6829_v57 = vpop.permute.xlu0 %4961 }
 0x158   : > { %5501 = vst.msk [vmem:[%s6221_s8 + $0x128] sm:$0xff] %vm4423_vm2, %v3576_v37  ;;  %v1262_v21 = vrot.slane %v1234_v11, %v6123_v28  ;;  %v1264_v31 = vcombine.high %v1248_v18, %v1248_v18  ;;  %v1265_v45 = vcombine.high %v1255_v24, %v1255_v24  ;;  %v2606_v9 = vrot.slane %v1255_v24, %v6134_v3 }
 0x159   : > { %5226 = vst.msk [vmem:[%s6221_s8 + $0x100] sm:$0xff] %vm5193_vm3, %v7991_v19  ;;  %5230 = vst.msk [vmem:[%s6221_s8 + $0x120] sm:$0xff] %vm5193_vm3, %v7992_v34  ;;  %v2610_v37 = vrot.slane %v1263_v39, %v6134_v3  ;;  %v2618_v22 = vrot.slane %v1248_v18, %v6134_v3  ;;  %v1206_v19 = vrot.slane %v1184_v46, %v6123_v28  ;;  %v6831_v46 = vpop.f32.mrb[13].mxu1 }
 0x15a   : > { %5227 = vst.msk [vmem:[%s6221_s8 + $0x108] sm:$0xff] %vm5193_vm3, %v7993_v40  ;;  %5231 = vst.msk [vmem:[%s6221_s8 + $0x128] sm:$0xff] %vm5193_vm3, %v7994_v59  ;;  %v1213_v34 = vrot.slane %v1185_v26, %v6123_v28  ;;  %v1266_v5 = vcombine.high %v1262_v21, %v1262_v21  ;;  %v2614_v11 = vrot.slane %v1265_v45, %v6134_v3 }
 0x15b   : > { %v2622_v53 = vrot.slane %v1262_v21, %v6134_v3  ;;  %v2626_v24 = vrot.slane %v1264_v31, %v6134_v3  ;;  %v3645_v8 = vcombine.low %v2602_v61, %v2606_v9  ;;  %v1214_v40 = vcombine.high %v1192_v15, %v1192_v15  ;;  %7995 = vst [vmem:[#allocation14_spill] sm:$0xff] %v6831_v46  ;;  %v6837_v31 = vpop.permute.xlu1 %4963 }
 0x15c   : > { %v1215_v7 = vcombine.high %v1199_v43, %v1199_v43  ;;  %v1216_v55 = vcombine.high %v1206_v19, %v1206_v19  ;;  %v2630_v59 = vrot.slane %v1266_v5, %v6134_v3  ;;  %v3646_v39 = vcombine.low %v2610_v37, %v2614_v11 }
 0x15d   : > { %v3662_v10 = vcombine.low %v2618_v22, %v2622_v53  ;;  %v1217_v18 = vcombine.high %v1213_v34, %v1213_v34  ;;  %v3653_v26 = vrot.slane %v3645_v8, %v6136_v4  ;;  %v2570_v45 = vrot.slane %v1192_v15, %v6134_v3 }
 0x15e   : > { %v2574_v21 = vrot.slane %v1206_v19, %v6134_v3  ;;  %v2578_v61 = vrot.slane %v1214_v40, %v6134_v3  ;;  %v3660_v9 = vrot.slane %v3646_v39, %v6136_v4  ;;  %v3663_v5 = vcombine.low %v2626_v24, %v2630_v59 }
 0x15f   : > { %v3670_v53 = vrot.slane %v3662_v10, %v6136_v4  ;;  %v2582_v22 = vrot.slane %v1216_v55, %v6134_v3  ;;  %v2586_v37 = vrot.slane %v1199_v43, %v6134_v3  ;;  %v2590_v8 = vrot.slane %v1213_v34, %v6134_v3 }
 0x160   : > { %v2594_v15 = vrot.slane %v1215_v7, %v6134_v3  ;;  %v2598_v19 = vrot.slane %v1217_v18, %v6134_v3  ;;  %v3661_v11 = vcombine.low %v3653_v26, %v3660_v9  ;;  %v3677_v40 = vrot.slane %v3663_v5, %v6136_v4  ;;  %v7996_v26 = vld [vmem:[#allocation20_spill] sm:$0xff] }
 0x161   : > { %v3611_v24 = vcombine.low %v2570_v45, %v2574_v21  ;;  %v3612_v59 = vcombine.low %v2578_v61, %v2582_v22  ;;  %v3628_v39 = vcombine.low %v2586_v37, %v2590_v8  ;;  %v1316_v55 = vcombine.high %v6759_v25, %v6759_v25  ;;  %v6859_v21 = vpop.permute.xlu0 %4965  ;;  %v7998_v61 = vld [vmem:[#allocation18_spill] sm:$0xff]  ;;  %v6870_v22 = vpop.permute.xlu1 %4967 }
 0x162   : > { %v3629_v10 = vcombine.low %v2594_v15, %v2598_v19  ;;  %v1323_v43 = vrot.slane %v6759_v25, %v6123_v28  ;;  %v3678_v7 = vcombine.low %v3670_v53, %v3677_v40  ;;  %4446 = vst.msk [vmem:[%s6221_s8 + $0x150] sm:$0xff] %vm4423_vm2, %v3661_v11  ;;  %5506 = vst.msk [vmem:[%s6221_s8 + $0x170] sm:$0xff] %vm4423_vm2, %v3661_v11  ;;  %v6878_v19 = vpop.f32.mrb[14].mxu1  ;;  %v8001_v11 = vld [vmem:[#allocation19_spill] sm:$0xff] }
 0x163   : > { %v3619_v34 = vrot.slane %v3611_v24, %v6136_v4  ;;  %v3626_v18 = vrot.slane %v3612_v59, %v6136_v4  ;;  %v584_v45 = vadd.f32 %v6745_v27, %v7996_v26  ;;  %7997 = vst [vmem:[#allocation11_spill] sm:$0xff] %v6859_v21  ;;  %5236 = vst.msk [vmem:[%s6221_s8 + $0x150] sm:$0xff] %vm5193_vm3, %v7998_v61 }
 0x164   : > { %5240 = vst.msk [vmem:[%s6221_s8 + $0x170] sm:$0xff] %vm5193_vm3, %v6230_v48  ;;  %v3636_v25 = vrot.slane %v3628_v39, %v6136_v4  ;;  %v3643_v9 = vrot.slane %v3629_v10, %v6136_v4  ;;  %v1330_v5 = vrot.slane %v1316_v55, %v6123_v28  ;;  %v1331_v53 = vcombine.high %v1323_v43, %v1323_v43 }
 0x165   : > { %7999 = vst [vmem:[#allocation15_spill] sm:$0xff] %v6870_v22  ;;  %4447 = vst.msk [vmem:[%s6221_s8 + $0x158] sm:$0xff] %vm4423_vm2, %v3678_v7  ;;  %v3627_v37 = vcombine.low %v3619_v34, %v3626_v18  ;;  %v1339_v8 = vrot.slane %v1323_v43, %v6123_v28  ;;  %v1610_v48 = vcombine.high %v584_v45, %v584_v45  ;;  %v8003_v34 = vld [vmem:[#allocation21_spill] sm:$0xff] }
 0x166   : > { %5507 = vst.msk [vmem:[%s6221_s8 + $0x178] sm:$0xff] %vm4423_vm2, %v3678_v7  ;;  %v1617_v15 = vrot.slane %v584_v45, %v6123_v28  ;;  %8000 = vst [vmem:[#allocation8_spill] sm:$0xff] %v6878_v19  ;;  %v3644_v40 = vcombine.low %v3636_v25, %v3643_v9  ;;  %v1332_v24 = vcombine.high %v1330_v5, %v1330_v5  ;;  %v8004_v25 = vld [vmem:[#allocation17_spill] sm:$0xff]  ;;  %v8005_v9 = vld [vmem:[#allocation23_spill] sm:$0xff] }
 0x167   : > { %5237 = vst.msk [vmem:[%s6221_s8 + $0x158] sm:$0xff] %vm5193_vm3, %v8001_v11  ;;  %5241 = vst.msk [vmem:[%s6221_s8 + $0x178] sm:$0xff] %vm5193_vm3, %v6238_v0  ;;  %v1346_v59 = vrot.slane %v1330_v5, %v6123_v28  ;;  %v1353_v39 = vrot.slane %v1331_v53, %v6123_v28  ;;  %v1361_v10 = vcombine.high %v1339_v8, %v1339_v8  ;;  %v8002_v0 = vld [vmem:[#allocation16_spill] sm:$0xff] }
 0x168   : > { %4444 = vst.msk [vmem:[%s6221_s8 + $0x140] sm:$0xff] %vm4423_vm2, %v3627_v37  ;;  %5504 = vst.msk [vmem:[%s6221_s8 + $0x160] sm:$0xff] %vm4423_vm2, %v3627_v37  ;;  %v2666_v55 = vrot.slane %v1339_v8, %v6134_v3  ;;  %v1624_v43 = vrot.slane %v1610_v48, %v6123_v28  ;;  %v1625_v7 = vcombine.high %v1617_v15, %v1617_v15  ;;  %v6915_v48 = vpop.permute.xlu0 %4969 }
 0x169   : > { %4445 = vst.msk [vmem:[%s6221_s8 + $0x148] sm:$0xff] %vm4423_vm2, %v3644_v40  ;;  %5505 = vst.msk [vmem:[%s6221_s8 + $0x168] sm:$0xff] %vm4423_vm2, %v3644_v40  ;;  %v1360_v18 = vrot.slane %v1332_v24, %v6123_v28  ;;  %v1362_v26 = vcombine.high %v1346_v59, %v1346_v59  ;;  %v1363_v45 = vcombine.high %v1353_v39, %v1353_v39 }
 0x16a   : > { %5234 = vst.msk [vmem:[%s6221_s8 + $0x140] sm:$0xff] %vm5193_vm3, %v8002_v0  ;;  %5238 = vst.msk [vmem:[%s6221_s8 + $0x160] sm:$0xff] %vm5193_vm3, %v8003_v34  ;;  %v2670_v61 = vrot.slane %v1353_v39, %v6134_v3  ;;  %v2674_v5 = vrot.slane %v1361_v10, %v6134_v3  ;;  %v2682_v53 = vrot.slane %v1346_v59, %v6134_v3  ;;  %v6920_v0 = vpop.permute.xlu1 %4971 }
 0x16b   : > { %5235 = vst.msk [vmem:[%s6221_s8 + $0x148] sm:$0xff] %vm5193_vm3, %v8004_v25  ;;  %5239 = vst.msk [vmem:[%s6221_s8 + $0x168] sm:$0xff] %vm5193_vm3, %v8005_v9  ;;  %v1626_v37 = vcombine.high %v1624_v43, %v1624_v43  ;;  %v1633_v8 = vrot.slane %v1617_v15, %v6123_v28  ;;  %v1364_v11 = vcombine.high %v1360_v18, %v1360_v18 }
 0x16c   : > { %8006 = vst [vmem:[#allocation12_spill] sm:$0xff] %v6915_v48  ;;  %v2678_v40 = vrot.slane %v1363_v45, %v6134_v3  ;;  %v2686_v24 = vrot.slane %v1360_v18, %v6134_v3  ;;  %v2690_v39 = vrot.slane %v1362_v26, %v6134_v3  ;;  %8007 = vst [vmem:[#allocation9_spill] sm:$0xff] %v6920_v0  ;;  %v6927_v26 = vpop.f32.mrb[15].mxu1 }
 0x16d   : > { %v3713_v34 = vcombine.low %v2666_v55, %v2670_v61  ;;  %v1640_v25 = vrot.slane %v1624_v43, %v6123_v28  ;;  %v1647_v10 = vrot.slane %v1625_v7, %v6123_v28  ;;  %v1654_v59 = vrot.slane %v1626_v37, %v6123_v28  ;;  %8008 = vst [vmem:[#allocation13_spill] sm:$0xff] %v6927_v26 }
 0x16e   : > { %v2694_v15 = vrot.slane %v1364_v11, %v6134_v3  ;;  %v3714_v9 = vcombine.low %v2674_v5, %v2678_v40  ;;  %v3730_v19 = vcombine.low %v2682_v53, %v2686_v24  ;;  %v1655_v46 = vcombine.high %v1633_v8, %v1633_v8  ;;  %v6936_v40 = vpop.permute.xlu0 %4973 }
 0x16f   : > { %v3721_v45 = vrot.slane %v3713_v34, %v6136_v4  ;;  %v1656_v48 = vcombine.high %v1640_v25, %v1640_v25  ;;  %v1657_v18 = vcombine.high %v1647_v10, %v1647_v10  ;;  %v1658_v21 = vcombine.high %v1654_v59, %v1654_v59  ;;  %8009 = vst [vmem:[#allocation20_spill] sm:$0xff] %v6936_v40  ;;  %v6943_v34 = vpop.permute.xlu1 %4975 }
 0x170   : > { %v3728_v55 = vrot.slane %v3714_v9, %v6136_v4  ;;  %v3731_v61 = vcombine.low %v2690_v39, %v2694_v15  ;;  %v3738_v43 = vrot.slane %v3730_v19, %v6136_v4  ;;  %v2858_v7 = vrot.slane %v1633_v8, %v6134_v3  ;;  %8010 = vst [vmem:[#allocation18_spill] sm:$0xff] %v6943_v34 }
 0x171   : > { %v2862_v37 = vrot.slane %v1647_v10, %v6134_v3  ;;  %v2866_v5 = vrot.slane %v1655_v46, %v6134_v3  ;;  %v2870_v53 = vrot.slane %v1657_v18, %v6134_v3  ;;  %v2874_v11 = vrot.slane %v1640_v25, %v6134_v3 }
 0x172   : > { %v3729_v24 = vcombine.low %v3721_v45, %v3728_v55  ;;  %v3745_v39 = vrot.slane %v3731_v61, %v6136_v4  ;;  %v2878_v19 = vrot.slane %v1654_v59, %v6134_v3  ;;  %v6941_v8 = vrot.slane %v1656_v48, %v6134_v3  ;;  %v8011_v59 = vld [vmem:[#allocation22_spill] sm:$0xff] }
 0x173   : > { %v6946_v46 = vrot.slane %v1658_v21, %v6134_v3  ;;  %v6948_v10 = vcombine.low %v2858_v7, %v2862_v37  ;;  %v3918_v25 = vcombine.low %v2866_v5, %v2870_v53  ;;  %v549_v15 = vadd.f32 %v6745_v27, %v6319_v12 }
 0x174   : > { %v3746_v9 = vcombine.low %v3738_v43, %v3745_v39  ;;  %4450 = vst.msk [vmem:[%s6221_s8 + $0x190] sm:$0xff] %vm4423_vm2, %v3729_v24  ;;  %5510 = vst.msk [vmem:[%s6221_s8 + $0x1b0] sm:$0xff] %vm4423_vm2, %v3729_v24  ;;  %v6956_v48 = vcombine.low %v2874_v11, %v2878_v19  ;;  %v579_v21 = vadd.f32 %v6745_v27, %v8011_v59  ;;  %v6997_v11 = vpop.permute.xlu0 %4977 }
 0x175   : > { %v564_v45 = vadd.f32 %v6745_v27, %v6331_v52  ;;  %5244 = vst.msk [vmem:[%s6221_s8 + $0x190] sm:$0xff] %vm5193_vm3, %v6333_v23  ;;  %5248 = vst.msk [vmem:[%s6221_s8 + $0x1b0] sm:$0xff] %vm5193_vm3, %v6433_v50  ;;  %v6971_v18 = vrot.slane %v3918_v25, %v6136_v4  ;;  %v1267_v61 = vcombine.high %v549_v15, %v549_v15  ;;  %v7001_v25 = vpop.permute.xlu1 %4979 }
 0x176   : > { %4451 = vst.msk [vmem:[%s6221_s8 + $0x198] sm:$0xff] %vm4423_vm2, %v3746_v9  ;;  %5511 = vst.msk [vmem:[%s6221_s8 + $0x1b8] sm:$0xff] %vm4423_vm2, %v3746_v9  ;;  %v1274_v23 = vrot.slane %v549_v15, %v6123_v28  ;;  %v1561_v50 = vcombine.high %v579_v21, %v579_v21  ;;  %v1568_v43 = vrot.slane %v579_v21, %v6123_v28 }
 0x177   : > { %5245 = vst.msk [vmem:[%s6221_s8 + $0x198] sm:$0xff] %vm5193_vm3, %v6338_v30  ;;  %5249 = vst.msk [vmem:[%s6221_s8 + $0x1b8] sm:$0xff] %vm5193_vm3, %v6438_v51  ;;  %v1281_v7 = vrot.slane %v1267_v61, %v6123_v28  ;;  %v1414_v37 = vcombine.high %v564_v45, %v564_v45  ;;  %v6991_v5 = vrot.slane %v564_v45, %v6123_v28 }
 0x178   : > { %v6995_v53 = vadd.f32 %v6745_v27, %v6336_v32  ;;  %8012 = vst [vmem:[#allocation19_spill] sm:$0xff] %v6997_v11  ;;  %v1282_v24 = vcombine.high %v1274_v23, %v1274_v23  ;;  %v1290_v39 = vrot.slane %v1274_v23, %v6123_v28  ;;  %v1575_v30 = vrot.slane %v1561_v50, %v6123_v28 }
 0x179   : > { %v1576_v19 = vcombine.high %v1568_v43, %v1568_v43  ;;  %8013 = vst [vmem:[#allocation16_spill] sm:$0xff] %v7001_v25  ;;  %v1283_v51 = vcombine.high %v1281_v7, %v1281_v7  ;;  %v1297_v15 = vrot.slane %v1281_v7, %v6123_v28  ;;  %v1584_v9 = vrot.slane %v1568_v43, %v6123_v28  ;;  %v7022_v0 = vpop.permute.xlu1 %4983 }
 0x17a   : > { %v7006_v59 = vrot.slane %v1414_v37, %v6123_v28  ;;  %v1304_v32 = vrot.slane %v1282_v24, %v6123_v28  ;;  %v1312_v21 = vcombine.high %v1290_v39, %v1290_v39  ;;  %v2634_v45 = vrot.slane %v1290_v39, %v6134_v3  ;;  %8015 = vst [vmem:[#allocation17_spill] sm:$0xff] %v7022_v0 }
 0x17b   : > { %v1577_v61 = vcombine.high %v1575_v30, %v1575_v30  ;;  %v1311_v23 = vrot.slane %v1283_v51, %v6123_v28  ;;  %v1313_v50 = vcombine.high %v1297_v15, %v1297_v15  ;;  %v2650_v12 = vrot.slane %v1297_v15, %v6134_v3  ;;  %v7019_v51 = vpop.permute.xlu0 %4981 }
 0x17c   : > { %v1591_v52 = vrot.slane %v1575_v30, %v6123_v28  ;;  %v1314_v55 = vcombine.high %v1304_v32, %v1304_v32  ;;  %v2638_v7 = vrot.slane %v1304_v32, %v6134_v3  ;;  %v2642_v43 = vrot.slane %v1312_v21, %v6134_v3  ;;  %8014 = vst [vmem:[#allocation21_spill] sm:$0xff] %v7019_v51 }
 0x17d   : > { %v1598_v37 = vrot.slane %v1576_v19, %v6123_v28  ;;  %v1315_v26 = vcombine.high %v1311_v23, %v1311_v23  ;;  %v2654_v24 = vrot.slane %v1311_v23, %v6134_v3  ;;  %v2658_v39 = vrot.slane %v1313_v50, %v6134_v3 }
 0x17e   : > { %v1605_v40 = vrot.slane %v1577_v61, %v6123_v28  ;;  %v2646_v15 = vrot.slane %v1314_v55, %v6134_v3  ;;  %v3679_v34 = vcombine.low %v2634_v45, %v2638_v7  ;;  %v1606_v30 = vcombine.high %v1584_v9, %v1584_v9 }
 0x17f   : > { %v1607_v25 = vcombine.high %v1591_v52, %v1591_v52  ;;  %v2662_v32 = vrot.slane %v1315_v26, %v6134_v3  ;;  %v3696_v21 = vcombine.low %v2650_v12, %v2654_v24  ;;  %v1608_v19 = vcombine.high %v1598_v37, %v1598_v37 }
 0x180   : > { %v1609_v11 = vcombine.high %v1605_v40, %v1605_v40  ;;  %v3680_v22 = vcombine.low %v2642_v43, %v2646_v15  ;;  %v3687_v23 = vrot.slane %v3679_v34, %v6136_v4  ;;  %v2826_v50 = vrot.slane %v1584_v9, %v6134_v3 }
 0x181   : > { %v2830_v61 = vrot.slane %v1598_v37, %v6134_v3  ;;  %v3697_v51 = vcombine.low %v2658_v39, %v2662_v32  ;;  %v3704_v55 = vrot.slane %v3696_v21, %v6136_v4  ;;  %v2834_v45 = vrot.slane %v1606_v30, %v6134_v3  ;;  %v7043_v39 = vpop.permute.xlu0 %4985 }
 0x182   : > { %v2838_v7 = vrot.slane %v1608_v19, %v6134_v3  ;;  %v3694_v0 = vrot.slane %v3680_v22, %v6136_v4  ;;  %v2842_v26 = vrot.slane %v1591_v52, %v6134_v3  ;;  %v2846_v12 = vrot.slane %v1605_v40, %v6134_v3 }
 0x183   : > { %v7035_v34 = vrot.slane %v1607_v25, %v6134_v3  ;;  %v3711_v9 = vrot.slane %v3697_v51, %v6136_v4  ;;  %v7039_v43 = vrot.slane %v1609_v11, %v6134_v3  ;;  %v7041_v37 = vcombine.low %v2826_v50, %v2830_v61  ;;  %v7051_v11 = vpop.permute.xlu1 %4987 }
 0x184   : > { %v3884_v24 = vcombine.low %v2834_v45, %v2838_v7  ;;  %v3695_v22 = vcombine.low %v3687_v23, %v3694_v0  ;;  %v7045_v52 = vcombine.low %v2842_v26, %v2846_v12  ;;  %v1429_v40 = vcombine.high %v6991_v5, %v6991_v5  ;;  %v8017_v45 = vld [vmem:[#allocation24_spill] sm:$0xff] }
 0x185   : > { %v1430_v25 = vcombine.high %v7006_v59, %v7006_v59  ;;  %v3712_v51 = vcombine.low %v3704_v55, %v3711_v9  ;;  %v3901_v0 = vcombine.low %v7035_v34, %v7039_v43  ;;  %v1437_v21 = vrot.slane %v6991_v5, %v6123_v28 }
 0x186   : > { %v7056_v30 = vrot.slane %v3884_v24, %v6136_v4  ;;  %4448 = vst.msk [vmem:[%s6221_s8 + $0x180] sm:$0xff] %vm4423_vm2, %v3695_v22  ;;  %5508 = vst.msk [vmem:[%s6221_s8 + $0x1a0] sm:$0xff] %vm4423_vm2, %v3695_v22  ;;  %v1444_v19 = vrot.slane %v7006_v59, %v6123_v28  ;;  %v1451_v23 = vrot.slane %v1429_v40, %v6123_v28 }
 0x187   : > { %4449 = vst.msk [vmem:[%s6221_s8 + $0x188] sm:$0xff] %vm4423_vm2, %v3712_v51  ;;  %5509 = vst.msk [vmem:[%s6221_s8 + $0x1a8] sm:$0xff] %vm4423_vm2, %v3712_v51  ;;  %v1458_v50 = vrot.slane %v1430_v25, %v6123_v28  ;;  %v1365_v5 = vcombine.high %v6995_v53, %v6995_v53  ;;  %v1372_v59 = vrot.slane %v6995_v53, %v6123_v28  ;;  %v7106_v25 = vpop.permute.xlu1 %4991 }
 0x188   : > { %5242 = vst.msk [vmem:[%s6221_s8 + $0x180] sm:$0xff] %vm5193_vm3, %v6283_v35  ;;  %5246 = vst.msk [vmem:[%s6221_s8 + $0x1a0] sm:$0xff] %vm5193_vm3, %v6378_v20  ;;  %v8016_v61 = vcombine.low %v6554_v36, %v6557_v63  ;;  %v1459_v35 = vcombine.high %v1437_v21, %v1437_v21  ;;  %v1460_v20 = vcombine.high %v1444_v19, %v1444_v19  ;;  %v7100_v36 = vpop.permute.xlu0 %4989 }
 0x189   : > { %5243 = vst.msk [vmem:[%s6221_s8 + $0x188] sm:$0xff] %vm5193_vm3, %v8017_v45  ;;  %5247 = vst.msk [vmem:[%s6221_s8 + $0x1a8] sm:$0xff] %vm5193_vm3, %v6389_v58  ;;  %v1461_v7 = vcombine.high %v1451_v23, %v1451_v23  ;;  %v2730_v26 = vrot.slane %v1437_v21, %v6134_v3  ;;  %v1462_v12 = vcombine.high %v1458_v50, %v1458_v50 }
 0x18a   : > { %v3847_v55 = vrot.slane %v8016_v61, %v6136_v4  ;;  %v2734_v9 = vrot.slane %v1451_v23, %v6134_v3  ;;  %v2746_v53 = vrot.slane %v1444_v19, %v6134_v3  ;;  %v2750_v24 = vrot.slane %v1458_v50, %v6134_v3 }
 0x18b   : > { %v2738_v63 = vrot.slane %v1459_v35, %v6134_v3  ;;  %v2742_v22 = vrot.slane %v1461_v7, %v6134_v3  ;;  %v2754_v58 = vrot.slane %v1460_v20, %v6134_v3  ;;  %v1379_v40 = vrot.slane %v1365_v5, %v6123_v28 }
 0x18c   : > { %v2758_v51 = vrot.slane %v1462_v12, %v6134_v3  ;;  %v3781_v21 = vcombine.low %v2730_v26, %v2734_v9  ;;  %v3798_v23 = vcombine.low %v2746_v53, %v2750_v24  ;;  %v1380_v61 = vcombine.high %v1372_v59, %v1372_v59 }
 0x18d   : > { %v3782_v19 = vcombine.low %v2738_v63, %v2742_v22  ;;  %v1381_v45 = vcombine.high %v1379_v40, %v1379_v40  ;;  %v1388_v50 = vrot.slane %v1372_v59, %v6123_v28  ;;  %v1395_v15 = vrot.slane %v1379_v40, %v6123_v28  ;;  %v7119_v22 = vpop.permute.xlu0 %4993 }
 0x18e   : > { %v3789_v35 = vrot.slane %v3781_v21, %v6136_v4  ;;  %v3799_v7 = vcombine.low %v2754_v58, %v2758_v51  ;;  %v3806_v20 = vrot.slane %v3798_v23, %v6136_v4  ;;  %v1402_v5 = vrot.slane %v1380_v61, %v6123_v28  ;;  %v7123_v23 = vpop.permute.xlu1 %4995 }
 0x18f   : > { %v3796_v32 = vrot.slane %v3782_v19, %v6136_v4  ;;  %v1409_v12 = vrot.slane %v1381_v45, %v6123_v28  ;;  %v1410_v26 = vcombine.high %v1388_v50, %v1388_v50  ;;  %v1411_v9 = vcombine.high %v1395_v15, %v1395_v15 }
 0x190   : > { %v3813_v53 = vrot.slane %v3799_v7, %v6136_v4  ;;  %v1412_v59 = vcombine.high %v1402_v5, %v1402_v5  ;;  %v2698_v24 = vrot.slane %v1388_v50, %v6134_v3  ;;  %v2702_v63 = vrot.slane %v1402_v5, %v6134_v3 }
 0x191   : > { %v3797_v58 = vcombine.low %v3789_v35, %v3796_v32  ;;  %v1413_v40 = vcombine.high %v1409_v12, %v1409_v12  ;;  %v2706_v51 = vrot.slane %v1410_v26, %v6134_v3  ;;  %v2714_v21 = vrot.slane %v1395_v15, %v6134_v3 }
 0x192   : > { %v3814_v61 = vcombine.low %v3806_v20, %v3813_v53  ;;  %v2710_v19 = vrot.slane %v1412_v59, %v6134_v3  ;;  %v2718_v45 = vrot.slane %v1409_v12, %v6134_v3  ;;  %v2722_v50 = vrot.slane %v1411_v9, %v6134_v3  ;;  %v8024_v9 = vld [vmem:[#allocation27_spill] sm:$0xff] }
 0x193   : > { %4454 = vst.msk [vmem:[%s6221_s8 + $0x1d0] sm:$0xff] %vm4423_vm2, %v3797_v58  ;;  %5514 = vst.msk [vmem:[%s6221_s8 + $0x1f0] sm:$0xff] %vm4423_vm2, %v3797_v58  ;;  %v2726_v32 = vrot.slane %v1413_v40, %v6134_v3  ;;  %v3747_v35 = vcombine.low %v2698_v24, %v2702_v63  ;;  %v8018_v15 = vrot.slane %v6567_v54, %v6136_v4 }
 0x194   : > { %v8019_v20 = vrot.slane %v6559_v2, %v6136_v4  ;;  %4455 = vst.msk [vmem:[%s6221_s8 + $0x1d8] sm:$0xff] %vm4423_vm2, %v3814_v61  ;;  %5515 = vst.msk [vmem:[%s6221_s8 + $0x1f8] sm:$0xff] %vm4423_vm2, %v3814_v61  ;;  %v3748_v54 = vcombine.low %v2706_v51, %v2710_v19  ;;  %v8020_v2 = vcombine.low %v6460_v16, %v6463_v60 }
 0x195   : > { %v3848_v7 = vcombine.low %v8018_v15, %v3847_v55  ;;  %5252 = vst.msk [vmem:[%s6221_s8 + $0x1d0] sm:$0xff] %vm5193_vm3, %v6513_v17  ;;  %5256 = vst.msk [vmem:[%s6221_s8 + $0x1f0] sm:$0xff] %vm5193_vm3, %v6573_v47  ;;  %v3764_v55 = vcombine.low %v2714_v21, %v2718_v45  ;;  %v8021_v12 = vrot.slane %v6465_v44, %v6136_v4  ;;  %v8022_v47 = vld [vmem:[#allocation34_spill] sm:$0xff]  ;;  %v8029_v45 = vld [vmem:[#allocation25_spill] sm:$0xff] }
 0x196   : > { %v3831_v5 = vcombine.low %v8019_v20, %v6603_v62  ;;  %v3881_v62 = vrot.slane %v8020_v2, %v6136_v4  ;;  %5253 = vst.msk [vmem:[%s6221_s8 + $0x1d8] sm:$0xff] %vm5193_vm3, %v6523_v13  ;;  %5257 = vst.msk [vmem:[%s6221_s8 + $0x1f8] sm:$0xff] %vm5193_vm3, %v6594_v1  ;;  %v3755_v17 = vrot.slane %v3747_v35, %v6136_v4  ;;  %v8023_v1 = vld [vmem:[#allocation33_spill] sm:$0xff] }
 0x197   : > { %v3865_v26 = vcombine.low %v8021_v12, %v6487_v33  ;;  %v3765_v16 = vcombine.low %v2722_v50, %v2726_v32  ;;  %4457 = vst.msk [vmem:[%s6221_s8 + $0x208] sm:$0xff] %vm4423_vm2, %v3848_v7  ;;  %5517 = vst.msk [vmem:[%s6221_s8 + $0x228] sm:$0xff] %vm4423_vm2, %v3848_v7  ;;  %v594_v60 = vadd.f32 %v6745_v27, %v6409_v14  ;;  %v8030_v50 = vld [vmem:[#allocation29_spill] sm:$0xff] }
 0x198   : > { %4456 = vst.msk [vmem:[%s6221_s8 + $0x200] sm:$0xff] %vm4423_vm2, %v3831_v5  ;;  %5516 = vst.msk [vmem:[%s6221_s8 + $0x220] sm:$0xff] %vm4423_vm2, %v3831_v5  ;;  %v589_v44 = vadd.f32 %v6745_v27, %v6445_v56  ;;  %v3762_v33 = vrot.slane %v3748_v54, %v6136_v4  ;;  %v3772_v13 = vrot.slane %v3764_v55, %v6136_v4  ;;  %v7202_v56 = vpop.permute.xlu0 %4997  ;;  %v8031_v20 = vld [vmem:[#allocation5_spill] sm:$0xff]  ;;  %v8034_v5 = vld [vmem:[#allocation31_spill] sm:$0xff] }
 0x199   : > { %5259 = vst.msk [vmem:[%s6221_s8 + $0x208] sm:$0xff] %vm5193_vm3, %v8022_v47  ;;  %5258 = vst.msk [vmem:[%s6221_s8 + $0x200] sm:$0xff] %vm5193_vm3, %v8023_v1  ;;  %v8025_v53 = vrot.slane %v8024_v9, %v6136_v4  ;;  %v3915_v14 = vrot.slane %v3901_v0, %v6136_v4  ;;  %v3779_v24 = vrot.slane %v3765_v16, %v6136_v4 }
 0x19a   : > { %4458 = vst.msk [vmem:[%s6221_s8 + $0x210] sm:$0xff] %vm4423_vm2, %v3865_v26  ;;  %5518 = vst.msk [vmem:[%s6221_s8 + $0x230] sm:$0xff] %vm4423_vm2, %v3865_v26  ;;  %v1708_v63 = vcombine.high %v594_v60, %v594_v60  ;;  %v1659_v58 = vcombine.high %v589_v44, %v589_v44  ;;  %v3763_v34 = vcombine.low %v3755_v17, %v3762_v33 }
 0x19b   : > { %v3882_v59 = vcombine.low %v8025_v53, %v3881_v62  ;;  %5263 = vst.msk [vmem:[%s6221_s8 + $0x228] sm:$0xff] %vm5193_vm3, %v6688_v41  ;;  %5262 = vst.msk [vmem:[%s6221_s8 + $0x220] sm:$0xff] %vm5193_vm3, %v6682_v6  ;;  %v1715_v41 = vrot.slane %v594_v60, %v6123_v28  ;;  %v7212_v6 = vpop.permute.xlu1 %4999  ;;  %v8026_v43 = vrot.slane %v7045_v52, %v6136_v4 }
 0x19c   : > { %5260 = vst.msk [vmem:[%s6221_s8 + $0x210] sm:$0xff] %vm5193_vm3, %v6641_v42  ;;  %5264 = vst.msk [vmem:[%s6221_s8 + $0x230] sm:$0xff] %vm5193_vm3, %v6722_v29  ;;  %v1666_v42 = vrot.slane %v589_v44, %v6123_v28  ;;  %v8027_v29 = vrot.slane %v7041_v37, %v6136_v4  ;;  %v3780_v51 = vcombine.low %v3772_v13, %v3779_v24  ;;  %v7285_v12 = vpop.permute.xlu0 %5001 }
 0x19d   : > { %4459 = vst.msk [vmem:[%s6221_s8 + $0x218] sm:$0xff] %vm4423_vm2, %v3882_v59  ;;  %5519 = vst.msk [vmem:[%s6221_s8 + $0x238] sm:$0xff] %vm4423_vm2, %v3882_v59  ;;  %v3916_v0 = vcombine.low %v8026_v43, %v3915_v14  ;;  %v1722_v21 = vrot.slane %v1708_v63, %v6123_v28  ;;  %v1723_v61 = vcombine.high %v1715_v41, %v1715_v41 }
 0x19e   : > { %v3899_v40 = vcombine.low %v8027_v29, %v7056_v30  ;;  %5261 = vst.msk [vmem:[%s6221_s8 + $0x218] sm:$0xff] %vm5193_vm3, %v6647_v38  ;;  %v1731_v52 = vrot.slane %v1715_v41, %v6123_v28  ;;  %5265 = vst.msk [vmem:[%s6221_s8 + $0x238] sm:$0xff] %vm5193_vm3, %v6726_v49  ;;  %v1673_v37 = vrot.slane %v1659_v58, %v6123_v28 }
 0x19f   : > { %4452 = vst.msk [vmem:[%s6221_s8 + $0x1c0] sm:$0xff] %vm4423_vm2, %v3763_v34  ;;  %5512 = vst.msk [vmem:[%s6221_s8 + $0x1e0] sm:$0xff] %vm4423_vm2, %v3763_v34  ;;  %v1674_v30 = vcombine.high %v1666_v42, %v1666_v42  ;;  %v1682_v38 = vrot.slane %v1666_v42, %v6123_v28  ;;  %v8028_v49 = vcombine.low %v6941_v8, %v6946_v46  ;;  %v8032_v8 = vld [vmem:[#allocation2_spill] sm:$0xff]  ;;  %v7289_v16 = vpop.permute.xlu1 %5003 }
 0x1a0   : > { %4461 = vst.msk [vmem:[%s6221_s8 + $0x248] sm:$0xff] %vm4423_vm2, %v3916_v0  ;;  %5521 = vst.msk [vmem:[%s6221_s8 + $0x268] sm:$0xff] %vm4423_vm2, %v3916_v0  ;;  %v1724_v32 = vcombine.high %v1722_v21, %v1722_v21  ;;  %v1738_v35 = vrot.slane %v1722_v21, %v6123_v28  ;;  %v1745_v15 = vrot.slane %v1723_v61, %v6123_v28  ;;  %v8033_v46 = vld [vmem:[#allocation26_spill] sm:$0xff] }
 0x1a1   : > { %4460 = vst.msk [vmem:[%s6221_s8 + $0x240] sm:$0xff] %vm4423_vm2, %v3899_v40  ;;  %5520 = vst.msk [vmem:[%s6221_s8 + $0x260] sm:$0xff] %vm4423_vm2, %v3899_v40  ;;  %v3949_v19 = vrot.slane %v8028_v49, %v6136_v4  ;;  %v1753_v7 = vcombine.high %v1731_v52, %v1731_v52  ;;  %v2922_v54 = vrot.slane %v1731_v52, %v6134_v3 }
 0x1a2   : > { %4453 = vst.msk [vmem:[%s6221_s8 + $0x1c8] sm:$0xff] %vm4423_vm2, %v3780_v51  ;;  %5513 = vst.msk [vmem:[%s6221_s8 + $0x1e8] sm:$0xff] %vm4423_vm2, %v3780_v51  ;;  %v1675_v55 = vcombine.high %v1673_v37, %v1673_v37  ;;  %v1689_v2 = vrot.slane %v1673_v37, %v6123_v28  ;;  %v1696_v62 = vrot.slane %v1674_v30, %v6123_v28  ;;  %v7308_v51 = vpop.permute.xlu0 %5005 }
 0x1a3   : > { %5250 = vst.msk [vmem:[%s6221_s8 + $0x1c0] sm:$0xff] %vm5193_vm3, %v8029_v45  ;;  %5254 = vst.msk [vmem:[%s6221_s8 + $0x1e0] sm:$0xff] %vm5193_vm3, %v8030_v50  ;;  %v1754_v26 = vcombine.high %v1738_v35, %v1738_v35  ;;  %v1755_v17 = vcombine.high %v1745_v15, %v1745_v15  ;;  %v2930_v60 = vrot.slane %v1753_v7, %v6134_v3  ;;  %v7316_v30 = vpop.permute.xlu1 %5007 }
 0x1a4   : > { %5267 = vst.msk [vmem:[%s6221_s8 + $0x248] sm:$0xff] %vm5193_vm3, %v8031_v20  ;;  %5266 = vst.msk [vmem:[%s6221_s8 + $0x240] sm:$0xff] %vm5193_vm3, %v8032_v8  ;;  %v2938_v44 = vrot.slane %v1738_v35, %v6134_v3  ;;  %v1703_v33 = vrot.slane %v1675_v55, %v6123_v28  ;;  %v1704_v13 = vcombine.high %v1682_v38, %v1682_v38  ;;  %v8037_v8 = vld [vmem:[#allocation28_spill] sm:$0xff] }
 0x1a5   : > { %5271 = vst.msk [vmem:[%s6221_s8 + $0x268] sm:$0xff] %vm5193_vm3, %v6837_v31  ;;  %5270 = vst.msk [vmem:[%s6221_s8 + $0x260] sm:$0xff] %vm5193_vm3, %v6829_v57  ;;  %v1752_v31 = vrot.slane %v1724_v32, %v6123_v28  ;;  %v2926_v57 = vrot.slane %v1745_v15, %v6134_v3  ;;  %v2934_v1 = vrot.slane %v1755_v17, %v6134_v3 }
 0x1a6   : > { %5251 = vst.msk [vmem:[%s6221_s8 + $0x1c8] sm:$0xff] %vm5193_vm3, %v8033_v46  ;;  %5255 = vst.msk [vmem:[%s6221_s8 + $0x1e8] sm:$0xff] %vm5193_vm3, %v8034_v5  ;;  %v2946_v53 = vrot.slane %v1754_v26, %v6134_v3  ;;  %v1705_v14 = vcombine.high %v1689_v2, %v1689_v2  ;;  %v1706_v24 = vcombine.high %v1696_v62, %v1696_v62  ;;  %v8039_v26 = vld [vmem:[#allocation10_spill] sm:$0xff] }
 0x1a7   : > { %v1756_v47 = vcombine.high %v1752_v31, %v1752_v31  ;;  %v2942_v9 = vrot.slane %v1752_v31, %v6134_v3  ;;  %v7297_v59 = vcombine.low %v2922_v54, %v2926_v57  ;;  %v1707_v63 = vcombine.high %v1703_v33, %v1703_v33 }
 0x1a8   : > { %v3986_v58 = vcombine.low %v2930_v60, %v2934_v1  ;;  %v2890_v42 = vrot.slane %v1682_v38, %v6134_v3  ;;  %v2894_v0 = vrot.slane %v1696_v62, %v6134_v3  ;;  %v2898_v29 = vrot.slane %v1704_v13, %v6134_v3  ;;  %v8041_v60 = vld [vmem:[#allocation15_spill] sm:$0xff]  ;;  %v7361_v13 = vpop.permute.xlu0 %5009 }
 0x1a9   : > { %v2950_v41 = vrot.slane %v1756_v47, %v6134_v3  ;;  %v7300_v34 = vcombine.low %v2938_v44, %v2942_v9  ;;  %v3993_v43 = vrot.slane %v7297_v59, %v6136_v4  ;;  %v2902_v40 = vrot.slane %v1706_v24, %v6134_v3  ;;  %v8042_v44 = vld [vmem:[#allocation11_spill] sm:$0xff] }
 0x1aa   : > { %v7311_v21 = vrot.slane %v3986_v58, %v6136_v4  ;;  %v2906_v37 = vrot.slane %v1689_v2, %v6134_v3  ;;  %v2910_v38 = vrot.slane %v1703_v33, %v6134_v3  ;;  %v2914_v49 = vrot.slane %v1705_v14, %v6134_v3  ;;  %v8038_v2 = vld [vmem:[#allocation30_spill] sm:$0xff]  ;;  %v7365_v14 = vpop.permute.xlu1 %5011 }
 0x1ab   : > { %v4003_v61 = vcombine.low %v2946_v53, %v2950_v41  ;;  %v4010_v52 = vrot.slane %v7300_v34, %v6136_v4  ;;  %v2918_v45 = vrot.slane %v1707_v63, %v6134_v3  ;;  %v3951_v50 = vcombine.low %v2890_v42, %v2894_v0 }
 0x1ac   : > { %v3952_v32 = vcombine.low %v2898_v29, %v2902_v40  ;;  %v8035_v35 = vrot.slane %v6956_v48, %v6136_v4  ;;  %v8036_v7 = vrot.slane %v6948_v10, %v6136_v4  ;;  %v604_v46 = vadd.f32 %v6745_v27, %v8037_v8  ;;  %v8046_v8 = vld [vmem:[#allocation16_spill] sm:$0xff] }
 0x1ad   : > { %v3959_v5 = vrot.slane %v3951_v50, %v6136_v4  ;;  %v3968_v54 = vcombine.low %v2906_v37, %v2910_v38  ;;  %v3969_v55 = vcombine.low %v2914_v49, %v2918_v45  ;;  %v599_v48 = vadd.f32 %v6745_v27, %v8038_v2  ;;  %v8040_v27 = vld [vmem:[#allocation6_spill] sm:$0xff]  ;;  %v8043_v45 = vld [vmem:[#allocation12_spill] sm:$0xff]  ;;  %v8044_v50 = vld [vmem:[#allocation19_spill] sm:$0xff]  ;;  %v7399_v2 = vpop.permute.xlu0 %5013 }
 0x1ae   : > { %v3950_v15 = vcombine.low %v8035_v35, %v3949_v19  ;;  %v3933_v20 = vcombine.low %v8036_v7, %v6971_v18  ;;  %v3966_v19 = vrot.slane %v3952_v32, %v6136_v4  ;;  %v1806_v10 = vcombine.high %v604_v46, %v604_v46 }
 0x1af   : > { %v1813_v18 = vrot.slane %v604_v46, %v6123_v28  ;;  %v7344_v62 = vrot.slane %v4003_v61, %v6136_v4  ;;  %v3976_v31 = vrot.slane %v3968_v54, %v6136_v4  ;;  %v1757_v17 = vcombine.high %v599_v48, %v599_v48 }
 0x1b0   : > { %4463 = vst.msk [vmem:[%s6221_s8 + $0x258] sm:$0xff] %vm4423_vm2, %v3950_v15  ;;  %5523 = vst.msk [vmem:[%s6221_s8 + $0x278] sm:$0xff] %vm4423_vm2, %v3950_v15  ;;  %v1764_v57 = vrot.slane %v599_v48, %v6123_v28  ;;  %v3983_v33 = vrot.slane %v3969_v55, %v6136_v4  ;;  %v1820_v47 = vrot.slane %v1806_v10, %v6123_v28 }
 0x1b1   : > { %4462 = vst.msk [vmem:[%s6221_s8 + $0x250] sm:$0xff] %vm4423_vm2, %v3933_v20  ;;  %5522 = vst.msk [vmem:[%s6221_s8 + $0x270] sm:$0xff] %vm4423_vm2, %v3933_v20  ;;  %v1821_v1 = vcombine.high %v1813_v18, %v1813_v18  ;;  %v1829_v9 = vrot.slane %v1813_v18, %v6123_v28  ;;  %v3967_v53 = vcombine.low %v3959_v5, %v3966_v19  ;;  %v8045_v20 = vld [vmem:[#allocation9_spill] sm:$0xff] }
 0x1b2   : > { %5269 = vst.msk [vmem:[%s6221_s8 + $0x258] sm:$0xff] %vm5193_vm3, %v8039_v26  ;;  %5268 = vst.msk [vmem:[%s6221_s8 + $0x250] sm:$0xff] %vm5193_vm3, %v8040_v27  ;;  %v1771_v24 = vrot.slane %v1757_v17, %v6123_v28  ;;  %v1772_v63 = vcombine.high %v1764_v57, %v1764_v57  ;;  %v1780_v41 = vrot.slane %v1764_v57, %v6123_v28 }
 0x1b3   : > { %5273 = vst.msk [vmem:[%s6221_s8 + $0x278] sm:$0xff] %vm5193_vm3, %v8041_v60  ;;  %5272 = vst.msk [vmem:[%s6221_s8 + $0x270] sm:$0xff] %vm5193_vm3, %v8042_v44  ;;  %v3984_v58 = vcombine.low %v3976_v31, %v3983_v33  ;;  %v1822_v42 = vcombine.high %v1820_v47, %v1820_v47  ;;  %v1836_v0 = vrot.slane %v1820_v47, %v6123_v28  ;;  %v7404_v31 = vpop.permute.xlu1 %5015 }
 0x1b4   : > { %v1843_v29 = vrot.slane %v1821_v1, %v6123_v28  ;;  %v1851_v40 = vcombine.high %v1829_v9, %v1829_v9  ;;  %4464 = vst.msk [vmem:[%s6221_s8 + $0x280] sm:$0xff] %vm4423_vm2, %v3967_v53  ;;  %5524 = vst.msk [vmem:[%s6221_s8 + $0x2a0] sm:$0xff] %vm4423_vm2, %v3967_v53  ;;  %v2986_v61 = vrot.slane %v1829_v9, %v6134_v3 }
 0x1b5   : > { %v1773_v37 = vcombine.high %v1771_v24, %v1771_v24  ;;  %v1787_v38 = vrot.slane %v1771_v24, %v6123_v28  ;;  %v1794_v49 = vrot.slane %v1772_v63, %v6123_v28  ;;  %4465 = vst.msk [vmem:[%s6221_s8 + $0x288] sm:$0xff] %vm4423_vm2, %v3984_v58  ;;  %5525 = vst.msk [vmem:[%s6221_s8 + $0x2a8] sm:$0xff] %vm4423_vm2, %v3984_v58 }
 0x1b6   : > { %5274 = vst.msk [vmem:[%s6221_s8 + $0x280] sm:$0xff] %vm5193_vm3, %v8043_v45  ;;  %5278 = vst.msk [vmem:[%s6221_s8 + $0x2a0] sm:$0xff] %vm5193_vm3, %v8044_v50  ;;  %v1850_v32 = vrot.slane %v1822_v42, %v6123_v28  ;;  %v1852_v35 = vcombine.high %v1836_v0, %v1836_v0  ;;  %v1853_v15 = vcombine.high %v1843_v29, %v1843_v29  ;;  %v7439_v50 = vld [vmem:[%s7935_s2] ss:$0 sm:$0xff] }
 0x1b7   : > { %v2990_v7 = vrot.slane %v1843_v29, %v6134_v3  ;;  %5275 = vst.msk [vmem:[%s6221_s8 + $0x288] sm:$0xff] %vm5193_vm3, %v8045_v20  ;;  %5279 = vst.msk [vmem:[%s6221_s8 + $0x2a8] sm:$0xff] %vm5193_vm3, %v8046_v8  ;;  %v2994_v46 = vrot.slane %v1851_v40, %v6134_v3  ;;  %v3002_v5 = vrot.slane %v1836_v0, %v6134_v3 }
 0x1b8   : > { %v1801_v54 = vrot.slane %v1773_v37, %v6123_v28  ;;  %v1802_v55 = vcombine.high %v1780_v41, %v1780_v41  ;;  %v1854_v48 = vcombine.high %v1850_v32, %v1850_v32  ;;  %v2998_v19 = vrot.slane %v1853_v15, %v6134_v3  ;;  %v7426_v37 = vpop.permute.xlu0 %5017  ;;  %v7443_v15 = vpop.permute.xlu1 %5019 }
 0x1b9   : > { %v3006_v10 = vrot.slane %v1850_v32, %v6134_v3  ;;  %v3010_v18 = vrot.slane %v1852_v35, %v6134_v3  ;;  %v7406_v26 = vcombine.low %v2986_v61, %v2990_v7  ;;  %v1803_v27 = vcombine.high %v1787_v38, %v1787_v38  ;;  %v8047_v32 = vld [vmem:[#allocation32_spill] sm:$0xff]  ;;  %v8048_v7 = vld [vmem:[#allocation35_spill] sm:$0xff] }
 0x1ba   : > { %v1804_v17 = vcombine.high %v1794_v49, %v1794_v49  ;;  %v1805_v57 = vcombine.high %v1801_v54, %v1801_v54  ;;  %v3014_v60 = vrot.slane %v1854_v48, %v6134_v3  ;;  %v4054_v44 = vcombine.low %v2994_v46, %v2998_v19  ;;  %v8051_v19 = vld [vmem:[#allocation17_spill] sm:$0xff] }
 0x1bb   : > { %v7409_v33 = vcombine.low %v3002_v5, %v3006_v10  ;;  %v2954_v47 = vrot.slane %v1780_v41, %v6134_v3  ;;  %v4061_v1 = vrot.slane %v7406_v26, %v6136_v4  ;;  %v2958_v9 = vrot.slane %v1794_v49, %v6134_v3  ;;  %v8049_v5 = vld [vmem:[#allocation18_spill] sm:$0xff]  ;;  %v8052_v10 = vld [vmem:[#allocation21_spill] sm:$0xff] }
 0x1bc   : > { %v2962_v53 = vrot.slane %v1802_v55, %v6134_v3  ;;  %v2966_v24 = vrot.slane %v1804_v17, %v6134_v3  ;;  %v7418_v63 = vrot.slane %v4054_v44, %v6136_v4  ;;  %v4071_v58 = vcombine.low %v3010_v18, %v3014_v60 }
 0x1bd   : > { %v4078_v42 = vrot.slane %v7409_v33, %v6136_v4  ;;  %v2970_v0 = vrot.slane %v1787_v38, %v6134_v3  ;;  %v2974_v41 = vrot.slane %v1801_v54, %v6134_v3  ;;  %v2978_v29 = vrot.slane %v1803_v27, %v6134_v3  ;;  %v8050_v54 = vld [vmem:[#allocation20_spill] sm:$0xff] }
 0x1be   : > { %v2982_v40 = vrot.slane %v1805_v57, %v6134_v3  ;;  %v4019_v61 = vcombine.low %v2954_v47, %v2958_v9  ;;  %v4020_v49 = vcombine.low %v2962_v53, %v2966_v24  ;;  %v4018_v45 = vcombine.low %v4010_v52, %v7344_v62  ;;  %v7480_v24 = vpop.permute.xlu0 %5021 }
 0x1bf   : > { %v4001_v38 = vcombine.low %v3993_v43, %v7311_v21  ;;  %v614_v35 = vadd.f32 %v7439_v50, %v8047_v32  ;;  %v4036_v52 = vcombine.low %v2970_v0, %v2974_v41  ;;  %v609_v59 = vadd.f32 %v7439_v50, %v8048_v7 }
 0x1c0   : > { %v4027_v34 = vrot.slane %v4019_v61, %v6136_v4  ;;  %v4037_v62 = vcombine.low %v2978_v29, %v2982_v40  ;;  %v4034_v43 = vrot.slane %v4020_v49, %v6136_v4  ;;  %4467 = vst.msk [vmem:[%s6221_s8 + $0x298] sm:$0xff] %vm4423_vm2, %v4018_v45  ;;  %5527 = vst.msk [vmem:[%s6221_s8 + $0x2b8] sm:$0xff] %vm4423_vm2, %v4018_v45  ;;  %v7488_v40 = vpop.permute.xlu1 %5023 }
 0x1c1   : > { %4466 = vst.msk [vmem:[%s6221_s8 + $0x290] sm:$0xff] %vm4423_vm2, %v4001_v38  ;;  %5526 = vst.msk [vmem:[%s6221_s8 + $0x2b0] sm:$0xff] %vm4423_vm2, %v4001_v38  ;;  %v1904_v21 = vcombine.high %v614_v35, %v614_v35  ;;  %v1911_v20 = vrot.slane %v614_v35, %v6123_v28  ;;  %v7459_v8 = vrot.slane %v4071_v58, %v6136_v4 }
 0x1c2   : > { %v4044_v46 = vrot.slane %v4036_v52, %v6136_v4  ;;  %5277 = vst.msk [vmem:[%s6221_s8 + $0x298] sm:$0xff] %vm5193_vm3, %v8049_v5  ;;  %5276 = vst.msk [vmem:[%s6221_s8 + $0x290] sm:$0xff] %vm5193_vm3, %v8050_v54  ;;  %v1855_v55 = vcombine.high %v609_v59, %v609_v59  ;;  %v1862_v48 = vrot.slane %v609_v59, %v6123_v28 }
 0x1c3   : > { %5281 = vst.msk [vmem:[%s6221_s8 + $0x2b8] sm:$0xff] %vm5193_vm3, %v8051_v19  ;;  %5280 = vst.msk [vmem:[%s6221_s8 + $0x2b0] sm:$0xff] %vm5193_vm3, %v8052_v10  ;;  %v4051_v18 = vrot.slane %v4037_v62, %v6136_v4  ;;  %v1918_v27 = vrot.slane %v1904_v21, %v6123_v28  ;;  %v1919_v17 = vcombine.high %v1911_v20, %v1911_v20 }
 0x1c4   : > { %v1927_v57 = vrot.slane %v1911_v20, %v6123_v28  ;;  %v4035_v60 = vcombine.low %v4027_v34, %v4034_v43  ;;  %v1869_v44 = vrot.slane %v1855_v55, %v6123_v28  ;;  %v1870_v47 = vcombine.high %v1862_v48, %v1862_v48 }
 0x1c5   : > { %v1878_v9 = vrot.slane %v1862_v48, %v6123_v28  ;;  %v4052_v53 = vcombine.low %v4044_v46, %v4051_v18  ;;  %v1920_v58 = vcombine.high %v1918_v27, %v1918_v27  ;;  %v1934_v0 = vrot.slane %v1918_v27, %v6123_v28  ;;  %v7525_v18 = vpop.permute.xlu1 %5027 }
 0x1c6   : > { %v1941_v41 = vrot.slane %v1919_v17, %v6123_v28  ;;  %v1949_v29 = vcombine.high %v1927_v57, %v1927_v57  ;;  %4468 = vst.msk [vmem:[%s6221_s8 + $0x2c0] sm:$0xff] %vm4423_vm2, %v4035_v60  ;;  %5528 = vst.msk [vmem:[%s6221_s8 + $0x2e0] sm:$0xff] %vm4423_vm2, %v4035_v60  ;;  %v3050_v61 = vrot.slane %v1927_v57, %v6134_v3 }
 0x1c7   : > { %v1871_v49 = vcombine.high %v1869_v44, %v1869_v44  ;;  %v1885_v45 = vrot.slane %v1869_v44, %v6123_v28  ;;  %v1892_v38 = vrot.slane %v1870_v47, %v6123_v28  ;;  %4469 = vst.msk [vmem:[%s6221_s8 + $0x2c8] sm:$0xff] %vm4423_vm2, %v4052_v53  ;;  %5529 = vst.msk [vmem:[%s6221_s8 + $0x2e8] sm:$0xff] %vm4423_vm2, %v4052_v53 }
 0x1c8   : > { %5282 = vst.msk [vmem:[%s6221_s8 + $0x2c0] sm:$0xff] %vm5193_vm3, %v7043_v39  ;;  %5286 = vst.msk [vmem:[%s6221_s8 + $0x2e0] sm:$0xff] %vm5193_vm3, %v7119_v22  ;;  %v1948_v32 = vrot.slane %v1920_v58, %v6123_v28  ;;  %v1950_v35 = vcombine.high %v1934_v0, %v1934_v0  ;;  %v1951_v34 = vcombine.high %v1941_v41, %v1941_v41 }
 0x1c9   : > { %v3054_v52 = vrot.slane %v1941_v41, %v6134_v3  ;;  %5283 = vst.msk [vmem:[%s6221_s8 + $0x2c8] sm:$0xff] %vm5193_vm3, %v7051_v11  ;;  %5287 = vst.msk [vmem:[%s6221_s8 + $0x2e8] sm:$0xff] %vm5193_vm3, %v7123_v23  ;;  %v3058_v62 = vrot.slane %v1949_v29, %v6134_v3  ;;  %v3066_v7 = vrot.slane %v1934_v0, %v6134_v3  ;;  %v7519_v23 = vpop.permute.xlu0 %5025 }
 0x1ca   : > { %v1899_v39 = vrot.slane %v1871_v49, %v6123_v28  ;;  %v1900_v59 = vcombine.high %v1878_v9, %v1878_v9  ;;  %v1952_v22 = vcombine.high %v1948_v32, %v1948_v32  ;;  %v3062_v43 = vrot.slane %v1951_v34, %v6134_v3 }
 0x1cb   : > { %v3070_v21 = vrot.slane %v1948_v32, %v6134_v3  ;;  %v3074_v20 = vrot.slane %v1950_v35, %v6134_v3  ;;  %v7517_v46 = vcombine.low %v3050_v61, %v3054_v52  ;;  %v1901_v11 = vcombine.high %v1885_v45, %v1885_v45 }
 0x1cc   : > { %v1902_v5 = vcombine.high %v1892_v38, %v1892_v38  ;;  %v1903_v54 = vcombine.high %v1899_v39, %v1899_v39  ;;  %v3078_v55 = vrot.slane %v1952_v22, %v6134_v3  ;;  %v4122_v48 = vcombine.low %v3058_v62, %v3062_v43  ;;  %v8054_v62 = vld [vmem:[#allocation7_spill] sm:$0xff] }
 0x1cd   : > { %v7522_v19 = vcombine.low %v3066_v7, %v3070_v21  ;;  %v3018_v10 = vrot.slane %v1878_v9, %v6134_v3  ;;  %v4129_v27 = vrot.slane %v7517_v46, %v6136_v4  ;;  %v3022_v17 = vrot.slane %v1892_v38, %v6134_v3  ;;  %v8053_v38 = vld [vmem:[#allocation4_spill] sm:$0xff]  ;;  %v7554_v33 = vpop.permute.xlu0 %5029 }
 0x1ce   : > { %v3026_v57 = vrot.slane %v1900_v59, %v6134_v3  ;;  %v3030_v60 = vrot.slane %v1902_v5, %v6134_v3  ;;  %v7533_v44 = vrot.slane %v4122_v48, %v6136_v4  ;;  %v4139_v47 = vcombine.low %v3074_v20, %v3078_v55 }
 0x1cf   : > { %v4146_v53 = vrot.slane %v7522_v19, %v6136_v4  ;;  %v3034_v9 = vrot.slane %v1885_v45, %v6134_v3  ;;  %v3038_v58 = vrot.slane %v1899_v39, %v6134_v3  ;;  %v3042_v0 = vrot.slane %v1901_v11, %v6134_v3 }
 0x1d0   : > { %v3046_v41 = vrot.slane %v1903_v54, %v6134_v3  ;;  %v4087_v29 = vcombine.low %v3018_v10, %v3022_v17  ;;  %v4088_v61 = vcombine.low %v3026_v57, %v3030_v60  ;;  %v4086_v49 = vcombine.low %v4078_v42, %v7459_v8  ;;  %v7569_v8 = vpop.permute.xlu1 %5031 }
 0x1d1   : > { %v4069_v45 = vcombine.low %v4061_v1, %v7418_v63  ;;  %v624_v32 = vadd.f32 %v7439_v50, %v8053_v38  ;;  %v4104_v34 = vcombine.low %v3034_v9, %v3038_v58  ;;  %v619_v7 = vadd.f32 %v7439_v50, %v8054_v62  ;;  %v7609_v9 = vpop.permute.xlu0 %5033 }
 0x1d2   : > { %v4095_v35 = vrot.slane %v4087_v29, %v6136_v4  ;;  %v4105_v52 = vcombine.low %v3042_v0, %v3046_v41  ;;  %v4102_v42 = vrot.slane %v4088_v61, %v6136_v4  ;;  %4471 = vst.msk [vmem:[%s6221_s8 + $0x2d8] sm:$0xff] %vm4423_vm2, %v4086_v49  ;;  %5531 = vst.msk [vmem:[%s6221_s8 + $0x2f8] sm:$0xff] %vm4423_vm2, %v4086_v49 }
 0x1d3   : > { %4470 = vst.msk [vmem:[%s6221_s8 + $0x2d0] sm:$0xff] %vm4423_vm2, %v4069_v45  ;;  %5530 = vst.msk [vmem:[%s6221_s8 + $0x2f0] sm:$0xff] %vm4423_vm2, %v4069_v45  ;;  %v2002_v26 = vcombine.high %v624_v32, %v624_v32  ;;  %v2009_v1 = vrot.slane %v624_v32, %v6123_v28  ;;  %v7567_v63 = vrot.slane %v4139_v47, %v6136_v4 }
 0x1d4   : > { %v4112_v39 = vrot.slane %v4104_v34, %v6136_v4  ;;  %5285 = vst.msk [vmem:[%s6221_s8 + $0x2d8] sm:$0xff] %vm5193_vm3, %v7106_v25  ;;  %5284 = vst.msk [vmem:[%s6221_s8 + $0x2d0] sm:$0xff] %vm5193_vm3, %v7100_v36  ;;  %v1953_v59 = vcombine.high %v619_v7, %v619_v7  ;;  %v1960_v22 = vrot.slane %v619_v7, %v6123_v28  ;;  %v7619_v61 = vpop.permute.xlu1 %5035 }
 0x1d5   : > { %5289 = vst.msk [vmem:[%s6221_s8 + $0x2f8] sm:$0xff] %vm5193_vm3, %v7212_v6  ;;  %5288 = vst.msk [vmem:[%s6221_s8 + $0x2f0] sm:$0xff] %vm5193_vm3, %v7202_v56  ;;  %v4119_v43 = vrot.slane %v4105_v52, %v6136_v4  ;;  %v2016_v21 = vrot.slane %v2002_v26, %v6123_v28  ;;  %v2017_v20 = vcombine.high %v2009_v1, %v2009_v1 }
 0x1d6   : > { %v2025_v25 = vrot.slane %v2009_v1, %v6123_v28  ;;  %v4103_v36 = vcombine.low %v4095_v35, %v4102_v42  ;;  %v1967_v11 = vrot.slane %v1953_v59, %v6123_v28  ;;  %v1968_v5 = vcombine.high %v1960_v22, %v1960_v22 }
 0x1d7   : > { %v1976_v6 = vrot.slane %v1960_v22, %v6123_v28  ;;  %v4120_v54 = vcombine.low %v4112_v39, %v4119_v43  ;;  %v2018_v55 = vcombine.high %v2016_v21, %v2016_v21  ;;  %v2032_v56 = vrot.slane %v2016_v21, %v6123_v28  ;;  %v7638_v21 = vpop.permute.xlu0 %5037 }
 0x1d8   : > { %v2039_v48 = vrot.slane %v2017_v20, %v6123_v28  ;;  %v2047_v10 = vcombine.high %v2025_v25, %v2025_v25  ;;  %4472 = vst.msk [vmem:[%s6221_s8 + $0x300] sm:$0xff] %vm4423_vm2, %v4103_v36  ;;  %5532 = vst.msk [vmem:[%s6221_s8 + $0x320] sm:$0xff] %vm4423_vm2, %v4103_v36  ;;  %v3114_v17 = vrot.slane %v2025_v25, %v6134_v3 }
 0x1d9   : > { %v1969_v57 = vcombine.high %v1967_v11, %v1967_v11  ;;  %v1983_v60 = vrot.slane %v1967_v11, %v6123_v28  ;;  %v1990_v47 = vrot.slane %v1968_v5, %v6123_v28  ;;  %4473 = vst.msk [vmem:[%s6221_s8 + $0x308] sm:$0xff] %vm4423_vm2, %v4120_v54  ;;  %5533 = vst.msk [vmem:[%s6221_s8 + $0x328] sm:$0xff] %vm4423_vm2, %v4120_v54  ;;  %v7646_v5 = vpop.permute.xlu1 %5039 }
 0x1da   : > { %5290 = vst.msk [vmem:[%s6221_s8 + $0x300] sm:$0xff] %vm5193_vm3, %v7285_v12  ;;  %5294 = vst.msk [vmem:[%s6221_s8 + $0x320] sm:$0xff] %vm5193_vm3, %v7361_v13  ;;  %v2046_v58 = vrot.slane %v2018_v55, %v6123_v28  ;;  %v2048_v0 = vcombine.high %v2032_v56, %v2032_v56  ;;  %v2049_v41 = vcombine.high %v2039_v48, %v2039_v48 }
 0x1db   : > { %v3118_v29 = vrot.slane %v2039_v48, %v6134_v3  ;;  %5291 = vst.msk [vmem:[%s6221_s8 + $0x308] sm:$0xff] %vm5193_vm3, %v7289_v16  ;;  %5295 = vst.msk [vmem:[%s6221_s8 + $0x328] sm:$0xff] %vm5193_vm3, %v7365_v14  ;;  %v3122_v12 = vrot.slane %v2047_v10, %v6134_v3  ;;  %v3130_v13 = vrot.slane %v2032_v56, %v6134_v3 }
 0x1dc   : > { %v1997_v49 = vrot.slane %v1969_v57, %v6123_v28  ;;  %v1998_v45 = vcombine.high %v1976_v6, %v1976_v6  ;;  %v2050_v38 = vcombine.high %v2046_v58, %v2046_v58  ;;  %v3126_v32 = vrot.slane %v2049_v41, %v6134_v3  ;;  %v8055_v57 = vld [vmem:[#allocation3_spill] sm:$0xff]  ;;  %v8056_v41 = vld [vmem:[#allocation14_spill] sm:$0xff] }
 0x1dd   : > { %v3134_v35 = vrot.slane %v2046_v58, %v6134_v3  ;;  %v3138_v34 = vrot.slane %v2048_v0, %v6134_v3  ;;  %v7627_v16 = vcombine.low %v3114_v17, %v3118_v29  ;;  %v1999_v52 = vcombine.high %v1983_v60, %v1983_v60 }
 0x1de   : > { %v2000_v14 = vcombine.high %v1990_v47, %v1990_v47  ;;  %v2001_v62 = vcombine.high %v1997_v49, %v1997_v49  ;;  %v3142_v7 = vrot.slane %v2050_v38, %v6134_v3  ;;  %v4190_v42 = vcombine.low %v3122_v12, %v3126_v32  ;;  %v7696_v32 = vpop.permute.xlu1 %5043 }
 0x1df   : > { %v7630_v26 = vcombine.low %v3130_v13, %v3134_v35  ;;  %v3082_v1 = vrot.slane %v1976_v6, %v6134_v3  ;;  %v4197_v39 = vrot.slane %v7627_v16, %v6136_v4  ;;  %v3086_v59 = vrot.slane %v1990_v47, %v6134_v3 }
 0x1e0   : > { %v3090_v22 = vrot.slane %v1998_v45, %v6134_v3  ;;  %v3094_v43 = vrot.slane %v2000_v14, %v6134_v3  ;;  %v7641_v20 = vrot.slane %v4190_v42, %v6136_v4  ;;  %v4207_v25 = vcombine.low %v3138_v34, %v3142_v7 }
 0x1e1   : > { %v4214_v36 = vrot.slane %v7630_v26, %v6136_v4  ;;  %v3098_v11 = vrot.slane %v1983_v60, %v6134_v3  ;;  %v3102_v6 = vrot.slane %v1997_v49, %v6134_v3  ;;  %v3106_v54 = vrot.slane %v1999_v52, %v6134_v3  ;;  %v7692_v49 = vpop.permute.xlu0 %5041 }
 0x1e2   : > { %v3110_v55 = vrot.slane %v2001_v62, %v6134_v3  ;;  %v4155_v56 = vcombine.low %v3082_v1, %v3086_v59  ;;  %v4156_v48 = vcombine.low %v3090_v22, %v3094_v43  ;;  %v4154_v10 = vcombine.low %v4146_v53, %v7567_v63 }
 0x1e3   : > { %v4137_v17 = vcombine.low %v4129_v27, %v7533_v44  ;;  %v634_v60 = vadd.f32 %v7439_v50, %v8055_v57  ;;  %v4172_v58 = vcombine.low %v3098_v11, %v3102_v6  ;;  %v629_v19 = vadd.f32 %v7439_v50, %v8056_v41 }
 0x1e4   : > { %v4163_v47 = vrot.slane %v4155_v56, %v6136_v4  ;;  %v4173_v0 = vcombine.low %v3106_v54, %v3110_v55  ;;  %v4170_v53 = vrot.slane %v4156_v48, %v6136_v4  ;;  %4475 = vst.msk [vmem:[%s6221_s8 + $0x318] sm:$0xff] %vm4423_vm2, %v4154_v10  ;;  %5535 = vst.msk [vmem:[%s6221_s8 + $0x338] sm:$0xff] %vm4423_vm2, %v4154_v10 }
 0x1e5   : > { %4474 = vst.msk [vmem:[%s6221_s8 + $0x310] sm:$0xff] %vm4423_vm2, %v4137_v17  ;;  %5534 = vst.msk [vmem:[%s6221_s8 + $0x330] sm:$0xff] %vm4423_vm2, %v4137_v17  ;;  %v2100_v46 = vcombine.high %v634_v60, %v634_v60  ;;  %v2107_v27 = vrot.slane %v634_v60, %v6123_v28  ;;  %v7675_v44 = vrot.slane %v4207_v25, %v6136_v4 }
 0x1e6   : > { %v4180_v63 = vrot.slane %v4172_v58, %v6136_v4  ;;  %5293 = vst.msk [vmem:[%s6221_s8 + $0x318] sm:$0xff] %vm5193_vm3, %v7316_v30  ;;  %5292 = vst.msk [vmem:[%s6221_s8 + $0x310] sm:$0xff] %vm5193_vm3, %v7308_v51  ;;  %v2051_v29 = vcombine.high %v629_v19, %v629_v19  ;;  %v2058_v12 = vrot.slane %v629_v19, %v6123_v28 }
 0x1e7   : > { %5297 = vst.msk [vmem:[%s6221_s8 + $0x338] sm:$0xff] %vm5193_vm3, %v7404_v31  ;;  %5296 = vst.msk [vmem:[%s6221_s8 + $0x330] sm:$0xff] %vm5193_vm3, %v7399_v2  ;;  %v4187_v13 = vrot.slane %v4173_v0, %v6136_v4  ;;  %v2114_v30 = vrot.slane %v2100_v46, %v6123_v28  ;;  %v2115_v45 = vcombine.high %v2107_v27, %v2107_v27 }
 0x1e8   : > { %v2123_v51 = vrot.slane %v2107_v27, %v6123_v28  ;;  %v4171_v38 = vcombine.low %v4163_v47, %v4170_v53  ;;  %v2065_v31 = vrot.slane %v2051_v29, %v6123_v28  ;;  %v2066_v2 = vcombine.high %v2058_v12, %v2058_v12 }
 0x1e9   : > { %v2074_v35 = vrot.slane %v2058_v12, %v6123_v28  ;;  %v4188_v34 = vcombine.low %v4180_v63, %v4187_v13  ;;  %v2116_v52 = vcombine.high %v2114_v30, %v2114_v30  ;;  %v2130_v14 = vrot.slane %v2114_v30, %v6123_v28 }
 0x1ea   : > { %v2137_v62 = vrot.slane %v2115_v45, %v6123_v28  ;;  %v2145_v7 = vcombine.high %v2123_v51, %v2123_v51  ;;  %4476 = vst.msk [vmem:[%s6221_s8 + $0x340] sm:$0xff] %vm4423_vm2, %v4171_v38  ;;  %5536 = vst.msk [vmem:[%s6221_s8 + $0x360] sm:$0xff] %vm4423_vm2, %v4171_v38  ;;  %v3178_v42 = vrot.slane %v2123_v51, %v6134_v3 }
 0x1eb   : > { %v2067_v1 = vcombine.high %v2065_v31, %v2065_v31  ;;  %v2081_v59 = vrot.slane %v2065_v31, %v6123_v28  ;;  %v2088_v22 = vrot.slane %v2066_v2, %v6123_v28  ;;  %4477 = vst.msk [vmem:[%s6221_s8 + $0x348] sm:$0xff] %vm4423_vm2, %v4188_v34  ;;  %5537 = vst.msk [vmem:[%s6221_s8 + $0x368] sm:$0xff] %vm4423_vm2, %v4188_v34 }
 0x1ec   : > { %5298 = vst.msk [vmem:[%s6221_s8 + $0x340] sm:$0xff] %vm5193_vm3, %v7426_v37  ;;  %5302 = vst.msk [vmem:[%s6221_s8 + $0x360] sm:$0xff] %vm5193_vm3, %v7519_v23  ;;  %v2144_v43 = vrot.slane %v2116_v52, %v6123_v28  ;;  %v2146_v25 = vcombine.high %v2130_v14, %v2130_v14  ;;  %v2147_v11 = vcombine.high %v2137_v62, %v2137_v62  ;;  %v7730_v23 = vpop.permute.xlu0 %5045 }
 0x1ed   : > { %v3182_v6 = vrot.slane %v2137_v62, %v6134_v3  ;;  %5299 = vst.msk [vmem:[%s6221_s8 + $0x348] sm:$0xff] %vm5193_vm3, %v7443_v15  ;;  %5303 = vst.msk [vmem:[%s6221_s8 + $0x368] sm:$0xff] %vm5193_vm3, %v7525_v18  ;;  %v3186_v54 = vrot.slane %v2145_v7, %v6134_v3  ;;  %v3194_v55 = vrot.slane %v2130_v14, %v6134_v3  ;;  %v7735_v15 = vpop.permute.xlu1 %5047  ;;  %v8057_v62 = vld [vmem:[#allocation8_spill] sm:$0xff] }
 0x1ee   : > { %v2095_v37 = vrot.slane %v2067_v1, %v6123_v28  ;;  %v2096_v56 = vcombine.high %v2074_v35, %v2074_v35  ;;  %v2148_v48 = vcombine.high %v2144_v43, %v2144_v43  ;;  %v3190_v10 = vrot.slane %v2147_v11, %v6134_v3 }
 0x1ef   : > { %v3198_v17 = vrot.slane %v2144_v43, %v6134_v3  ;;  %v3202_v57 = vrot.slane %v2146_v25, %v6134_v3  ;;  %v7737_v60 = vcombine.low %v3178_v42, %v3182_v6  ;;  %v2097_v18 = vcombine.high %v2081_v59, %v2081_v59  ;;  %v8058_v43 = vld [vmem:[#allocation13_spill] sm:$0xff] }
 0x1f0   : > { %v2098_v47 = vcombine.high %v2088_v22, %v2088_v22  ;;  %v2099_v58 = vcombine.high %v2095_v37, %v2095_v37  ;;  %v3206_v0 = vrot.slane %v2148_v48, %v6134_v3  ;;  %v4258_v41 = vcombine.low %v3186_v54, %v3190_v10 }
 0x1f1   : > { %v7740_v19 = vcombine.low %v3194_v55, %v3198_v17  ;;  %v3146_v53 = vrot.slane %v2074_v35, %v6134_v3  ;;  %v4265_v46 = vrot.slane %v7737_v60, %v6136_v4  ;;  %v3150_v27 = vrot.slane %v2088_v22, %v6134_v3  ;;  %v7757_v35 = vpop.permute.xlu0 %5049  ;;  %v7769_v42 = vpop.permute.xlu1 %5051 }
 0x1f2   : > { %v3154_v63 = vrot.slane %v2096_v56, %v6134_v3  ;;  %v3158_v29 = vrot.slane %v2098_v47, %v6134_v3  ;;  %v7749_v12 = vrot.slane %v4258_v41, %v6136_v4  ;;  %v4275_v13 = vcombine.low %v3202_v57, %v3206_v0 }
 0x1f3   : > { %v4282_v30 = vrot.slane %v7740_v19, %v6136_v4  ;;  %v3162_v45 = vrot.slane %v2081_v59, %v6134_v3  ;;  %v3166_v51 = vrot.slane %v2095_v37, %v6134_v3  ;;  %v3170_v38 = vrot.slane %v2097_v18, %v6134_v3 }
 0x1f4   : > { %v3174_v31 = vrot.slane %v2099_v58, %v6134_v3  ;;  %v4223_v2 = vcombine.low %v3146_v53, %v3150_v27  ;;  %v4224_v34 = vcombine.low %v3154_v63, %v3158_v29  ;;  %v4222_v52 = vcombine.low %v4214_v36, %v7675_v44 }
 0x1f5   : > { %v4205_v14 = vcombine.low %v4197_v39, %v7641_v20  ;;  %v644_v7 = vadd.f32 %v7439_v50, %v8057_v62  ;;  %v4240_v59 = vcombine.low %v3162_v45, %v3166_v51  ;;  %v639_v26 = vadd.f32 %v7439_v50, %v8058_v43  ;;  %v7814_v18 = vpop.permute.xlu1 %5055 }
 0x1f6   : > { %v4231_v1 = vrot.slane %v4223_v2, %v6136_v4  ;;  %v4241_v22 = vcombine.low %v3170_v38, %v3174_v31  ;;  %v4238_v36 = vrot.slane %v4224_v34, %v6136_v4  ;;  %4479 = vst.msk [vmem:[%s6221_s8 + $0x358] sm:$0xff] %vm4423_vm2, %v4222_v52  ;;  %5539 = vst.msk [vmem:[%s6221_s8 + $0x378] sm:$0xff] %vm4423_vm2, %v4222_v52 }
 0x1f7   : > { %4478 = vst.msk [vmem:[%s6221_s8 + $0x350] sm:$0xff] %vm4423_vm2, %v4205_v14  ;;  %5538 = vst.msk [vmem:[%s6221_s8 + $0x370] sm:$0xff] %vm4423_vm2, %v4205_v14  ;;  %v2198_v16 = vcombine.high %v644_v7, %v644_v7  ;;  %v2205_v39 = vrot.slane %v644_v7, %v6123_v28  ;;  %v7785_v20 = vrot.slane %v4275_v13, %v6136_v4 }
 0x1f8   : > { %v4248_v44 = vrot.slane %v4240_v59, %v6136_v4  ;;  %5301 = vst.msk [vmem:[%s6221_s8 + $0x358] sm:$0xff] %vm5193_vm3, %v7488_v40  ;;  %5300 = vst.msk [vmem:[%s6221_s8 + $0x350] sm:$0xff] %vm5193_vm3, %v7480_v24  ;;  %v2149_v50 = vcombine.high %v639_v26, %v639_v26  ;;  %v2156_v25 = vrot.slane %v639_v26, %v6123_v28 }
 0x1f9   : > { %5305 = vst.msk [vmem:[%s6221_s8 + $0x378] sm:$0xff] %vm5193_vm3, %v7569_v8  ;;  %5304 = vst.msk [vmem:[%s6221_s8 + $0x370] sm:$0xff] %vm5193_vm3, %v7554_v33  ;;  %v4255_v11 = vrot.slane %v4241_v22, %v6136_v4  ;;  %v2212_v6 = vrot.slane %v2198_v16, %v6123_v28  ;;  %v2213_v54 = vcombine.high %v2205_v39, %v2205_v39  ;;  %v7806_v33 = vpop.permute.xlu0 %5053 }
 0x1fa   : > { %v2221_v40 = vrot.slane %v2205_v39, %v6123_v28  ;;  %v4239_v55 = vcombine.low %v4231_v1, %v4238_v36  ;;  %v2163_v24 = vrot.slane %v2149_v50, %v6123_v28  ;;  %v2164_v37 = vcombine.high %v2156_v25, %v2156_v25 }
 0x1fb   : > { %v2172_v8 = vrot.slane %v2156_v25, %v6123_v28  ;;  %v4256_v56 = vcombine.low %v4248_v44, %v4255_v11  ;;  %v2214_v48 = vcombine.high %v2212_v6, %v2212_v6  ;;  %v2228_v10 = vrot.slane %v2212_v6, %v6123_v28 }
 0x1fc   : > { %v2235_v17 = vrot.slane %v2213_v54, %v6123_v28  ;;  %v2243_v57 = vcombine.high %v2221_v40, %v2221_v40  ;;  %4480 = vst.msk [vmem:[%s6221_s8 + $0x380] sm:$0xff] %vm4423_vm2, %v4239_v55  ;;  %5540 = vst.msk [vmem:[%s6221_s8 + $0x3a0] sm:$0xff] %vm4423_vm2, %v4239_v55  ;;  %v3242_v47 = vrot.slane %v2221_v40, %v6134_v3 }
 0x1fd   : > { %v2165_v58 = vcombine.high %v2163_v24, %v2163_v24  ;;  %v2179_v0 = vrot.slane %v2163_v24, %v6123_v28  ;;  %v2186_v41 = vrot.slane %v2164_v37, %v6123_v28  ;;  %4481 = vst.msk [vmem:[%s6221_s8 + $0x388] sm:$0xff] %vm4423_vm2, %v4256_v56  ;;  %5541 = vst.msk [vmem:[%s6221_s8 + $0x3a8] sm:$0xff] %vm4423_vm2, %v4256_v56  ;;  %v5058_v62 = vpop.permute.xlu0 %5057 }
 0x1fe   : > { %5306 = vst.msk [vmem:[%s6221_s8 + $0x380] sm:$0xff] %vm5193_vm3, %v7609_v9  ;;  %5310 = vst.msk [vmem:[%s6221_s8 + $0x3a0] sm:$0xff] %vm5193_vm3, %v7692_v49  ;;  %v2242_v53 = vrot.slane %v2214_v48, %v6123_v28  ;;  %v2244_v27 = vcombine.high %v2228_v10, %v2228_v10  ;;  %v2245_v63 = vcombine.high %v2235_v17, %v2235_v17 }
 0x1ff   : > { %v3246_v29 = vrot.slane %v2235_v17, %v6134_v3  ;;  %5307 = vst.msk [vmem:[%s6221_s8 + $0x388] sm:$0xff] %vm5193_vm3, %v7619_v61  ;;  %5311 = vst.msk [vmem:[%s6221_s8 + $0x3a8] sm:$0xff] %vm5193_vm3, %v7696_v32  ;;  %v3250_v13 = vrot.slane %v2243_v57, %v6134_v3  ;;  %v3258_v45 = vrot.slane %v2228_v10, %v6134_v3 }
 0x200   : > { %v2193_v9 = vrot.slane %v2165_v58, %v6123_v28  ;;  %v2194_v51 = vcombine.high %v2172_v8, %v2172_v8  ;;  %v2246_v49 = vcombine.high %v2242_v53, %v2242_v53  ;;  %v3254_v38 = vrot.slane %v2245_v63, %v6134_v3  ;;  %v5060_v28 = vpop.permute.xlu1 %5059 }
 0x201   : > { %v3262_v31 = vrot.slane %v2242_v53, %v6134_v3  ;;  %v3266_v2 = vrot.slane %v2244_v27, %v6134_v3  ;;  %v4325_v34 = vcombine.low %v3242_v47, %v3246_v29  ;;  %v2195_v52 = vcombine.high %v2179_v0, %v2179_v0  ;;  %v5062_v19 = vpop.permute.xlu0 %5061 }
 0x202   : > { %v2196_v61 = vcombine.high %v2186_v41, %v2186_v41  ;;  %v2197_v14 = vcombine.high %v2193_v9, %v2193_v9  ;;  %v3270_v32 = vrot.slane %v2246_v49, %v6134_v3  ;;  %v4326_v7 = vcombine.low %v3250_v13, %v3254_v38 }
 0x203   : > { %v4342_v1 = vcombine.low %v3258_v45, %v3262_v31  ;;  %v3210_v59 = vrot.slane %v2172_v8, %v6134_v3  ;;  %v4333_v22 = vrot.slane %v4325_v34, %v6136_v4  ;;  %v3214_v43 = vrot.slane %v2186_v41, %v6134_v3 }
 0x204   : > { %v3218_v26 = vrot.slane %v2194_v51, %v6134_v3  ;;  %v3222_v36 = vrot.slane %v2196_v61, %v6134_v3  ;;  %v4340_v16 = vrot.slane %v4326_v7, %v6136_v4  ;;  %v4343_v39 = vcombine.low %v3266_v2, %v3270_v32 }
 0x205   : > { %v4350_v44 = vrot.slane %v4342_v1, %v6136_v4  ;;  %v3226_v50 = vrot.slane %v2179_v0, %v6134_v3  ;;  %v3230_v25 = vrot.slane %v2193_v9, %v6134_v3  ;;  %v3234_v11 = vrot.slane %v2195_v52, %v6134_v3 }
 0x206   : > { %v3238_v6 = vrot.slane %v2197_v14, %v6134_v3  ;;  %v4291_v54 = vcombine.low %v3210_v59, %v3214_v43  ;;  %v4292_v40 = vcombine.low %v3218_v26, %v3222_v36  ;;  %v4290_v55 = vcombine.low %v4282_v30, %v7785_v20 }
 0x207   : > { %v4273_v24 = vcombine.low %v4265_v46, %v7749_v12  ;;  %v4357_v37 = vrot.slane %v4343_v39, %v6136_v4  ;;  %v4308_v3 = vcombine.low %v3226_v50, %v3230_v25  ;;  %v4341_v48 = vcombine.low %v4333_v22, %v4340_v16  ;;  %v5064_v46 = vpop.permute.xlu1 %5063 }
 0x208   : > { %v4299_v8 = vrot.slane %v4291_v54, %v6136_v4  ;;  %v4309_v56 = vcombine.low %v3234_v11, %v3238_v6  ;;  %v4306_v30 = vrot.slane %v4292_v40, %v6136_v4  ;;  %4483 = vst.msk [vmem:[%s6221_s8 + $0x398] sm:$0xff] %vm4423_vm2, %v4290_v55  ;;  %5543 = vst.msk [vmem:[%s6221_s8 + $0x3b8] sm:$0xff] %vm4423_vm2, %v4290_v55 }
 0x209   : > { %4482 = vst.msk [vmem:[%s6221_s8 + $0x390] sm:$0xff] %vm4423_vm2, %v4273_v24  ;;  %5542 = vst.msk [vmem:[%s6221_s8 + $0x3b0] sm:$0xff] %vm4423_vm2, %v4273_v24  ;;  %v4358_v60 = vcombine.low %v4350_v44, %v4357_v37  ;;  %v4316_v12 = vrot.slane %v4308_v3, %v6136_v4 }
 0x20a   : > { %5309 = vst.msk [vmem:[%s6221_s8 + $0x398] sm:$0xff] %vm5193_vm3, %v7646_v5  ;;  %5308 = vst.msk [vmem:[%s6221_s8 + $0x390] sm:$0xff] %vm5193_vm3, %v7638_v21  ;;  %v4323_v20 = vrot.slane %v4309_v56, %v6136_v4  ;;  %v4307_v5 = vcombine.low %v4299_v8, %v4306_v30 }
 0x20b   : > { %5313 = vst.msk [vmem:[%s6221_s8 + $0x3b8] sm:$0xff] %vm5193_vm3, %v7735_v15  ;;  %5312 = vst.msk [vmem:[%s6221_s8 + $0x3b0] sm:$0xff] %vm5193_vm3, %v7730_v23 }
 0x20c   : > { %4486 = vst.msk [vmem:[%s6221_s8 + $0x3d0] sm:$0xff] %vm4423_vm2, %v4341_v48  ;;  %5546 = vst.msk [vmem:[%s6221_s8 + $0x3f0] sm:$0xff] %vm4423_vm2, %v4341_v48  ;;  %v4324_v21 = vcombine.low %v4316_v12, %v4323_v20 }
 0x20d   : > { %4487 = vst.msk [vmem:[%s6221_s8 + $0x3d8] sm:$0xff] %vm4423_vm2, %v4358_v60  ;;  %5547 = vst.msk [vmem:[%s6221_s8 + $0x3f8] sm:$0xff] %vm4423_vm2, %v4358_v60 }
 0x20e   : > { %5316 = vst.msk [vmem:[%s6221_s8 + $0x3d0] sm:$0xff] %vm5193_vm3, %v7806_v33  ;;  %5320 = vst.msk [vmem:[%s6221_s8 + $0x3f0] sm:$0xff] %vm5193_vm3, %v5062_v19 }
 0x20f   : > { %5317 = vst.msk [vmem:[%s6221_s8 + $0x3d8] sm:$0xff] %vm5193_vm3, %v7814_v18  ;;  %5321 = vst.msk [vmem:[%s6221_s8 + $0x3f8] sm:$0xff] %vm5193_vm3, %v5064_v46 }
 0x210   : > { %4484 = vst.msk [vmem:[%s6221_s8 + $0x3c0] sm:$0xff] %vm4423_vm2, %v4307_v5  ;;  %5544 = vst.msk [vmem:[%s6221_s8 + $0x3e0] sm:$0xff] %vm4423_vm2, %v4307_v5 }
 0x211   : > { %4485 = vst.msk [vmem:[%s6221_s8 + $0x3c8] sm:$0xff] %vm4423_vm2, %v4324_v21  ;;  %5545 = vst.msk [vmem:[%s6221_s8 + $0x3e8] sm:$0xff] %vm4423_vm2, %v4324_v21 }
 0x212   : > { %5314 = vst.msk [vmem:[%s6221_s8 + $0x3c0] sm:$0xff] %vm5193_vm3, %v7757_v35  ;;  %5318 = vst.msk [vmem:[%s6221_s8 + $0x3e0] sm:$0xff] %vm5193_vm3, %v5058_v62 }
 0x213   : > { %5315 = vst.msk [vmem:[%s6221_s8 + $0x3c8] sm:$0xff] %vm5193_vm3, %v7769_v42  ;;  %5319 = vst.msk [vmem:[%s6221_s8 + $0x3e8] sm:$0xff] %vm5193_vm3, %v5060_v28 }
 0x214 PF: > { %s14_s17 = sadd.s32 1, %s5689_s17   ;;  %s8059_s15 = smov %s5685_s16 }
 0x215   : > { %p11_p5 = scmp.ge.s32.totalorder %s14_s17, 4   ;;  %s8060_s16 = smov %s8062_s18 }
 0x217   :  { %13 = sbr.rel (!%p11_p5) target bundleno = 2 (0x2), region = 70 }

</bundles_post_ra>
